<compile_context>
chip_gen: v5e
topology: v5e:2x2
jax: 0.10.0
libtpu: 0.0.40
codegen_flags: <defaults>
</compile_context>

<pallas_src>
import functools

import numpy as np
import jax
import jax.numpy as jnp
from jax import lax
from jax.experimental import pallas as pl
from jax.experimental.pallas import tpu as pltpu


# ---------------------------------------------------------------------------
# helpers
# ---------------------------------------------------------------------------
def _gelu_exact(x):
    # matches PyTorch F.gelu default (erf-based)
    return 0.5 * x * (1.0 + lax.erf(x * np.float32(1.0 / np.sqrt(2.0))))


def _round_up(x, m):
    return ((x + m - 1) // m) * m


def make_block_dft_mats(n_pad, np_eff, modes, bt):
    """Batch-block-diagonal real DFT / truncated inverse DFT matrices.

    Row/column orderings are chosen to match the in-kernel layouts exactly:
      dbig : (2*bt*M, bt*np_eff)  rows ordered (part, b, m), cols (b, n)
      idbig: (bt*np_eff, 2*bt*M)  rows ordered (b, n),        cols (part, b, m)
    part 0 = real (cos), part 1 = imag (-sin); columns / rows with n >= n_pad
    (dead alignment padding) are exactly zero.
    """
    assert modes <= n_pad // 2 + 1, "modes must be <= n_pad//2 + 1"
    n = np.arange(n_pad)
    k = np.arange(modes)
    ang = 2.0 * np.pi * np.outer(k, n) / n_pad          # (M, n_pad)
    cos_f = np.cos(ang)
    msin_f = -np.sin(ang)

    coef = np.full((modes,), 2.0)
    coef[0] = 1.0
    if n_pad % 2 == 0 and modes - 1 == n_pad // 2:       # Nyquist mode
        coef[-1] = 1.0
    icos = coef[:, None] * np.cos(ang) / n_pad           # (M, n_pad)
    misin = -coef[:, None] * np.sin(ang) / n_pad         # (M, n_pad)

    M = modes
    dbig = np.zeros((2 * bt * M, bt * np_eff), np.float32)
    idbig = np.zeros((bt * np_eff, 2 * bt * M), np.float32)
    for b in range(bt):
        r0 = b * M
        c0 = b * np_eff
        dbig[r0:r0 + M, c0:c0 + n_pad] = cos_f
        dbig[bt * M + r0:bt * M + r0 + M, c0:c0 + n_pad] = msin_f
        idbig[c0:c0 + n_pad, r0:r0 + M] = icos.T
        idbig[c0:c0 + n_pad, bt * M + r0:bt * M + r0 + M] = misin.T
    return jnp.asarray(dbig), jnp.asarray(idbig)


# ---------------------------------------------------------------------------
# fused forward kernel (one batch tile per grid step)
# ---------------------------------------------------------------------------
def _fno_forward_kernel(x_ref, w0_ref, dbig_ref, idbig_ref, wmix_ref,
                        wcbc_ref, w1_ref, head_ref, o_ref,
                        *, bt, modes, width, n_layers):
    f32 = jnp.float32
    M, W = modes, width
    MB = M * bt

    # ---- fc0 lift (+bias via ones-column) + zero padding (host-prepadded rows)
    # x_ref[0]: (bt*np_eff, cin+1); w0_ref: (cin+1, W)
    h = jnp.dot(x_ref[0], w0_ref[...], preferred_element_type=f32)   # (bt*npad, W)

    for l in range(n_layers):
        # ---- truncated rfft: one batch-folded standard matmul -------------
        xf = jnp.dot(dbig_ref[...], h, preferred_element_type=f32)   # (2*MB, W)

        # regroup to the mode-batched operand (M, bt, 2W): aligned row slices
        # + concatenates only (no reshape/transpose in-kernel).
        pieces = []
        for b in range(bt):
            xr_b = xf[b * M:(b + 1) * M, :]                 # (M, W) real part
            xi_b = xf[MB + b * M:MB + (b + 1) * M, :]       # (M, W) imag part
            pieces.append(jnp.concatenate([xr_b, xi_b], axis=1)[:, None, :])
        xri = pieces[0] if bt == 1 else jnp.concatenate(pieces, axis=1)

        # ---- merged complex channel mix: ONE mode-batched MXU matmul -------
        # wmix[l]: (M, 2W, 2W) = per-mode [[wr, wi], [-wi, wr]]
        ys = jnp.einsum('mbi,mio->mbo', xri, wmix_ref[l],
                        preferred_element_type=f32)                 # (M, bt, 2W)

        # back to stacked (part, b, m) rows for the inverse DFT
        ys2d = jnp.concatenate(
            [ys[:, b, :W] for b in range(bt)] +
            [ys[:, b, W:] for b in range(bt)], axis=0)              # (2*MB, W)

        # ---- truncated irfft: one batch-folded standard matmul ------------
        x1 = jnp.dot(idbig_ref[...], ys2d, preferred_element_type=f32)

        # ---- pointwise (kernel-size-1) conv, weight+bias packed -----------
        wcbc_l = wcbc_ref[l]                                        # (W+1, W)
        x2 = (jnp.dot(h, wcbc_l[:W, :], preferred_element_type=f32)
              + wcbc_l[W:, :])

        h = x1 + x2
        if l != n_layers - 1:
            h = _gelu_exact(h)

    # ---- head: fc1 + gelu + fc2 (lane-dense single-row output store) -------
    head = head_ref[...]                                            # (3, d1)
    h1 = _gelu_exact(jnp.dot(h, w1_ref[...], preferred_element_type=f32)
                     + head[0:1, :])                                # (bt*npad, d1)
    out = (jnp.einsum('ok,nk->on', head[1:2, :], h1,
                      preferred_element_type=f32)
           + head[2:3, 0:1])                                        # (1, bt*npad)
    o_ref[0] = out.astype(o_ref.dtype)


# ---------------------------------------------------------------------------
# wrapper: parameter repack + single pallas_call
# ---------------------------------------------------------------------------
def fno1d_forward(x, params, modes, n_layers, padding_frac, block_batch=None):
    b, s, cin = x.shape
    width = params["fc0_w"].shape[0]
    d1 = params["fc1_w"].shape[0]
    x_padding = int(round(s * padding_frac))
    n_pad = s + x_padding
    np_eff = _round_up(n_pad, 8)          # 8-aligned (sublane) padded length

    # Batch tile folded into every matmul.  (On v7x pick bt <= b//2 so the
    # "parallel" grid axis still has >=2 steps for megacore sharding.)
    if block_batch is None:
        block_batch = b if b <= 8 else 8
    bt = block_batch
    assert b % bt == 0, "batch must be divisible by block_batch"
    num_tiles = b // bt

    dbig, idbig = make_block_dft_mats(n_pad, np_eff, modes, bt)

    # ---- input: zero-pad spatial dim to np_eff and append a "ones" column so
    # fc0 bias + F.pad are folded into one matmul (pad rows stay exactly 0).
    x_pad = jnp.zeros((b, np_eff, cin + 1), jnp.float32)
    x_pad = x_pad.at[:, :s, :cin].set(x.astype(jnp.float32))
    x_pad = x_pad.at[:, :s, cin].set(1.0)
    x_aug = x_pad.reshape(num_tiles, bt * np_eff, cin + 1)

    # fc0 weight augmented with its bias as the last row
    w0aug = jnp.concatenate(
        [params["fc0_w"].T, params["fc0_b"][None, :]], axis=0)      # (cin+1, W)

    # merged per-mode complex-mix weights: (L, M, 2W, 2W), [[wr, wi], [-wi, wr]]
    def mix_block(wr, wi):                 # torch layout (in, out, modes)
        wr_m = jnp.transpose(wr, (2, 0, 1))                         # (M, W, W)
        wi_m = jnp.transpose(wi, (2, 0, 1))
        top = jnp.concatenate([wr_m, wi_m], axis=2)                 # (M, W, 2W)
        bot = jnp.concatenate([-wi_m, wr_m], axis=2)
        return jnp.concatenate([top, bot], axis=1)                  # (M, 2W, 2W)

    wmix_all = jnp.stack([mix_block(params["spec_wr"][l], params["spec_wi"][l])
                          for l in range(n_layers)])

    # 1x1-conv weight (transposed to (in, out)) + bias packed per layer
    wcbc_all = jnp.stack([
        jnp.concatenate([params["conv_w"][l].T,
                         params["conv_b"][l][None, :]], axis=0)
        for l in range(n_layers)])                                   # (L, W+1, W)

    w1T = params["fc1_w"].T                                          # (W, d1)
    head = jnp.zeros((3, d1), jnp.float32)
    head = head.at[0].set(params["fc1_b"])
    head = head.at[1].set(params["fc2_w"][0])
    head = head.at[2, 0].set(params["fc2_b"][0])

    def full_spec(a):
        nd = a.ndim
        return pl.BlockSpec(a.shape, lambda i, _n=nd: (0,) * _n)

    kernel = functools.partial(_fno_forward_kernel, bt=bt, modes=modes,
                               width=width, n_layers=n_layers)

    out = pl.pallas_call(
        kernel,
        out_shape=jax.ShapeDtypeStruct((num_tiles, 1, bt * np_eff), jnp.float32),
        grid=(num_tiles,),
        in_specs=[
            pl.BlockSpec((1, bt * np_eff, cin + 1), lambda i: (i, 0, 0)),
            full_spec(w0aug),
            full_spec(dbig),
            full_spec(idbig),
            full_spec(wmix_all),
            full_spec(wcbc_all),
            full_spec(w1T),
            full_spec(head),
        ],
        out_specs=pl.BlockSpec((1, 1, bt * np_eff), lambda i: (i, 0, 0)),
        compiler_params=pltpu.CompilerParams(
            dimension_semantics=("parallel",)),
        # NOTE: total weight residency here is ~1 MB so the default scoped VMEM
        # limit is ample; raise vmem_limit_bytes when scaling width/modes/bt.
    )(x_aug, w0aug, dbig, idbig, wmix_all, wcbc_all, w1T, head)

    return out.reshape(b, np_eff)[:, :s]


# ---------------------------------------------------------------------------
# pure-JAX reference (torch semantics, fft-based) for correctness check
# ---------------------------------------------------------------------------
def reference_forward(x, params, modes, n_layers, padding_frac):
    with jax.default_matmul_precision("float32"):
        b, s, _ = x.shape
        width = params["fc0_w"].shape[0]
        h = x @ params["fc0_w"].T + params["fc0_b"]
        h = jnp.transpose(h, (0, 2, 1))                       # (B, W, s)
        pad = int(round(s * padding_frac))
        h = jnp.pad(h, ((0, 0), (0, 0), (0, pad)))
        n_pad = s + pad
        for k in range(n_layers):
            hf = jnp.fft.rfft(h, axis=-1)
            w = params["spec_wr"][k] + 1j * params["spec_wi"][k]   # (in,out,M)
            out_ft = jnp.zeros((b, width, n_pad // 2 + 1), jnp.complex64)
            out_ft = out_ft.at[:, :, :modes].set(
                jnp.einsum("bix,iox->box", hf[:, :, :modes], w))
            x1 = jnp.fft.irfft(out_ft, n=n_pad, axis=-1)
            x2 = (jnp.einsum("oi,bin->bon", params["conv_w"][k], h)
                  + params["conv_b"][k].reshape(1, width, 1))
            h = x1 + x2
            if k != n_layers - 1:
                h = _gelu_exact(h)
        h = h[..., :s]
        h = jnp.transpose(h, (0, 2, 1))
        h = _gelu_exact(h @ params["fc1_w"].T + params["fc1_b"])
        h = h @ params["fc2_w"].T + params["fc2_b"]
        return h[..., 0]


# ---------------------------------------------------------------------------
# deterministic parameter init (shapes from FNO1d.__init__, torch layouts)
# ---------------------------------------------------------------------------
def init_params(key, nfun, width, modes, n_layers):
    ks = iter(jax.random.split(key, 6 + 4 * n_layers))

    def u(k, shape, bound):
        return jax.random.uniform(k, shape, jnp.float32, -bound, bound)

    cin = nfun + 1
    p = {}
    p["fc0_w"] = u(next(ks), (width, cin), 1.0 / np.sqrt(cin))
    p["fc0_b"] = u(next(ks), (width,), 1.0 / np.sqrt(cin))
    scale = 1.0 / (width * width)
    p["spec_wr"], p["spec_wi"], p["conv_w"], p["conv_b"] = [], [], [], []
    for _ in range(n_layers):
        # torch.rand(in, out, modes, cfloat) -> real / imag parts
        p["spec_wr"].append(scale * jax.random.uniform(
            next(ks), (width, width, modes), jnp.float32))
        p["spec_wi"].append(scale * jax.random.uniform(
            next(ks), (width, width, modes), jnp.float32))
        # Conv1d(width, width, 1) weight (out, in)
        p["conv_w"].append(u(next(ks), (width, width), 1.0 / np.sqrt(width)))
        p["conv_b"].append(u(next(ks), (width,), 1.0 / np.sqrt(width)))
    p["fc1_w"] = u(next(ks), (128, width), 1.0 / np.sqrt(width))
    p["fc1_b"] = u(next(ks), (128,), 1.0 / np.sqrt(width))
    p["fc2_w"] = u(next(ks), (1, 128), 1.0 / np.sqrt(128))
    p["fc2_b"] = u(next(ks), (1,), 1.0 / np.sqrt(128))
    return p


if __name__ == "__main__":
    arch = {"modes": 8, "width": 32, "n_layers": 4, "retrain": 0}
    nfun = 1
    padding_frac = 1.0 / 4.0
    B, S = 2, 16

    key = jax.random.PRNGKey(0)
    kx, kp = jax.random.split(key)
    x = jax.random.normal(kx, (B, S, nfun + 1), jnp.float32)
    params = init_params(kp, nfun, arch["width"], arch["modes"],
                         arch["n_layers"])

    out = fno1d_forward(x, params, arch["modes"], arch["n_layers"],
                        padding_frac)
    out = jax.block_until_ready(out)
    assert out.shape == (B, S)

    ref = reference_forward(x, params, arch["modes"], arch["n_layers"],
                            padding_frac)
    np.testing.assert_allclose(np.asarray(out), np.asarray(ref),
                               rtol=2e-2, atol=2e-2)

    print("KERNEL_OK")
</pallas_src>

<mosaic_0001>
module attributes {stable_mosaic.version = 11 : i64} {
  func.func @_fno_forward_kernel(%arg0: i32, %arg1: memref<1x48x3xf32, #tpu.memory_space<vmem>>, %arg2: memref<3x32xf32, #tpu.memory_space<vmem>>, %arg3: memref<32x48xf32, #tpu.memory_space<vmem>>, %arg4: memref<48x32xf32, #tpu.memory_space<vmem>>, %arg5: memref<4x8x64x64xf32, #tpu.memory_space<vmem>>, %arg6: memref<4x33x32xf32, #tpu.memory_space<vmem>>, %arg7: memref<32x128xf32, #tpu.memory_space<vmem>>, %arg8: memref<3x128xf32, #tpu.memory_space<vmem>>, %arg9: memref<1x1x48xf32, #tpu.memory_space<vmem>>) attributes {dimension_semantics = [#tpu.dimension_semantics<parallel>], iteration_bounds = array<i64: 1>, scalar_prefetch = 0 : i64, scratch_operands = 0 : i64, tpu.core_type = #tpu.core_type<tc>, window_params = [{transform_indices = @transform_0, window_bounds = array<i64: 1, 48, 3>}, {pipeline_mode = #tpu.pipeline_mode<synchronous>, transform_indices = @transform_1, window_bounds = array<i64: 3, 32>}, {pipeline_mode = #tpu.pipeline_mode<synchronous>, transform_indices = @transform_2, window_bounds = array<i64: 32, 48>}, {pipeline_mode = #tpu.pipeline_mode<synchronous>, transform_indices = @transform_3, window_bounds = array<i64: 48, 32>}, {pipeline_mode = #tpu.pipeline_mode<synchronous>, transform_indices = @transform_4, window_bounds = array<i64: 4, 8, 64, 64>}, {pipeline_mode = #tpu.pipeline_mode<synchronous>, transform_indices = @transform_5, window_bounds = array<i64: 4, 33, 32>}, {pipeline_mode = #tpu.pipeline_mode<synchronous>, transform_indices = @transform_6, window_bounds = array<i64: 32, 128>}, {pipeline_mode = #tpu.pipeline_mode<synchronous>, transform_indices = @transform_7, window_bounds = array<i64: 3, 128>}, {transform_indices = @transform_8, window_bounds = array<i64: 1, 1, 48>}]} {
    %c0 = arith.constant 0 : index
    %c0_0 = arith.constant 0 : index
    %c0_1 = arith.constant 0 : index
    %0 = vector.load %arg1[%c0, %c0_0, %c0_1] : memref<1x48x3xf32, #tpu.memory_space<vmem>>, vector<1x48x3xf32>
    %1 = vector.shape_cast %0 : vector<1x48x3xf32> to vector<48x3xf32>
    %c0_2 = arith.constant 0 : index
    %c0_3 = arith.constant 0 : index
    %2 = vector.load %arg2[%c0_2, %c0_3] : memref<3x32xf32, #tpu.memory_space<vmem>>, vector<3x32xf32>
    %cst = arith.constant dense<0.000000e+00> : vector<48x32xf32>
    %3 = tpu.matmul %1, %2, %cst {dimension_numbers = #tpu.dot_dimension_numbers<[1], [0], [0], [1], [0, 0, 1, 1], [], []>} : vector<48x3xf32>, vector<3x32xf32>, vector<48x32xf32> -> vector<48x32xf32>
    %c0_4 = arith.constant 0 : index
    %c0_5 = arith.constant 0 : index
    %4 = vector.load %arg3[%c0_4, %c0_5] : memref<32x48xf32, #tpu.memory_space<vmem>>, vector<32x48xf32>
    %cst_6 = arith.constant dense<0.000000e+00> : vector<32x32xf32>
    %5 = tpu.matmul %4, %3, %cst_6 {dimension_numbers = #tpu.dot_dimension_numbers<[1], [0], [0], [1], [0, 0, 1, 1], [], []>} : vector<32x48xf32>, vector<48x32xf32>, vector<32x32xf32> -> vector<32x32xf32>
    %6 = vector.extract_strided_slice %5 {offsets = [0, 0], sizes = [8, 32], strides = [1, 1]} : vector<32x32xf32> to vector<8x32xf32>
    %7 = vector.extract_strided_slice %5 {offsets = [16, 0], sizes = [8, 32], strides = [1, 1]} : vector<32x32xf32> to vector<8x32xf32>
    %8 = tpu.concatenate %6, %7 in 1 : vector<8x32xf32>, vector<8x32xf32> -> vector<8x64xf32>
    %9 = vector.shape_cast %8 : vector<8x64xf32> to vector<8x1x64xf32>
    %10 = vector.extract_strided_slice %5 {offsets = [8, 0], sizes = [8, 32], strides = [1, 1]} : vector<32x32xf32> to vector<8x32xf32>
    %11 = vector.extract_strided_slice %5 {offsets = [24, 0], sizes = [8, 32], strides = [1, 1]} : vector<32x32xf32> to vector<8x32xf32>
    %12 = tpu.concatenate %10, %11 in 1 : vector<8x32xf32>, vector<8x32xf32> -> vector<8x64xf32>
    %13 = vector.shape_cast %12 : vector<8x64xf32> to vector<8x1x64xf32>
    %14 = tpu.concatenate %9, %13 in 1 : vector<8x1x64xf32>, vector<8x1x64xf32> -> vector<8x2x64xf32>
    %c0_7 = arith.constant 0 : index
    %c0_8 = arith.constant 0 : index
    %c0_9 = arith.constant 0 : index
    %c0_10 = arith.constant 0 : index
    %15 = vector.load %arg5[%c0_7, %c0_8, %c0_9, %c0_10] : memref<4x8x64x64xf32, #tpu.memory_space<vmem>>, vector<1x8x64x64xf32>
    %16 = vector.shape_cast %15 : vector<1x8x64x64xf32> to vector<8x64x64xf32>
    "tpu.trace_start"() <{level = 10 : i32, message = "mbi,mio->mbo"}> : () -> ()
    %cst_11 = arith.constant dense<0.000000e+00> : vector<8x2x64xf32>
    %17 = tpu.matmul %14, %16, %cst_11 {dimension_numbers = #tpu.dot_dimension_numbers<[2], [1], [1], [2], [0, 0, 0, 1, 1, 2], [0], [0]>} : vector<8x2x64xf32>, vector<8x64x64xf32>, vector<8x2x64xf32> -> vector<8x2x64xf32>
    "tpu.trace_stop"() : () -> ()
    %18 = vector.extract_strided_slice %17 {offsets = [0, 0, 0], sizes = [8, 1, 32], strides = [1, 1, 1]} : vector<8x2x64xf32> to vector<8x1x32xf32>
    %19 = vector.shape_cast %18 : vector<8x1x32xf32> to vector<8x32xf32>
    %20 = vector.extract_strided_slice %17 {offsets = [0, 1, 0], sizes = [8, 1, 32], strides = [1, 1, 1]} : vector<8x2x64xf32> to vector<8x1x32xf32>
    %21 = vector.shape_cast %20 : vector<8x1x32xf32> to vector<8x32xf32>
    %22 = vector.extract_strided_slice %17 {offsets = [0, 0, 32], sizes = [8, 1, 32], strides = [1, 1, 1]} : vector<8x2x64xf32> to vector<8x1x32xf32>
    %23 = vector.shape_cast %22 : vector<8x1x32xf32> to vector<8x32xf32>
    %24 = vector.extract_strided_slice %17 {offsets = [0, 1, 32], sizes = [8, 1, 32], strides = [1, 1, 1]} : vector<8x2x64xf32> to vector<8x1x32xf32>
    %25 = vector.shape_cast %24 : vector<8x1x32xf32> to vector<8x32xf32>
    %26 = tpu.concatenate %19, %21, %23, %25 in 0 : vector<8x32xf32>, vector<8x32xf32>, vector<8x32xf32>, vector<8x32xf32> -> vector<32x32xf32>
    %c0_12 = arith.constant 0 : index
    %c0_13 = arith.constant 0 : index
    %27 = vector.load %arg4[%c0_12, %c0_13] : memref<48x32xf32, #tpu.memory_space<vmem>>, vector<48x32xf32>
    %cst_14 = arith.constant dense<0.000000e+00> : vector<48x32xf32>
    %28 = tpu.matmul %27, %26, %cst_14 {dimension_numbers = #tpu.dot_dimension_numbers<[1], [0], [0], [1], [0, 0, 1, 1], [], []>} : vector<48x32xf32>, vector<32x32xf32>, vector<48x32xf32> -> vector<48x32xf32>
    %c0_15 = arith.constant 0 : index
    %c0_16 = arith.constant 0 : index
    %c0_17 = arith.constant 0 : index
    %29 = vector.load %arg6[%c0_15, %c0_16, %c0_17] : memref<4x33x32xf32, #tpu.memory_space<vmem>>, vector<1x33x32xf32>
    %30 = vector.shape_cast %29 : vector<1x33x32xf32> to vector<33x32xf32>
    %31 = vector.extract_strided_slice %30 {offsets = [0, 0], sizes = [32, 32], strides = [1, 1]} : vector<33x32xf32> to vector<32x32xf32>
    %cst_18 = arith.constant dense<0.000000e+00> : vector<48x32xf32>
    %32 = tpu.matmul %3, %31, %cst_18 {dimension_numbers = #tpu.dot_dimension_numbers<[1], [0], [0], [1], [0, 0, 1, 1], [], []>} : vector<48x32xf32>, vector<32x32xf32>, vector<48x32xf32> -> vector<48x32xf32>
    %33 = vector.extract_strided_slice %30 {offsets = [32, 0], sizes = [1, 32], strides = [1, 1]} : vector<33x32xf32> to vector<1x32xf32>
    %34 = vector.broadcast %33 : vector<1x32xf32> to vector<48x32xf32>
    %35 = arith.addf %32, %34 : vector<48x32xf32>
    %36 = arith.addf %28, %35 : vector<48x32xf32>
    %cst_19 = arith.constant 5.000000e-01 : f32
    %37 = vector.broadcast %cst_19 : f32 to vector<48x32xf32>
    %38 = arith.mulf %37, %36 : vector<48x32xf32>
    %cst_20 = arith.constant 0.707106769 : f32
    %39 = vector.broadcast %cst_20 : f32 to vector<48x32xf32>
    %40 = arith.mulf %36, %39 : vector<48x32xf32>
    %41 = math.erf %40 : vector<48x32xf32>
    %cst_21 = arith.constant 1.000000e+00 : f32
    %42 = vector.broadcast %cst_21 : f32 to vector<48x32xf32>
    %43 = arith.addf %42, %41 : vector<48x32xf32>
    %44 = arith.mulf %38, %43 : vector<48x32xf32>
    %c0_22 = arith.constant 0 : index
    %c0_23 = arith.constant 0 : index
    %45 = vector.load %arg3[%c0_22, %c0_23] : memref<32x48xf32, #tpu.memory_space<vmem>>, vector<32x48xf32>
    %cst_24 = arith.constant dense<0.000000e+00> : vector<32x32xf32>
    %46 = tpu.matmul %45, %44, %cst_24 {dimension_numbers = #tpu.dot_dimension_numbers<[1], [0], [0], [1], [0, 0, 1, 1], [], []>} : vector<32x48xf32>, vector<48x32xf32>, vector<32x32xf32> -> vector<32x32xf32>
    %47 = vector.extract_strided_slice %46 {offsets = [0, 0], sizes = [8, 32], strides = [1, 1]} : vector<32x32xf32> to vector<8x32xf32>
    %48 = vector.extract_strided_slice %46 {offsets = [16, 0], sizes = [8, 32], strides = [1, 1]} : vector<32x32xf32> to vector<8x32xf32>
    %49 = tpu.concatenate %47, %48 in 1 : vector<8x32xf32>, vector<8x32xf32> -> vector<8x64xf32>
    %50 = vector.shape_cast %49 : vector<8x64xf32> to vector<8x1x64xf32>
    %51 = vector.extract_strided_slice %46 {offsets = [8, 0], sizes = [8, 32], strides = [1, 1]} : vector<32x32xf32> to vector<8x32xf32>
    %52 = vector.extract_strided_slice %46 {offsets = [24, 0], sizes = [8, 32], strides = [1, 1]} : vector<32x32xf32> to vector<8x32xf32>
    %53 = tpu.concatenate %51, %52 in 1 : vector<8x32xf32>, vector<8x32xf32> -> vector<8x64xf32>
    %54 = vector.shape_cast %53 : vector<8x64xf32> to vector<8x1x64xf32>
    %55 = tpu.concatenate %50, %54 in 1 : vector<8x1x64xf32>, vector<8x1x64xf32> -> vector<8x2x64xf32>
    %c1 = arith.constant 1 : index
    %c0_25 = arith.constant 0 : index
    %c0_26 = arith.constant 0 : index
    %c0_27 = arith.constant 0 : index
    %56 = vector.load %arg5[%c1, %c0_25, %c0_26, %c0_27] : memref<4x8x64x64xf32, #tpu.memory_space<vmem>>, vector<1x8x64x64xf32>
    %57 = vector.shape_cast %56 : vector<1x8x64x64xf32> to vector<8x64x64xf32>
    "tpu.trace_start"() <{level = 10 : i32, message = "mbi,mio->mbo"}> : () -> ()
    %cst_28 = arith.constant dense<0.000000e+00> : vector<8x2x64xf32>
    %58 = tpu.matmul %55, %57, %cst_28 {dimension_numbers = #tpu.dot_dimension_numbers<[2], [1], [1], [2], [0, 0, 0, 1, 1, 2], [0], [0]>} : vector<8x2x64xf32>, vector<8x64x64xf32>, vector<8x2x64xf32> -> vector<8x2x64xf32>
    "tpu.trace_stop"() : () -> ()
    %59 = vector.extract_strided_slice %58 {offsets = [0, 0, 0], sizes = [8, 1, 32], strides = [1, 1, 1]} : vector<8x2x64xf32> to vector<8x1x32xf32>
    %60 = vector.shape_cast %59 : vector<8x1x32xf32> to vector<8x32xf32>
    %61 = vector.extract_strided_slice %58 {offsets = [0, 1, 0], sizes = [8, 1, 32], strides = [1, 1, 1]} : vector<8x2x64xf32> to vector<8x1x32xf32>
    %62 = vector.shape_cast %61 : vector<8x1x32xf32> to vector<8x32xf32>
    %63 = vector.extract_strided_slice %58 {offsets = [0, 0, 32], sizes = [8, 1, 32], strides = [1, 1, 1]} : vector<8x2x64xf32> to vector<8x1x32xf32>
    %64 = vector.shape_cast %63 : vector<8x1x32xf32> to vector<8x32xf32>
    %65 = vector.extract_strided_slice %58 {offsets = [0, 1, 32], sizes = [8, 1, 32], strides = [1, 1, 1]} : vector<8x2x64xf32> to vector<8x1x32xf32>
    %66 = vector.shape_cast %65 : vector<8x1x32xf32> to vector<8x32xf32>
    %67 = tpu.concatenate %60, %62, %64, %66 in 0 : vector<8x32xf32>, vector<8x32xf32>, vector<8x32xf32>, vector<8x32xf32> -> vector<32x32xf32>
    %c0_29 = arith.constant 0 : index
    %c0_30 = arith.constant 0 : index
    %68 = vector.load %arg4[%c0_29, %c0_30] : memref<48x32xf32, #tpu.memory_space<vmem>>, vector<48x32xf32>
    %cst_31 = arith.constant dense<0.000000e+00> : vector<48x32xf32>
    %69 = tpu.matmul %68, %67, %cst_31 {dimension_numbers = #tpu.dot_dimension_numbers<[1], [0], [0], [1], [0, 0, 1, 1], [], []>} : vector<48x32xf32>, vector<32x32xf32>, vector<48x32xf32> -> vector<48x32xf32>
    %c1_32 = arith.constant 1 : index
    %c0_33 = arith.constant 0 : index
    %c0_34 = arith.constant 0 : index
    %70 = vector.load %arg6[%c1_32, %c0_33, %c0_34] : memref<4x33x32xf32, #tpu.memory_space<vmem>>, vector<1x33x32xf32>
    %71 = vector.shape_cast %70 : vector<1x33x32xf32> to vector<33x32xf32>
    %72 = vector.extract_strided_slice %71 {offsets = [0, 0], sizes = [32, 32], strides = [1, 1]} : vector<33x32xf32> to vector<32x32xf32>
    %cst_35 = arith.constant dense<0.000000e+00> : vector<48x32xf32>
    %73 = tpu.matmul %44, %72, %cst_35 {dimension_numbers = #tpu.dot_dimension_numbers<[1], [0], [0], [1], [0, 0, 1, 1], [], []>} : vector<48x32xf32>, vector<32x32xf32>, vector<48x32xf32> -> vector<48x32xf32>
    %74 = vector.extract_strided_slice %71 {offsets = [32, 0], sizes = [1, 32], strides = [1, 1]} : vector<33x32xf32> to vector<1x32xf32>
    %75 = vector.broadcast %74 : vector<1x32xf32> to vector<48x32xf32>
    %76 = arith.addf %73, %75 : vector<48x32xf32>
    %77 = arith.addf %69, %76 : vector<48x32xf32>
    %cst_36 = arith.constant 5.000000e-01 : f32
    %78 = vector.broadcast %cst_36 : f32 to vector<48x32xf32>
    %79 = arith.mulf %78, %77 : vector<48x32xf32>
    %cst_37 = arith.constant 0.707106769 : f32
    %80 = vector.broadcast %cst_37 : f32 to vector<48x32xf32>
    %81 = arith.mulf %77, %80 : vector<48x32xf32>
    %82 = math.erf %81 : vector<48x32xf32>
    %cst_38 = arith.constant 1.000000e+00 : f32
    %83 = vector.broadcast %cst_38 : f32 to vector<48x32xf32>
    %84 = arith.addf %83, %82 : vector<48x32xf32>
    %85 = arith.mulf %79, %84 : vector<48x32xf32>
    %c0_39 = arith.constant 0 : index
    %c0_40 = arith.constant 0 : index
    %86 = vector.load %arg3[%c0_39, %c0_40] : memref<32x48xf32, #tpu.memory_space<vmem>>, vector<32x48xf32>
    %cst_41 = arith.constant dense<0.000000e+00> : vector<32x32xf32>
    %87 = tpu.matmul %86, %85, %cst_41 {dimension_numbers = #tpu.dot_dimension_numbers<[1], [0], [0], [1], [0, 0, 1, 1], [], []>} : vector<32x48xf32>, vector<48x32xf32>, vector<32x32xf32> -> vector<32x32xf32>
    %88 = vector.extract_strided_slice %87 {offsets = [0, 0], sizes = [8, 32], strides = [1, 1]} : vector<32x32xf32> to vector<8x32xf32>
    %89 = vector.extract_strided_slice %87 {offsets = [16, 0], sizes = [8, 32], strides = [1, 1]} : vector<32x32xf32> to vector<8x32xf32>
    %90 = tpu.concatenate %88, %89 in 1 : vector<8x32xf32>, vector<8x32xf32> -> vector<8x64xf32>
    %91 = vector.shape_cast %90 : vector<8x64xf32> to vector<8x1x64xf32>
    %92 = vector.extract_strided_slice %87 {offsets = [8, 0], sizes = [8, 32], strides = [1, 1]} : vector<32x32xf32> to vector<8x32xf32>
    %93 = vector.extract_strided_slice %87 {offsets = [24, 0], sizes = [8, 32], strides = [1, 1]} : vector<32x32xf32> to vector<8x32xf32>
    %94 = tpu.concatenate %92, %93 in 1 : vector<8x32xf32>, vector<8x32xf32> -> vector<8x64xf32>
    %95 = vector.shape_cast %94 : vector<8x64xf32> to vector<8x1x64xf32>
    %96 = tpu.concatenate %91, %95 in 1 : vector<8x1x64xf32>, vector<8x1x64xf32> -> vector<8x2x64xf32>
    %c2 = arith.constant 2 : index
    %c0_42 = arith.constant 0 : index
    %c0_43 = arith.constant 0 : index
    %c0_44 = arith.constant 0 : index
    %97 = vector.load %arg5[%c2, %c0_42, %c0_43, %c0_44] : memref<4x8x64x64xf32, #tpu.memory_space<vmem>>, vector<1x8x64x64xf32>
    %98 = vector.shape_cast %97 : vector<1x8x64x64xf32> to vector<8x64x64xf32>
    "tpu.trace_start"() <{level = 10 : i32, message = "mbi,mio->mbo"}> : () -> ()
    %cst_45 = arith.constant dense<0.000000e+00> : vector<8x2x64xf32>
    %99 = tpu.matmul %96, %98, %cst_45 {dimension_numbers = #tpu.dot_dimension_numbers<[2], [1], [1], [2], [0, 0, 0, 1, 1, 2], [0], [0]>} : vector<8x2x64xf32>, vector<8x64x64xf32>, vector<8x2x64xf32> -> vector<8x2x64xf32>
    "tpu.trace_stop"() : () -> ()
    %100 = vector.extract_strided_slice %99 {offsets = [0, 0, 0], sizes = [8, 1, 32], strides = [1, 1, 1]} : vector<8x2x64xf32> to vector<8x1x32xf32>
    %101 = vector.shape_cast %100 : vector<8x1x32xf32> to vector<8x32xf32>
    %102 = vector.extract_strided_slice %99 {offsets = [0, 1, 0], sizes = [8, 1, 32], strides = [1, 1, 1]} : vector<8x2x64xf32> to vector<8x1x32xf32>
    %103 = vector.shape_cast %102 : vector<8x1x32xf32> to vector<8x32xf32>
    %104 = vector.extract_strided_slice %99 {offsets = [0, 0, 32], sizes = [8, 1, 32], strides = [1, 1, 1]} : vector<8x2x64xf32> to vector<8x1x32xf32>
    %105 = vector.shape_cast %104 : vector<8x1x32xf32> to vector<8x32xf32>
    %106 = vector.extract_strided_slice %99 {offsets = [0, 1, 32], sizes = [8, 1, 32], strides = [1, 1, 1]} : vector<8x2x64xf32> to vector<8x1x32xf32>
    %107 = vector.shape_cast %106 : vector<8x1x32xf32> to vector<8x32xf32>
    %108 = tpu.concatenate %101, %103, %105, %107 in 0 : vector<8x32xf32>, vector<8x32xf32>, vector<8x32xf32>, vector<8x32xf32> -> vector<32x32xf32>
    %c0_46 = arith.constant 0 : index
    %c0_47 = arith.constant 0 : index
    %109 = vector.load %arg4[%c0_46, %c0_47] : memref<48x32xf32, #tpu.memory_space<vmem>>, vector<48x32xf32>
    %cst_48 = arith.constant dense<0.000000e+00> : vector<48x32xf32>
    %110 = tpu.matmul %109, %108, %cst_48 {dimension_numbers = #tpu.dot_dimension_numbers<[1], [0], [0], [1], [0, 0, 1, 1], [], []>} : vector<48x32xf32>, vector<32x32xf32>, vector<48x32xf32> -> vector<48x32xf32>
    %c2_49 = arith.constant 2 : index
    %c0_50 = arith.constant 0 : index
    %c0_51 = arith.constant 0 : index
    %111 = vector.load %arg6[%c2_49, %c0_50, %c0_51] : memref<4x33x32xf32, #tpu.memory_space<vmem>>, vector<1x33x32xf32>
    %112 = vector.shape_cast %111 : vector<1x33x32xf32> to vector<33x32xf32>
    %113 = vector.extract_strided_slice %112 {offsets = [0, 0], sizes = [32, 32], strides = [1, 1]} : vector<33x32xf32> to vector<32x32xf32>
    %cst_52 = arith.constant dense<0.000000e+00> : vector<48x32xf32>
    %114 = tpu.matmul %85, %113, %cst_52 {dimension_numbers = #tpu.dot_dimension_numbers<[1], [0], [0], [1], [0, 0, 1, 1], [], []>} : vector<48x32xf32>, vector<32x32xf32>, vector<48x32xf32> -> vector<48x32xf32>
    %115 = vector.extract_strided_slice %112 {offsets = [32, 0], sizes = [1, 32], strides = [1, 1]} : vector<33x32xf32> to vector<1x32xf32>
    %116 = vector.broadcast %115 : vector<1x32xf32> to vector<48x32xf32>
    %117 = arith.addf %114, %116 : vector<48x32xf32>
    %118 = arith.addf %110, %117 : vector<48x32xf32>
    %cst_53 = arith.constant 5.000000e-01 : f32
    %119 = vector.broadcast %cst_53 : f32 to vector<48x32xf32>
    %120 = arith.mulf %119, %118 : vector<48x32xf32>
    %cst_54 = arith.constant 0.707106769 : f32
    %121 = vector.broadcast %cst_54 : f32 to vector<48x32xf32>
    %122 = arith.mulf %118, %121 : vector<48x32xf32>
    %123 = math.erf %122 : vector<48x32xf32>
    %cst_55 = arith.constant 1.000000e+00 : f32
    %124 = vector.broadcast %cst_55 : f32 to vector<48x32xf32>
    %125 = arith.addf %124, %123 : vector<48x32xf32>
    %126 = arith.mulf %120, %125 : vector<48x32xf32>
    %c0_56 = arith.constant 0 : index
    %c0_57 = arith.constant 0 : index
    %127 = vector.load %arg3[%c0_56, %c0_57] : memref<32x48xf32, #tpu.memory_space<vmem>>, vector<32x48xf32>
    %cst_58 = arith.constant dense<0.000000e+00> : vector<32x32xf32>
    %128 = tpu.matmul %127, %126, %cst_58 {dimension_numbers = #tpu.dot_dimension_numbers<[1], [0], [0], [1], [0, 0, 1, 1], [], []>} : vector<32x48xf32>, vector<48x32xf32>, vector<32x32xf32> -> vector<32x32xf32>
    %129 = vector.extract_strided_slice %128 {offsets = [0, 0], sizes = [8, 32], strides = [1, 1]} : vector<32x32xf32> to vector<8x32xf32>
    %130 = vector.extract_strided_slice %128 {offsets = [16, 0], sizes = [8, 32], strides = [1, 1]} : vector<32x32xf32> to vector<8x32xf32>
    %131 = tpu.concatenate %129, %130 in 1 : vector<8x32xf32>, vector<8x32xf32> -> vector<8x64xf32>
    %132 = vector.shape_cast %131 : vector<8x64xf32> to vector<8x1x64xf32>
    %133 = vector.extract_strided_slice %128 {offsets = [8, 0], sizes = [8, 32], strides = [1, 1]} : vector<32x32xf32> to vector<8x32xf32>
    %134 = vector.extract_strided_slice %128 {offsets = [24, 0], sizes = [8, 32], strides = [1, 1]} : vector<32x32xf32> to vector<8x32xf32>
    %135 = tpu.concatenate %133, %134 in 1 : vector<8x32xf32>, vector<8x32xf32> -> vector<8x64xf32>
    %136 = vector.shape_cast %135 : vector<8x64xf32> to vector<8x1x64xf32>
    %137 = tpu.concatenate %132, %136 in 1 : vector<8x1x64xf32>, vector<8x1x64xf32> -> vector<8x2x64xf32>
    %c3 = arith.constant 3 : index
    %c0_59 = arith.constant 0 : index
    %c0_60 = arith.constant 0 : index
    %c0_61 = arith.constant 0 : index
    %138 = vector.load %arg5[%c3, %c0_59, %c0_60, %c0_61] : memref<4x8x64x64xf32, #tpu.memory_space<vmem>>, vector<1x8x64x64xf32>
    %139 = vector.shape_cast %138 : vector<1x8x64x64xf32> to vector<8x64x64xf32>
    "tpu.trace_start"() <{level = 10 : i32, message = "mbi,mio->mbo"}> : () -> ()
    %cst_62 = arith.constant dense<0.000000e+00> : vector<8x2x64xf32>
    %140 = tpu.matmul %137, %139, %cst_62 {dimension_numbers = #tpu.dot_dimension_numbers<[2], [1], [1], [2], [0, 0, 0, 1, 1, 2], [0], [0]>} : vector<8x2x64xf32>, vector<8x64x64xf32>, vector<8x2x64xf32> -> vector<8x2x64xf32>
    "tpu.trace_stop"() : () -> ()
    %141 = vector.extract_strided_slice %140 {offsets = [0, 0, 0], sizes = [8, 1, 32], strides = [1, 1, 1]} : vector<8x2x64xf32> to vector<8x1x32xf32>
    %142 = vector.shape_cast %141 : vector<8x1x32xf32> to vector<8x32xf32>
    %143 = vector.extract_strided_slice %140 {offsets = [0, 1, 0], sizes = [8, 1, 32], strides = [1, 1, 1]} : vector<8x2x64xf32> to vector<8x1x32xf32>
    %144 = vector.shape_cast %143 : vector<8x1x32xf32> to vector<8x32xf32>
    %145 = vector.extract_strided_slice %140 {offsets = [0, 0, 32], sizes = [8, 1, 32], strides = [1, 1, 1]} : vector<8x2x64xf32> to vector<8x1x32xf32>
    %146 = vector.shape_cast %145 : vector<8x1x32xf32> to vector<8x32xf32>
    %147 = vector.extract_strided_slice %140 {offsets = [0, 1, 32], sizes = [8, 1, 32], strides = [1, 1, 1]} : vector<8x2x64xf32> to vector<8x1x32xf32>
    %148 = vector.shape_cast %147 : vector<8x1x32xf32> to vector<8x32xf32>
    %149 = tpu.concatenate %142, %144, %146, %148 in 0 : vector<8x32xf32>, vector<8x32xf32>, vector<8x32xf32>, vector<8x32xf32> -> vector<32x32xf32>
    %c0_63 = arith.constant 0 : index
    %c0_64 = arith.constant 0 : index
    %150 = vector.load %arg4[%c0_63, %c0_64] : memref<48x32xf32, #tpu.memory_space<vmem>>, vector<48x32xf32>
    %cst_65 = arith.constant dense<0.000000e+00> : vector<48x32xf32>
    %151 = tpu.matmul %150, %149, %cst_65 {dimension_numbers = #tpu.dot_dimension_numbers<[1], [0], [0], [1], [0, 0, 1, 1], [], []>} : vector<48x32xf32>, vector<32x32xf32>, vector<48x32xf32> -> vector<48x32xf32>
    %c3_66 = arith.constant 3 : index
    %c0_67 = arith.constant 0 : index
    %c0_68 = arith.constant 0 : index
    %152 = vector.load %arg6[%c3_66, %c0_67, %c0_68] : memref<4x33x32xf32, #tpu.memory_space<vmem>>, vector<1x33x32xf32>
    %153 = vector.shape_cast %152 : vector<1x33x32xf32> to vector<33x32xf32>
    %154 = vector.extract_strided_slice %153 {offsets = [0, 0], sizes = [32, 32], strides = [1, 1]} : vector<33x32xf32> to vector<32x32xf32>
    %cst_69 = arith.constant dense<0.000000e+00> : vector<48x32xf32>
    %155 = tpu.matmul %126, %154, %cst_69 {dimension_numbers = #tpu.dot_dimension_numbers<[1], [0], [0], [1], [0, 0, 1, 1], [], []>} : vector<48x32xf32>, vector<32x32xf32>, vector<48x32xf32> -> vector<48x32xf32>
    %156 = vector.extract_strided_slice %153 {offsets = [32, 0], sizes = [1, 32], strides = [1, 1]} : vector<33x32xf32> to vector<1x32xf32>
    %157 = vector.broadcast %156 : vector<1x32xf32> to vector<48x32xf32>
    %158 = arith.addf %155, %157 : vector<48x32xf32>
    %159 = arith.addf %151, %158 : vector<48x32xf32>
    %c0_70 = arith.constant 0 : index
    %c0_71 = arith.constant 0 : index
    %160 = vector.load %arg8[%c0_70, %c0_71] : memref<3x128xf32, #tpu.memory_space<vmem>>, vector<3x128xf32>
    %c0_72 = arith.constant 0 : index
    %c0_73 = arith.constant 0 : index
    %161 = vector.load %arg7[%c0_72, %c0_73] : memref<32x128xf32, #tpu.memory_space<vmem>>, vector<32x128xf32>
    %cst_74 = arith.constant dense<0.000000e+00> : vector<48x128xf32>
    %162 = tpu.matmul %159, %161, %cst_74 {dimension_numbers = #tpu.dot_dimension_numbers<[1], [0], [0], [1], [0, 0, 1, 1], [], []>} : vector<48x32xf32>, vector<32x128xf32>, vector<48x128xf32> -> vector<48x128xf32>
    %163 = vector.extract_strided_slice %160 {offsets = [0, 0], sizes = [1, 128], strides = [1, 1]} : vector<3x128xf32> to vector<1x128xf32>
    %164 = vector.broadcast %163 : vector<1x128xf32> to vector<48x128xf32>
    %165 = arith.addf %162, %164 : vector<48x128xf32>
    %cst_75 = arith.constant 5.000000e-01 : f32
    %166 = vector.broadcast %cst_75 : f32 to vector<48x128xf32>
    %167 = arith.mulf %166, %165 : vector<48x128xf32>
    %cst_76 = arith.constant 0.707106769 : f32
    %168 = vector.broadcast %cst_76 : f32 to vector<48x128xf32>
    %169 = arith.mulf %165, %168 : vector<48x128xf32>
    %170 = math.erf %169 : vector<48x128xf32>
    %cst_77 = arith.constant 1.000000e+00 : f32
    %171 = vector.broadcast %cst_77 : f32 to vector<48x128xf32>
    %172 = arith.addf %171, %170 : vector<48x128xf32>
    %173 = arith.mulf %167, %172 : vector<48x128xf32>
    %174 = vector.extract_strided_slice %160 {offsets = [1, 0], sizes = [1, 128], strides = [1, 1]} : vector<3x128xf32> to vector<1x128xf32>
    "tpu.trace_start"() <{level = 10 : i32, message = "ok,nk->on"}> : () -> ()
    %cst_78 = arith.constant dense<0.000000e+00> : vector<1x48xf32>
    %175 = tpu.matmul %174, %173, %cst_78 {dimension_numbers = #tpu.dot_dimension_numbers<[1], [1], [0], [0], [0, 0, 1, 0], [], []>} : vector<1x128xf32>, vector<48x128xf32>, vector<1x48xf32> -> vector<1x48xf32>
    "tpu.trace_stop"() : () -> ()
    %176 = vector.extract_strided_slice %160 {offsets = [2, 0], sizes = [1, 1], strides = [1, 1]} : vector<3x128xf32> to vector<1x1xf32>
    %177 = vector.broadcast %176 : vector<1x1xf32> to vector<1x48xf32>
    %178 = arith.addf %175, %177 : vector<1x48xf32>
    %c0_79 = arith.constant 0 : index
    %c0_80 = arith.constant 0 : index
    %c0_81 = arith.constant 0 : index
    %179 = vector.load %arg9[%c0_79, %c0_80, %c0_81] : memref<1x1x48xf32, #tpu.memory_space<vmem>>, vector<1x1x48xf32>
    %180 = vector.shape_cast %179 : vector<1x1x48xf32> to vector<1x48xf32>
    %181 = vector.shape_cast %178 : vector<1x48xf32> to vector<1x1x48xf32>
    tpu.vector_store %arg9[%c0_79, %c0_80, %c0_81], %181 {strides = array<i32>} : memref<1x1x48xf32, #tpu.memory_space<vmem>>, vector<1x1x48xf32>,
    return
  }
  func.func @transform_0(%arg0: i32) -> (i32, i32, i32) {
    %c0_i32 = arith.constant 0 : i32
    %c0_i32_0 = arith.constant 0 : i32
    %c0_i32_1 = arith.constant 0 : i32
    return %arg0, %c0_i32, %c0_i32_0 : i32, i32, i32
  }
  func.func @transform_1(%arg0: i32) -> (i32, i32) {
    %c0_i32 = arith.constant 0 : i32
    %c0_i32_0 = arith.constant 0 : i32
    %c0_i32_1 = arith.constant 0 : i32
    return %c0_i32, %c0_i32_0 : i32, i32
  }
  func.func @transform_2(%arg0: i32) -> (i32, i32) {
    %c0_i32 = arith.constant 0 : i32
    %c0_i32_0 = arith.constant 0 : i32
    %c0_i32_1 = arith.constant 0 : i32
    return %c0_i32, %c0_i32_0 : i32, i32
  }
  func.func @transform_3(%arg0: i32) -> (i32, i32) {
    %c0_i32 = arith.constant 0 : i32
    %c0_i32_0 = arith.constant 0 : i32
    %c0_i32_1 = arith.constant 0 : i32
    return %c0_i32, %c0_i32_0 : i32, i32
  }
  func.func @transform_4(%arg0: i32) -> (i32, i32, i32, i32) {
    %c0_i32 = arith.constant 0 : i32
    %c0_i32_0 = arith.constant 0 : i32
    %c0_i32_1 = arith.constant 0 : i32
    %c0_i32_2 = arith.constant 0 : i32
    %c0_i32_3 = arith.constant 0 : i32
    return %c0_i32, %c0_i32_0, %c0_i32_1, %c0_i32_2 : i32, i32, i32, i32
  }
  func.func @transform_5(%arg0: i32) -> (i32, i32, i32) {
    %c0_i32 = arith.constant 0 : i32
    %c0_i32_0 = arith.constant 0 : i32
    %c0_i32_1 = arith.constant 0 : i32
    %c0_i32_2 = arith.constant 0 : i32
    return %c0_i32, %c0_i32_0, %c0_i32_1 : i32, i32, i32
  }
  func.func @transform_6(%arg0: i32) -> (i32, i32) {
    %c0_i32 = arith.constant 0 : i32
    %c0_i32_0 = arith.constant 0 : i32
    %c0_i32_1 = arith.constant 0 : i32
    return %c0_i32, %c0_i32_0 : i32, i32
  }
  func.func @transform_7(%arg0: i32) -> (i32, i32) {
    %c0_i32 = arith.constant 0 : i32
    %c0_i32_0 = arith.constant 0 : i32
    %c0_i32_1 = arith.constant 0 : i32
    return %c0_i32, %c0_i32_0 : i32, i32
  }
  func.func @transform_8(%arg0: i32) -> (i32, i32, i32) {
    %c0_i32 = arith.constant 0 : i32
    %c0_i32_0 = arith.constant 0 : i32
    %c0_i32_1 = arith.constant 0 : i32
    return %arg0, %c0_i32, %c0_i32_0 : i32, i32, i32
  }
}

</mosaic_0001>

<bundles_post_ra>
// kernel: tpu_custom_call.1
= control target key start
LH: loop header
LB: loop body
LE: loop exit
PB: predicated region body
PF: predicated region fallthrough
CT: control target
= control target key end

     0   :  { %13 = vsyncpa [#allocation3], 0  ;;  %s5333_s0 = inlined_call_operand.vmem [shape: f32[1,48,3], index: 0, kind: input, shape index: {}]   ;;  %s5334_s1 = inlined_call_operand.vmem [shape: f32[3,32], index: 1, kind: input, shape index: {}]   ;;  %s5335_s2 = inlined_call_operand.vmem [shape: f32[32,48], index: 2, kind: input, shape index: {}]   ;;  %s5336_s3 = inlined_call_operand.vmem [shape: f32[48,32], index: 3, kind: input, shape index: {}]   ;;  %s5337_s4 = inlined_call_operand.hbm [shape: f32[4,8,64,64], index: 4, kind: input, shape index: {}]   ;;  %s5338_s5 = inlined_call_operand.vmem [shape: f32[4,33,32], index: 5, kind: input, shape index: {}]   ;;  %s5339_s6 = inlined_call_operand.vmem [shape: f32[32,128], index: 6, kind: input, shape index: {}]   ;;  %s5340_s7 = inlined_call_operand.vmem [shape: f32[3,128], index: 7, kind: input, shape index: {}]   ;;  %s5341_s8 = inlined_call_operand.hbm [shape: f32[1,1,48], index: 8, kind: output, shape index: {}]  }
   0x1   :  { %14 = vsyncpa [#allocation4], 0  ;;  %s27_s29 = sshll.u32 %s5337_s4, 4  ;;  %s3624_s30 = smov [#allocation2]   ;;  %s28_s29 = int_to_ptr.hbm [resolvable:$true] %s27_s29 }
   0x2   :  { %s29_s9 = sshll.u32 %s3624_s30, 4  ;;  %s3625_s10 = smov 128   ;;  %s30_s9 = int_to_ptr.vmem [resolvable:$true] %s29_s9 }
   0x3   :  { %s3626_s11 = smov 8  }
   0x4   :  { %35 = dma.hbm_to_vmem [thread:$0]  %s28_s29, 32768, %s30_s9, [#allocation3], %s3625_s10, %s3625_s10, %s3626_s11  }
   0x5   :  { %3620 = dma.done.wait [#allocation3], 32768  }
   0x6   :  { %3621 = vsyncadd [#allocation3], 4294934528  ;;  %vm72_vm0 = vcmask 1042432   ;;  %vm53_vm1 = vcmask 23552   ;;  %v52_v0 = vld [vmem:[%s5334_s1] sm:$0x7] }
   0x7   :  { %v46_v1 = vld [vmem:[%s5333_s0] sm:$0xff]  ;;  %3338 = vmatpush.msk.msra.mxu0 %vm72_vm0, %v52_v0  ;;  %v47_v2 = vld [vmem:[%s5333_s0 + $0x8] sm:$0xff]  ;;  %v48_v3 = vld [vmem:[%s5333_s0 + $0x10] sm:$0xff]  ;;  %vm115_vm2 = vcmask 392192   ;;  %s3627_s9 = smov 32   ;;  %vm161_vm3 = vcmask 261120  }
   0x8   :  { %3339 = vmatmul.msk.f32.vlgmr.msra.gmra.mxu0 %vm53_vm1, %v46_v1  ;;  %v49_v4 = vld [vmem:[%s5333_s0 + $0x18] sm:$0xff]  ;;  %v50_v5 = vld [vmem:[%s5333_s0 + $0x20] sm:$0xff]  ;;  %v51_v6 = vld [vmem:[%s5333_s0 + $0x28] sm:$0xff]  ;;  %vm5350_vm4 = vcmask 1040384   ;;  %vm5349_vm5 = vcmask 523264   ;;  %vm5348_vm6 = vcmask 1041409  }
   0x9   :  { %v113_v13 = vld [vmem:[%s5335_s2 + $0x10] sm:$0xff]  ;;  %v111_v14 = vld [vmem:[%s5335_s2] sm:$0xff]  ;;  %v114_v15 = vld [vmem:[%s5335_s2 + $0x18] sm:$0xff]  ;;  %vm5347_vm7 = vcmask 1042434   ;;  %vm5346_vm8 = vcmask 1043459   ;;  %vm5345_vm9 = vcmask 1044484  }
   0xa   :  { %v112_v16 = vld [vmem:[%s5335_s2 + $0x8] sm:$0xff]  ;;  %v223_v17 = vld [vmem:[#allocation2 + $0x38] sm:$0xff]  ;;  %v222_v18 = vld [vmem:[#allocation2 + $0x30] sm:$0xff]  ;;  %vm5344_vm10 = vcmask 1045509   ;;  %vm5343_vm11 = vcmask 1046534   ;;  %vm5342_vm12 = vcmask 1047559  }
   0xb   :  { %v221_v19 = vld [vmem:[#allocation2 + $0x28] sm:$0xff]  ;;  %v247_v20 = vld [vmem:[#allocation2 + $0xf8] sm:$0xff]  ;;  %v246_v21 = vld [vmem:[#allocation2 + $0xf0] sm:$0xff]  ;;  %s3628_s17 = smov 96   ;;  %s3328_s12 = sshll.u32 %s5341_s8, 4  ;;  %s3329_s12 = int_to_ptr.hbm [resolvable:$true] %s3328_s12 }
   0xc   :  { %361 = vmatpush.msra.mxu3 %v247_v20  ;;  %v220_v22 = vld [vmem:[#allocation2 + $0x20] sm:$0xff]  ;;  %v245_v23 = vld [vmem:[#allocation2 + $0xe8] sm:$0xff]  ;;  %v255_v24 = vld [vmem:[#allocation2 + $0x138] sm:$0xff] }
   0xd   :  { %v279_v25 = vld [vmem:[#allocation2 + $0x1f8] sm:$0xff]  ;;  %v244_v27 = vld [vmem:[#allocation2 + $0xe0] sm:$0xff]  ;;  %v278_v28 = vld [vmem:[#allocation2 + $0x1f0] sm:$0xff] }
   0xe   :  { %362 = vmatpush.msra.mxu3 %v246_v21  ;;  %v219_v26 = vld [vmem:[#allocation2 + $0x18] sm:$0xff]  ;;  %453 = vmatpush.msrb.mxu0 %v279_v25  ;;  %v218_v29 = vld [vmem:[#allocation2 + $0x10] sm:$0xff]  ;;  %v217_v31 = vld [vmem:[#allocation2 + $0x8] sm:$0xff] }
   0xf   :  { %v243_v30 = vld [vmem:[#allocation2 + $0xd8] sm:$0xff]  ;;  %v216_v32 = vld [vmem:[#allocation2] sm:$0xff]  ;;  %v230_v35 = vld [vmem:[#allocation2 + $0x70] sm:$0xff] }
  0x10   :  { %3340 = vmatmul.msk.f32.gmra.mxu0 %vm53_vm1, %v47_v2  ;;  %363 = vmatpush.msra.mxu3 %v245_v23  ;;  %v231_v33 = vld [vmem:[#allocation2 + $0x78] sm:$0xff]  ;;  %v229_v36 = vld [vmem:[#allocation2 + $0x68] sm:$0xff]  ;;  %v254_v38 = vld [vmem:[#allocation2 + $0x130] sm:$0xff] }
  0x11   :  { %454 = vmatpush.msrb.mxu0 %v278_v28  ;;  %v242_v39 = vld [vmem:[#allocation2 + $0xd0] sm:$0xff]  ;;  %v228_v40 = vld [vmem:[#allocation2 + $0x60] sm:$0xff]  ;;  %v253_v41 = vld [vmem:[#allocation2 + $0x128] sm:$0xff] }
  0x12   :  { %364 = vmatpush.msra.mxu3 %v244_v27  ;;  %v277_v42 = vld [vmem:[#allocation2 + $0x1e8] sm:$0xff]  ;;  %v227_v44 = vld [vmem:[#allocation2 + $0x58] sm:$0xff]  ;;  %v252_v45 = vld [vmem:[#allocation2 + $0x120] sm:$0xff] }
  0x13   :  { %v241_v43 = vld [vmem:[#allocation2 + $0xc8] sm:$0xff]  ;;  %455 = vmatpush.msrb.mxu0 %v277_v42  ;;  %v276_v46 = vld [vmem:[#allocation2 + $0x1e0] sm:$0xff]  ;;  %v226_v48 = vld [vmem:[#allocation2 + $0x50] sm:$0xff] }
  0x14   :  { %365 = vmatpush.msra.mxu3 %v243_v30  ;;  %v240_v47 = vld [vmem:[#allocation2 + $0xc0] sm:$0xff]  ;;  %v251_v49 = vld [vmem:[#allocation2 + $0x118] sm:$0xff]  ;;  %v225_v52 = vld [vmem:[#allocation2 + $0x48] sm:$0xff] }
  0x15   :  { %v271_v50 = vld [vmem:[#allocation2 + $0x1b8] sm:$0xff]  ;;  %456 = vmatpush.msrb.mxu0 %v276_v46  ;;  %v270_v53 = vld [vmem:[#allocation2 + $0x1b0] sm:$0xff]  ;;  %v224_v56 = vld [vmem:[#allocation2 + $0x40] sm:$0xff] }
  0x16   :  { %366 = vmatpush.msra.mxu3 %v242_v39  ;;  %v275_v51 = vld [vmem:[#allocation2 + $0x1d8] sm:$0xff]  ;;  %v274_v54 = vld [vmem:[#allocation2 + $0x1d0] sm:$0xff]  ;;  %v249_v57 = vld [vmem:[#allocation2 + $0x108] sm:$0xff] }
  0x17   :  { %457 = vmatpush.msrb.mxu0 %v275_v51  ;;  %v250_v55 = vld [vmem:[#allocation2 + $0x110] sm:$0xff]  ;;  %v269_v58 = vld [vmem:[#allocation2 + $0x1a8] sm:$0xff]  ;;  %v248_v60 = vld [vmem:[#allocation2 + $0x100] sm:$0xff] }
  0x18   :  { %3341 = vmatmul.msk.f32.gmra.mxu0 %vm53_vm1, %v48_v3  ;;  %367 = vmatpush.msra.mxu3 %v241_v43  ;;  %v273_v59 = vld [vmem:[#allocation2 + $0x1c8] sm:$0xff]  ;;  %v268_v61 = vld [vmem:[#allocation2 + $0x1a0] sm:$0xff]  ;;  %v267_v63 = vld [vmem:[#allocation2 + $0x198] sm:$0xff] }
  0x19   :  { %458 = vmatpush.msrb.mxu0 %v274_v54  ;;  %v272_v62 = vld [vmem:[#allocation2 + $0x1c0] sm:$0xff]  ;;  %v525_v0 = vld [vmem:[%s5338_s5 + $0x18] sm:$0xff]  ;;  %v266_v1 = vld [vmem:[#allocation2 + $0x190] sm:$0xff] }
  0x1a   :  { %368 = vmatpush.msra.mxu3 %v240_v47  ;;  %v524_v2 = vld [vmem:[%s5338_s5 + $0x10] sm:$0xff]  ;;  %v265_v3 = vld [vmem:[#allocation2 + $0x188] sm:$0xff]  ;;  %v239_v23 = vld [vmem:[#allocation2 + $0xb8] sm:$0xff] }
  0x1b   :  { %459 = vmatpush.msrb.mxu0 %v273_v59  ;;  %v236_v39 = vld [vmem:[#allocation2 + $0xa0] sm:$0xff]  ;;  %v235_v42 = vld [vmem:[#allocation2 + $0x98] sm:$0xff]  ;;  %v233_v47 = vld [vmem:[#allocation2 + $0x88] sm:$0xff] }
  0x1c   :  { %430 = vmatpush.msrb.mxu3 %v271_v50  ;;  %v263_v51 = vld [vmem:[#allocation2 + $0x178] sm:$0xff]  ;;  %v257_v59 = vld [vmem:[#allocation2 + $0x148] sm:$0xff] }
  0x1d   :  { %460 = vmatpush.msrb.mxu0 %v272_v62 }
  0x1e   :  { %431 = vmatpush.msrb.mxu3 %v270_v53  ;;  %v262_v53 = vld [vmem:[#allocation2 + $0x170] sm:$0xff] }
  0x20   :  { %3342 = vmatmul.msk.f32.gmra.mxu0 %vm53_vm1, %v49_v4  ;;  %432 = vmatpush.msrb.mxu3 %v269_v58  ;;  %v523_v4 = vld [vmem:[%s5338_s5 + $0x8] sm:$0xff] }
  0x22   :  { %433 = vmatpush.msrb.mxu3 %v268_v61  ;;  %v256_v61 = vld [vmem:[#allocation2 + $0x140] sm:$0xff] }
  0x24   :  { %434 = vmatpush.msrb.mxu3 %v267_v63 }
  0x26   :  { %435 = vmatpush.msrb.mxu3 %v266_v1 }
  0x28   :  { %3343 = vmatmul.msk.f32.gmra.mxu0 %vm53_vm1, %v50_v5  ;;  %436 = vmatpush.msrb.mxu3 %v265_v3  ;;  %v264_v5 = vld [vmem:[#allocation2 + $0x180] sm:$0xff] }
  0x2a   :  { %437 = vmatpush.msrb.mxu3 %v264_v5 }
  0x30   :  { %3344 = vmatmul.msk.f32.gmra.mxu0 %vm53_vm1, %v51_v6  ;;  %v522_v6 = vld [vmem:[%s5338_s5] sm:$0xff] }
  0x85   :  { %v3700_v7 = vpop.f32.mrf.mxu0 }
  0x8d   :  { %v3702_v8 = vpop.f32.mrf.mxu0 }
  0x95   :  { %v3704_v9 = vpop.f32.mrf.mxu0 }
  0x9d   :  { %v3706_v10 = vpop.f32.mrf.mxu0 }
  0xa5   :  { %v3708_v11 = vpop.f32.mrf.mxu0 }
  0xad   :  { %v3710_v12 = vpop.f32.mrf.mxu0 }
  0xae   :  { %138 = vmatpush.msra.mxu1 %v3710_v12  ;;  %3486 = vmatpush.msra.mxu2 %v3710_v12 }
  0xb0   :  { %139 = vmatpush.msra.mxu1 %v3708_v11  ;;  %3487 = vmatpush.msra.mxu2 %v3708_v11 }
  0xb2   :  { %140 = vmatpush.msra.mxu1 %v3706_v10  ;;  %3488 = vmatpush.msra.mxu2 %v3706_v10 }
  0xb4   :  { %141 = vmatpush.msra.mxu1 %v3704_v9  ;;  %3489 = vmatpush.msra.mxu2 %v3704_v9 }
  0xb6   :  { %142 = vmatpush.msra.mxu1 %v3702_v8  ;;  %3490 = vmatpush.msra.mxu2 %v3702_v8 }
  0xb8   :  { %143 = vmatpush.msra.mxu1 %v3700_v7  ;;  %3491 = vmatpush.msra.mxu2 %v3700_v7 }
  0xb9   :  { %3347 = vmatmul.msk.f32.vlgmr.msra.gmra.mxu2 %vm115_vm2, %v113_v13  ;;  %3345 = vmatmul.msk.f32.vlgmr.msra.gmra.mxu1 %vm115_vm2, %v111_v14 }
  0xba   :  { %292 = vmatpush.msrb.mxu2 %v223_v17  ;;  %384 = vmatpush.msrb.mxu1 %v255_v24 }
  0xbc   :  { %293 = vmatpush.msrb.mxu2 %v222_v18  ;;  %385 = vmatpush.msrb.mxu1 %v254_v38 }
  0xbe   :  { %294 = vmatpush.msrb.mxu2 %v221_v19  ;;  %386 = vmatpush.msrb.mxu1 %v253_v41 }
  0xc0   :  { %295 = vmatpush.msrb.mxu2 %v220_v22  ;;  %387 = vmatpush.msrb.mxu1 %v252_v45  ;;  %v234_v45 = vld [vmem:[#allocation2 + $0x90] sm:$0xff] }
  0xc1   :  { %3348 = vmatmul.msk.f32.gmra.mxu2 %vm115_vm2, %v114_v15  ;;  %3346 = vmatmul.msk.f32.gmra.mxu1 %vm115_vm2, %v112_v16 }
  0xc2   :  { %296 = vmatpush.msrb.mxu2 %v219_v26  ;;  %388 = vmatpush.msrb.mxu1 %v251_v49  ;;  %v232_v49 = vld [vmem:[#allocation2 + $0x80] sm:$0xff] }
  0xc4   :  { %297 = vmatpush.msrb.mxu2 %v218_v29  ;;  %389 = vmatpush.msrb.mxu1 %v250_v55  ;;  %v261_v55 = vld [vmem:[#allocation2 + $0x168] sm:$0xff] }
  0xc6   :  { %298 = vmatpush.msrb.mxu2 %v217_v31  ;;  %390 = vmatpush.msrb.mxu1 %v249_v57  ;;  %v238_v31 = vld [vmem:[#allocation2 + $0xb0] sm:$0xff] }
  0xc7   :  { %v258_v57 = vld [vmem:[#allocation2 + $0x150] sm:$0xff] }
  0xc8   :  { %299 = vmatpush.msrb.mxu2 %v216_v32  ;;  %391 = vmatpush.msrb.mxu1 %v248_v60 }
  0xca   :  { %315 = vmatpush.msra.mxu2 %v231_v33  ;;  %558 = vmatpush.msra.mxu1 %v525_v0 }
  0xcc   :  { %316 = vmatpush.msra.mxu2 %v230_v35  ;;  %559 = vmatpush.msra.mxu1 %v524_v2 }
  0xce   :  { %317 = vmatpush.msra.mxu2 %v229_v36  ;;  %560 = vmatpush.msra.mxu1 %v523_v4  ;;  %v237_v36 = vld [vmem:[#allocation2 + $0xa8] sm:$0xff] }
  0xd0   :  { %318 = vmatpush.msra.mxu2 %v228_v40  ;;  %561 = vmatpush.msra.mxu1 %v522_v6 }
  0xd2   :  { %319 = vmatpush.msra.mxu2 %v227_v44 }
  0xd4   :  { %320 = vmatpush.msra.mxu2 %v226_v48 }
  0xd6   :  { %321 = vmatpush.msra.mxu2 %v225_v52 }
  0xd8   :  { %322 = vmatpush.msra.mxu2 %v224_v56  ;;  %v259_v56 = vld [vmem:[#allocation2 + $0x158] sm:$0xff] }
 0x136   :  { %v145_v13 = vpop.f32.mrf.mxu1 }
 0x13c   :  { %v151_v34 = vpop.f32.mrf.mxu2 }
 0x13e   :  { %v148_v14 = vpop.f32.mrf.mxu1 }
 0x144   :  { %v154_v37 = vpop.f32.mrf.mxu2 }
 0x145   :  { %179 = vrot.lane.b32.xlu0 %v154_v37, %s3627_s9 }
 0x14d   :  { %158 = vrot.lane.b32.xlu0 %v151_v34, %s3627_s9 }
 0x1b7   :  { %v180_v15 = vpop.permute.xlu0 %179 }
 0x1b8   :  { %v3755_v16 = vsel %vm161_vm3, %v148_v14, %v180_v15 }
 0x1b9   :  { %v186_v17 = vrot.slane %v3755_v16, 3  ;;  %v187_v18 = vrot.slane %v3755_v16, 4  ;;  %v190_v19 = vrot.slane %v3755_v16, 7  ;;  %v191_v21 = vperm.slane %v3755_v16, 0 }
 0x1ba   :  { %v184_v35 = vrot.slane %v3755_v16, 1  ;;  %v189_v38 = vrot.slane %v3755_v16, 6  ;;  %v185_v48 = vrot.slane %v3755_v16, 2  ;;  %v188_v58 = vrot.slane %v3755_v16, 5 }
 0x1bb   :  { %v194_v24 = vperm.slane %v186_v17, 0  ;;  %v195_v25 = vperm.slane %v187_v18, 0  ;;  %v198_v26 = vperm.slane %v190_v19, 0 }
 0x1bc   :  { %v192_v40 = vperm.slane %v184_v35, 0  ;;  %v197_v44 = vperm.slane %v189_v38, 0  ;;  %v193_v52 = vperm.slane %v185_v48, 0  ;;  %v196_v62 = vperm.slane %v188_v58, 0  ;;  %v3520_v48 = vld [vmem:[%s5338_s5 + $0x20] ss:$0 sm:$0xff] }
 0x1bf   :  { %v159_v20 = vpop.permute.xlu0 %158 }
 0x1c0   :  { %v3762_v22 = vsel %vm161_vm3, %v145_v13, %v159_v20 }
 0x1c1   :  { %v208_v27 = vsel %vm5350_vm4, %v3762_v22, %v191_v21  ;;  %v166_v28 = vrot.slane %v3762_v22, 3  ;;  %v167_v29 = vrot.slane %v3762_v22, 4  ;;  %v170_v30 = vrot.slane %v3762_v22, 7 }
 0x1c2   :  { %3349 = vmatmul.msk.f32.vlgmr.msrb.gmra.mxu2 %vm5349_vm5, %v208_v27  ;;  %v164_v37 = vrot.slane %v3762_v22, 1  ;;  %v169_v41 = vrot.slane %v3762_v22, 6  ;;  %v165_v50 = vrot.slane %v3762_v22, 2  ;;  %v168_v60 = vrot.slane %v3762_v22, 5 }
 0x1c3   :  { %338 = vmatpush.msrb.mxu2 %v239_v23  ;;  %v211_v32 = vsel %vm5350_vm4, %v166_v28, %v194_v24  ;;  %v212_v33 = vsel %vm5350_vm4, %v167_v29, %v195_v25  ;;  %v215_v34 = vsel %vm5350_vm4, %v170_v30, %v198_v26 }
 0x1c4   :  { %3352 = vmatmul.msk.f32.vlgmr.msra.gmra.mxu3 %vm5349_vm5, %v211_v32  ;;  %3353 = vmatmul.msk.f32.vlgmr.msrb.gmra.mxu1 %vm5349_vm5, %v212_v33  ;;  %v209_v43 = vsel %vm5350_vm4, %v164_v37, %v192_v40  ;;  %v214_v46 = vsel %vm5350_vm4, %v169_v41, %v197_v44  ;;  %v210_v54 = vsel %vm5350_vm4, %v165_v50, %v193_v52  ;;  %v516_v41 = vld [vmem:[%s5336_s3] sm:$0xff]  ;;  %v519_v44 = vld [vmem:[%s5336_s3 + $0x18] sm:$0xff] }
 0x1c5   :  { %339 = vmatpush.msrb.mxu2 %v238_v31  ;;  %3356 = vmatmul.msk.f32.vlgmr.msrb.gmra.mxu0 %vm5349_vm5, %v215_v34 }
 0x1c7   :  { %340 = vmatpush.msrb.mxu2 %v237_v36 }
 0x1c9   :  { %341 = vmatpush.msrb.mxu2 %v236_v39 }
 0x1ca   :  { %3350 = vmatmul.msk.f32.vlgmr.msra.gmra.mxu2 %vm5349_vm5, %v209_v43  ;;  %v518_v43 = vld [vmem:[%s5336_s3 + $0x10] sm:$0xff] }
 0x1cb   :  { %342 = vmatpush.msrb.mxu2 %v235_v42  ;;  %v517_v42 = vld [vmem:[%s5336_s3 + $0x8] sm:$0xff] }
 0x1cc   :  { %3355 = vmatmul.msk.f32.vlgmr.msrb.gmra.mxu3 %vm5349_vm5, %v214_v46  ;;  %3357 = vmatmul.msk.f32.vlgmr.msra.gmra.mxu1 %vm161_vm3, %v3700_v7  ;;  %v260_v7 = vld [vmem:[#allocation2 + $0x160] sm:$0xff]  ;;  %v521_v46 = vld [vmem:[%s5336_s3 + $0x28] sm:$0xff] }
 0x1cd   :  { %343 = vmatpush.msrb.mxu2 %v234_v45  ;;  %v520_v45 = vld [vmem:[%s5336_s3 + $0x20] sm:$0xff] }
 0x1cf   :  { %344 = vmatpush.msrb.mxu2 %v233_v47 }
 0x1d1   :  { %345 = vmatpush.msrb.mxu2 %v232_v49 }
 0x1d2   :  { %3351 = vmatmul.msk.f32.vlgmr.msrb.gmra.mxu2 %vm5349_vm5, %v210_v54 }
 0x1d3   :  { %407 = vmatpush.msra.mxu2 %v263_v51 }
 0x1d4   :  { %3358 = vmatmul.msk.f32.gmra.mxu1 %vm161_vm3, %v3702_v8  ;;  %v213_v8 = vsel %vm5350_vm4, %v168_v60, %v196_v62 }
 0x1d5   :  { %408 = vmatpush.msra.mxu2 %v262_v53 }
 0x1d7   :  { %409 = vmatpush.msra.mxu2 %v261_v55 }
 0x1d9   :  { %410 = vmatpush.msra.mxu2 %v260_v7 }
 0x1db   :  { %411 = vmatpush.msra.mxu2 %v259_v56 }
 0x1dc   :  { %3359 = vmatmul.msk.f32.gmra.mxu1 %vm161_vm3, %v3704_v9 }
 0x1dd   :  { %412 = vmatpush.msra.mxu2 %v258_v57 }
 0x1df   :  { %413 = vmatpush.msra.mxu2 %v257_v59 }
 0x1e1   :  { %414 = vmatpush.msra.mxu2 %v256_v61 }
 0x1e2   :  { %3354 = vmatmul.msk.f32.vlgmr.msra.gmra.mxu2 %vm5349_vm5, %v213_v8 }
 0x1e4   :  { %3360 = vmatmul.msk.f32.gmra.mxu1 %vm161_vm3, %v3706_v10 }
 0x1ec   :  { %3361 = vmatmul.msk.f32.gmra.mxu1 %vm161_vm3, %v3708_v11 }
 0x1f4   :  { %3362 = vmatmul.msk.f32.gmra.mxu1 %vm161_vm3, %v3710_v12 }
 0x241   :  { %v393_v12 = vpop.f32.mrf.mxu1 }
 0x242   :  { %v482_v19 = vrot.slane %v393_v12, 4  ;;  %v501_v20 = vrot.slane %v393_v12, 5  ;;  %v462_v21 = vpop.f32.mrf.mxu0 }
 0x243   :  { %v491_v29 = vrot.slane %v462_v21, 1  ;;  %v507_v30 = vrot.slane %v462_v21, 2 }
 0x245   :  { %v301_v9 = vpop.f32.mrf.mxu2 }
 0x246   :  { %v495_v5 = vrot.slane %v301_v9, 1 }
 0x247   :  { %v370_v0 = vpop.f32.mrf.mxu3 }
 0x248   :  { %v479_v14 = vrot.slane %v370_v0, 5  ;;  %v499_v15 = vrot.slane %v370_v0, 6 }
 0x249   :  { %v563_v47 = vpop.f32.mrf.mxu1 }
 0x24a   :  { %v564_v49 = vadd.f32 %v3520_v48, %v563_v47 }
 0x24d   :  { %v324_v63 = vpop.f32.mrf.mxu2 }
 0x24e   :  { %v473_v2 = vrot.slane %v324_v63, 7  ;;  %v496_v10 = vsel %vm5348_vm6, %v324_v63, %v495_v5 }
 0x24f   :  { %v439_v16 = vpop.f32.mrf.mxu3 }
 0x250   :  { %v475_v6 = vsel %vm5348_vm6, %v473_v2, %v301_v9  ;;  %v488_v25 = vrot.slane %v439_v16, 2  ;;  %v505_v26 = vrot.slane %v439_v16, 3 }
 0x251   :  { %v566_v50 = vpop.f32.mrf.mxu1 }
 0x252   :  { %v567_v54 = vadd.f32 %v3520_v48, %v566_v50 }
 0x255   :  { %v347_v1 = vpop.f32.mrf.mxu2 }
 0x256   :  { %v476_v3 = vrot.slane %v347_v1, 6  ;;  %v497_v4 = vrot.slane %v347_v1, 7 }
 0x258   :  { %v478_v13 = vsel %vm5347_vm7, %v476_v3, %v475_v6  ;;  %v498_v11 = vsel %vm5347_vm7, %v497_v4, %v496_v10 }
 0x259   :  { %v481_v17 = vsel %vm5346_vm8, %v479_v14, %v478_v13  ;;  %v500_v18 = vsel %vm5346_vm8, %v499_v15, %v498_v11  ;;  %v569_v7 = vpop.f32.mrf.mxu1 }
 0x25a   :  { %v484_v27 = vsel %vm5345_vm9, %v482_v19, %v481_v17  ;;  %v502_v28 = vsel %vm5345_vm9, %v501_v20, %v500_v18  ;;  %v570_v61 = vadd.f32 %v3520_v48, %v569_v7 }
 0x261   :  { %v572_v0 = vpop.f32.mrf.mxu1 }
 0x262   :  { %v573_v5 = vadd.f32 %v3520_v48, %v572_v0 }
 0x265   :  { %v416_v22 = vpop.f32.mrf.mxu2 }
 0x266   :  { %v485_v23 = vrot.slane %v416_v22, 3  ;;  %v503_v24 = vrot.slane %v416_v22, 4 }
 0x268   :  { %v487_v31 = vsel %vm5344_vm10, %v485_v23, %v484_v27  ;;  %v504_v32 = vsel %vm5344_vm10, %v503_v24, %v502_v28 }
 0x269   :  { %v490_v33 = vsel %vm5343_vm11, %v488_v25, %v487_v31  ;;  %v506_v34 = vsel %vm5343_vm11, %v505_v26, %v504_v32  ;;  %v575_v17 = vpop.f32.mrf.mxu1 }
 0x26a   :  { %v493_v35 = vsel %vm5342_vm12, %v491_v29, %v490_v33  ;;  %v508_v36 = vsel %vm5342_vm12, %v507_v30, %v506_v34  ;;  %v576_v29 = vadd.f32 %v3520_v48, %v575_v17 }
 0x26b   :  { %v3499_v37 = vpack.i.bf16 %v493_v35, %v508_v36 }
 0x26d   :  { %3500 = vrot.lane.b32.xlu1 %v3499_v37, %s3628_s17 }
 0x271   :  { %v578_v34 = vpop.f32.mrf.mxu1 }
 0x2df   :  { %v3501_v38 = vpop.permute.xlu1 %3500 }
 0x2e0   :  { %v3502_v39 = vunpack.i.l.bf16 %v3501_v38  ;;  %v3503_v40 = vunpack.i.h.bf16 %v3501_v38 }
 0x2e2   :  { %611 = vmatpush.msrb.mxu2 %v3502_v39 }
 0x2e4   :  { %612 = vmatpush.msrb.mxu2 %v3503_v40 }
 0x2e6   :  { %613 = vmatpush.msrb.mxu2 %v508_v36 }
 0x2e8   :  { %614 = vmatpush.msrb.mxu2 %v493_v35 }
 0x2e9   :  { %3363 = vmatmul.msk.f32.vlgmr.msrb.gmra.mxu2 %vm161_vm3, %v516_v41 }
 0x2f1   :  { %3364 = vmatmul.msk.f32.gmra.mxu2 %vm161_vm3, %v517_v42  ;;  %v579_v42 = vadd.f32 %v3520_v48, %v578_v34 }
 0x2f9   :  { %3365 = vmatmul.msk.f32.gmra.mxu2 %vm161_vm3, %v518_v43 }
 0x301   :  { %3366 = vmatmul.msk.f32.gmra.mxu2 %vm161_vm3, %v519_v44 }
 0x309   :  { %3367 = vmatmul.msk.f32.gmra.mxu2 %vm161_vm3, %v520_v45 }
 0x311   :  { %3368 = vmatmul.msk.f32.gmra.mxu2 %vm161_vm3, %v521_v46 }
 0x36c   :  { %v616_v51 = vpop.f32.mrf.mxu2 }
 0x36d   :  { %v3846_v52 = vadd.f32 %v616_v51, %v564_v49 }
 0x36f   :  { %v3849_v53 = vmul.f32 0.70710677, %v3846_v52 }
 0x371   :  { %v646_v56 = vmul.f32 %v3849_v53, %v3849_v53 }
 0x373   :  { %v3858_v59 = vmin.f32 %v646_v56, 16.0 }
 0x374   :  { %v619_v55 = vpop.f32.mrf.mxu2 }
 0x375   :  { %v3853_v57 = vadd.f32 %v619_v55, %v567_v54  ;;  %v659_v9 = vmul.f32 3.8918573e-05, %v3858_v59  ;;  %v648_v30 = vmul.f32 2.1237322e-06, %v3858_v59 }
 0x377   :  { %v3856_v58 = vmul.f32 0.70710677, %v3853_v57  ;;  %v660_v3 = vadd.f32 0.001143296, %v659_v9  ;;  %v649_v38 = vadd.f32 0.00028619796, %v648_v30 }
 0x379   :  { %v686_v60 = vmul.f32 %v3856_v58, %v3856_v58  ;;  %v661_v11 = vmul.f32 %v660_v3, %v3858_v59  ;;  %v650_v50 = vmul.f32 %v649_v38, %v3858_v59 }
 0x37b   :  { %v3862_v62 = vmin.f32 %v686_v60, 16.0  ;;  %v662_v18 = vadd.f32 0.014752088, %v661_v11  ;;  %v651_v0 = vadd.f32 0.0036580483, %v650_v50 }
 0x37c   :  { %v622_v8 = vpop.f32.mrf.mxu2 }
 0x37d   :  { %v3865_v63 = vadd.f32 %v622_v8, %v570_v61  ;;  %v699_v1 = vmul.f32 3.8918573e-05, %v3862_v62  ;;  %v663_v23 = vmul.f32 %v662_v18, %v3858_v59  ;;  %v688_v35 = vmul.f32 2.1237322e-06, %v3862_v62 }
 0x37f   :  { %v3869_v2 = vmul.f32 0.70710677, %v3865_v63  ;;  %v700_v6 = vadd.f32 0.001143296, %v699_v1  ;;  %v664_v31 = vadd.f32 0.112945676, %v663_v23 }
 0x380   :  { %v689_v46 = vadd.f32 0.00028619796, %v688_v35 }
 0x381   :  { %v726_v4 = vmul.f32 %v3869_v2, %v3869_v2  ;;  %v701_v14 = vmul.f32 %v700_v6, %v3862_v62  ;;  %v665_v40 = vmul.f32 %v664_v31, %v3858_v59 }
 0x382   :  { %v690_v60 = vmul.f32 %v689_v46, %v3862_v62 }
 0x383   :  { %v3873_v10 = vmin.f32 %v726_v4, 16.0  ;;  %v702_v19 = vadd.f32 0.014752088, %v701_v14  ;;  %v666_v48 = vadd.f32 0.4994258, %v665_v40 }
 0x384   :  { %v625_v13 = vpop.f32.mrf.mxu2  ;;  %v691_v14 = vadd.f32 0.0036580483, %v690_v60 }
 0x385   :  { %v3876_v12 = vadd.f32 %v625_v13, %v573_v5  ;;  %v739_v15 = vmul.f32 3.8918573e-05, %v3873_v10  ;;  %v703_v26 = vmul.f32 %v702_v19, %v3862_v62  ;;  %v728_v43 = vmul.f32 2.1237322e-06, %v3873_v10 }
 0x386   :  { %v667_v4 = vmul.f32 %v666_v48, %v3858_v59  ;;  %v692_v30 = vmul.f32 %v691_v14, %v3862_v62 }
 0x387   :  { %v3881_v16 = vmul.f32 0.70710677, %v3876_v12  ;;  %v740_v20 = vadd.f32 0.001143296, %v739_v15  ;;  %v704_v36 = vadd.f32 0.112945676, %v703_v26 }
 0x388   :  { %v729_v7 = vadd.f32 0.00028619796, %v728_v43  ;;  %v3926_v23 = vadd.f32 1.0, %v667_v4 }
 0x389   :  { %v766_v21 = vmul.f32 %v3881_v16, %v3881_v16  ;;  %v741_v24 = vmul.f32 %v740_v20, %v3873_v10  ;;  %v705_v47 = vmul.f32 %v704_v36, %v3862_v62 }
 0x38a   :  { %v730_v11 = vmul.f32 %v729_v7, %v3873_v10  ;;  %3524 = vrcp.f32 %v3926_v23  ;;  %vm674_vm12 = vweird.f32 %v3926_v23 }
 0x38b   :  { %v3887_v25 = vmin.f32 %v766_v21, 16.0  ;;  %v742_v27 = vadd.f32 0.014752088, %v741_v24  ;;  %v706_v61 = vadd.f32 0.4994258, %v705_v47 }
 0x38c   :  { %v628_v22 = vpop.f32.mrf.mxu2  ;;  %v731_v26 = vadd.f32 0.0036580483, %v730_v11  ;;  %v693_v47 = vadd.f32 0.05243302, %v692_v30 }
 0x38d   :  { %v779_v28 = vmul.f32 3.8918573e-05, %v3887_v25  ;;  %v3892_v33 = vadd.f32 %v628_v22, %v576_v29  ;;  %v743_v37 = vmul.f32 %v742_v27, %v3873_v10  ;;  %v768_v5 = vmul.f32 2.1237322e-06, %v3887_v25 }
 0x38e   :  { %v707_v15 = vmul.f32 %v706_v61, %v3862_v62  ;;  %v652_v22 = vmul.f32 %v651_v0, %v3858_v59  ;;  %v732_v40 = vmul.f32 %v731_v26, %v3873_v10  ;;  %v694_v0 = vmul.f32 %v693_v47, %v3862_v62 }
 0x38f   :  { %v780_v32 = vadd.f32 0.001143296, %v779_v28  ;;  %v3900_v45 = vmul.f32 0.70710677, %v3892_v33  ;;  %v744_v49 = vadd.f32 0.112945676, %v743_v37 }
 0x390   :  { %v769_v24 = vadd.f32 0.00028619796, %v768_v5  ;;  %v3933_v31 = vadd.f32 1.0, %v707_v15  ;;  %v733_v60 = vadd.f32 0.05243302, %v732_v40 }
 0x391   :  { %v781_v39 = vmul.f32 %v780_v32, %v3887_v25  ;;  %v806_v54 = vmul.f32 %v3900_v45, %v3900_v45  ;;  %v745_v8 = vmul.f32 %v744_v49, %v3873_v10 }
 0x392   :  { %v770_v38 = vmul.f32 %v769_v24, %v3887_v25  ;;  %3526 = vrcp.f32 %v3933_v31  ;;  %vm714_vm0 = vweird.f32 %v3933_v31 }
 0x393   :  { %v782_v44 = vadd.f32 0.014752088, %v781_v39  ;;  %v3911_v9 = vmin.f32 %v806_v54, 16.0  ;;  %v746_v17 = vadd.f32 0.4994258, %v745_v8 }
 0x394   :  { %v631_v41 = vpop.f32.mrf.mxu2  ;;  %v653_v39 = vadd.f32 0.05243302, %v652_v22  ;;  %v771_v50 = vadd.f32 0.0036580483, %v770_v38 }
 0x395   :  { %v783_v51 = vmul.f32 %v782_v44, %v3887_v25  ;;  %v3907_v55 = vadd.f32 %v631_v41, %v579_v42  ;;  %v808_v6 = vmul.f32 2.1237322e-06, %v3911_v9  ;;  %v819_v13 = vmul.f32 3.8918573e-05, %v3911_v9 }
 0x396   :  { %v747_v32 = vmul.f32 %v746_v17, %v3873_v10  ;;  %v654_v7 = vmul.f32 %v653_v39, %v3858_v59  ;;  %v772_v4 = vmul.f32 %v771_v50, %v3887_v25  ;;  %v734_v17 = vmul.f32 %v733_v60, %v3873_v10 }
 0x397   :  { %v784_v56 = vadd.f32 0.112945676, %v783_v51  ;;  %v3915_v3 = vmul.f32 0.70710677, %v3907_v55  ;;  %v809_v19 = vadd.f32 0.00028619796, %v808_v6 }
 0x398   :  { %v820_v20 = vadd.f32 0.001143296, %v819_v13  ;;  %v3944_v42 = vadd.f32 1.0, %v747_v32  ;;  %v655_v14 = vadd.f32 0.18741608, %v654_v7 }
 0x399   :  { %v785_v1 = vmul.f32 %v784_v56, %v3887_v25  ;;  %v846_v21 = vmul.f32 %v3915_v3, %v3915_v3  ;;  %v810_v34 = vmul.f32 %v809_v19, %v3911_v9  ;;  %v3952_v56 = vpop.eup %3524  ;;  %v773_v26 = vadd.f32 0.05243302, %v772_v4 }
 0x39a   :  { %v821_v28 = vmul.f32 %v820_v20, %v3911_v9  ;;  %v3960_v11 = vpop.eup %3526  ;;  %v670_v15 = vmul.f32 %v3952_v56, %v3926_v23  ;;  %v656_v32 = vmul.f32 %v655_v14, %v3858_v59  ;;  %vm754_vm14 = vweird.f32 %v3944_v42 }
 0x39b   :  { %v786_v18 = vadd.f32 0.4994258, %v785_v1  ;;  %v3930_v29 = vmin.f32 %v846_v21, 16.0  ;;  %v811_v49 = vadd.f32 0.0036580483, %v810_v34  ;;  %vm715_vm13 = vweird.f32 %v3960_v11 }
 0x39c   :  { %v822_v35 = vadd.f32 0.014752088, %v821_v28  ;;  %v695_v21 = vadd.f32 0.18741608, %v694_v0  ;;  %v671_v34 = vsub.f32 1.0, %v670_v15  ;;  %vm675_vm15 = vweird.f32 %v3952_v56 }
 0x39d   :  { %v787_v27 = vmul.f32 %v786_v18, %v3887_v25  ;;  %v848_v36 = vmul.f32 2.1237322e-06, %v3930_v29  ;;  %v859_v37 = vmul.f32 3.8918573e-05, %v3930_v29  ;;  %v812_v1 = vmul.f32 %v811_v49, %v3911_v9 }
 0x39e   :  { %v823_v43 = vmul.f32 %v822_v35, %v3911_v9  ;;  %v680_v35 = vand.u32 2147483648, %v3926_v23  ;;  %v696_v39 = vmul.f32 %v695_v21, %v3862_v62  ;;  %v3987_v49 = vadd.f32 1.1283791, %v656_v32 }
 0x39f   :  { %v3942_v41 = vadd.f32 1.0, %v787_v27  ;;  %v849_v44 = vadd.f32 0.00028619796, %v848_v36  ;;  %v860_v46 = vadd.f32 0.001143296, %v859_v37  ;;  %v710_v36 = vmul.f32 %v3960_v11, %v3933_v31 }
 0x3a0   :  { %v824_v51 = vadd.f32 0.112945676, %v823_v43  ;;  %v813_v22 = vadd.f32 0.05243302, %v812_v1  ;;  %v735_v37 = vadd.f32 0.18741608, %v734_v17  ;;  %v672_v50 = vmul.f32 %v3952_v56, %v671_v34 }
 0x3a1   :  { %v850_v54 = vmul.f32 %v849_v44, %v3930_v29  ;;  %v861_v48 = vmul.f32 %v860_v46, %v3930_v29  ;;  %3528 = vrcp.f32 %v3942_v41  ;;  %v720_v44 = vand.u32 2147483648, %v3933_v31 }
 0x3a2   :  { %3530 = vrcp.f32 %v3944_v42  ;;  %v825_v61 = vmul.f32 %v824_v51, %v3911_v9  ;;  %v814_v43 = vmul.f32 %v813_v22, %v3911_v9  ;;  %v774_v46 = vmul.f32 %v773_v26, %v3887_v25 }
 0x3a3   :  { %v862_v8 = vadd.f32 0.014752088, %v861_v48  ;;  %v851_v6 = vadd.f32 0.0036580483, %v850_v54  ;;  %v678_v51 = vand.u32 2147483647, %v3926_v23  ;;  %v736_v7 = vmul.f32 %v735_v37, %v3873_v10 }
 0x3a4   :  { %v826_v5 = vadd.f32 0.4994258, %v825_v61  ;;  %v3992_v62 = vor.u32 1.1754944e-38, %v680_v35  ;;  %v711_v48 = vsub.f32 1.0, %v710_v36  ;;  %v3995_v61 = vadd.f32 1.1283791, %v696_v39 }
 0x3a5   :  { %v863_v13 = vmul.f32 %v862_v8, %v3930_v29  ;;  %v852_v28 = vmul.f32 %v851_v6, %v3930_v29  ;;  %v815_v0 = vadd.f32 0.18741608, %v814_v43  ;;  %v4000_v6 = vor.u32 1.1754944e-38, %v720_v44 }
 0x3a6   :  { %v827_v18 = vmul.f32 %v826_v5, %v3911_v9  ;;  %v718_v5 = vand.u32 2147483647, %v3933_v31  ;;  %v4004_v15 = vadd.f32 %v3952_v56, %v672_v50  ;;  %v712_v17 = vmul.f32 %v3960_v11, %v711_v48  ;;  %v1047_v31 = vld [vmem:[#allocation2 + $0x370] sm:$0xff] }
 0x3a7   :  { %v864_v19 = vadd.f32 0.112945676, %v863_v13  ;;  %v3966_v20 = vpop.eup %3528  ;;  %v853_v47 = vadd.f32 0.05243302, %v852_v28  ;;  %v775_v13 = vadd.f32 0.18741608, %v774_v46  ;;  %v816_v26 = vmul.f32 %v815_v0, %v3911_v9 }
 0x3a8   :  { %v3968_v24 = vpop.eup %3530  ;;  %v3970_v27 = vadd.f32 1.0, %v827_v18  ;;  %v790_v38 = vmul.f32 %v3966_v20, %v3942_v41  ;;  %v4010_v18 = vadd.f32 1.1283791, %v736_v7  ;;  %v758_v22 = vand.u32 2147483647, %v3944_v42  ;;  %v898_v7 = vld [vmem:[%s5335_s2] sm:$0xff] }
 0x3a9   :  { %v865_v30 = vmul.f32 %v864_v19, %v3930_v29  ;;  %v750_v40 = vmul.f32 %v3968_v24, %v3944_v42  ;;  %v854_v14 = vmul.f32 %v853_v47, %v3930_v29  ;;  %vm755_vm1 = vweird.f32 %v3968_v24 }
 0x3aa   :  { %3532 = vrcp.f32 %v3970_v27  ;;  %v791_v60 = vsub.f32 1.0, %v790_v38  ;;  %v776_v32 = vmul.f32 %v775_v13, %v3887_v25  ;;  %v798_v35 = vand.u32 2147483647, %v3942_v41 }
 0x3ab   :  { %v866_v59 = vadd.f32 0.4994258, %v865_v30  ;;  %v751_v8 = vsub.f32 1.0, %v750_v40  ;;  %v760_v30 = vand.u32 2147483648, %v3944_v42  ;;  %v855_v34 = vadd.f32 0.18741608, %v854_v14 }
 0x3ac   :  { %v792_v19 = vmul.f32 %v3966_v20, %v791_v60  ;;  %v840_v37 = vand.u32 2147483648, %v3970_v27  ;;  %vm795_vm10 = vweird.f32 %v3966_v20  ;;  %v800_v9 = vand.u32 2147483648, %v3942_v41 }
 0x3ad   :  { %v867_v54 = vmul.f32 %v866_v59, %v3930_v29  ;;  %v752_v21 = vmul.f32 %v3968_v24, %v751_v8  ;;  %v838_v39 = vand.u32 2147483647, %v3970_v27  ;;  %v817_v43 = vadd.f32 1.1283791, %v816_v26 }
 0x3ae   :  { %v793_v38 = vadd.f32 %v3966_v20, %v792_v19  ;;  %vm834_vm9 = vweird.f32 %v3970_v27  ;;  %v713_v44 = vadd.f32 %v3960_v11, %v712_v17  ;;  %vm4032_vm8 = vcmp.eq.f32.partialorder %v718_v5, 8.507059e+37 }
 0x3af   :  { %v3997_v1 = vadd.f32 1.0, %v867_v54  ;;  %v753_v25 = vadd.f32 %v3968_v24, %v752_v21  ;;  %vm794_vm7 = vweird.f32 %v3942_v41  ;;  %v856_v50 = vmul.f32 %v855_v34, %v3930_v29 }
 0x3b0   :  { %v3533_v4 = vpop.eup %3532  ;;  %v777_v48 = vadd.f32 1.1283791, %v776_v32  ;;  %vm4045_vm5 = vmor %vm794_vm7, %vm795_vm10  ;;  %vm4049_vm4 = vcmp.eq.f32.partialorder %v798_v35, 8.507059e+37  ;;  %v841_v60 = vor.u32 1.1754944e-38, %v840_v37  ;;  %v801_v0 = vor.u32 1.1754944e-38, %v800_v9 }
 0x3b1   :  { %v830_v10 = vmul.f32 %v3533_v4, %v3970_v27  ;;  %3534 = vrcp.f32 %v3997_v1  ;;  %vm835_vm11 = vweird.f32 %v3533_v4  ;;  %v797_v8 = vsel %vm4045_vm5, %v3966_v20, %v793_v38 }
 0x3b2   :  { %vm4037_vm6 = vmor %vm834_vm9, %vm835_vm11  ;;  %vm839_vm7 = vcmp.eq.f32.partialorder %v838_v39, 8.507059e+37  ;;  %v818_v13 = vmul.f32 %v817_v43, %v3900_v45  ;;  %v880_v42 = vand.u32 2147483648, %v3997_v1  ;;  %v857_v20 = vadd.f32 1.1283791, %v856_v50 }
 0x3b3   :  { %v831_v28 = vsub.f32 1.0, %v830_v10  ;;  %vm4059_vm9 = vmor %vm754_vm14, %vm755_vm1  ;;  %v878_v19 = vand.u32 2147483647, %v3997_v1  ;;  %vm759_vm10 = vcmp.eq.f32.partialorder %v758_v22, 8.507059e+37  ;;  %v802_v21 = vsel %vm4049_vm4, %v801_v0, %v797_v8  ;;  %v1005_v10 = vld [vmem:[#allocation2 + $0x220] sm:$0xff] }
 0x3b4   :  { %vm4089_vm11 = vmor %vm674_vm12, %vm675_vm15  ;;  %v778_v26 = vmul.f32 %v777_v48, %v3881_v16  ;;  %v738_v22 = vmul.f32 %v4010_v18, %v3869_v2  ;;  %v881_v34 = vor.u32 1.1754944e-38, %v880_v42  ;;  %vm679_vm14 = vcmp.eq.f32.partialorder %v678_v51, 8.507059e+37  ;;  %v1023_v42 = vld [vmem:[#allocation2 + $0x2b0] sm:$0xff] }
 0x3b5   :  { %v832_v36 = vmul.f32 %v3533_v4, %v831_v28  ;;  %vm879_vm12 = vcmp.eq.f32.partialorder %v878_v19, 8.507059e+37  ;;  %v698_v16 = vmul.f32 %v3995_v61, %v3856_v58  ;;  %v636_v47 = vmul.f32 0.5, %v3865_v63  ;;  %v1004_v19 = vld [vmem:[#allocation2 + $0x218] sm:$0xff] }
 0x3b6   :  { %v803_v35 = vmul.f32 %v802_v21, %v778_v26  ;;  %v634_v48 = vmul.f32 0.5, %v3846_v52  ;;  %v899_v52 = vld [vmem:[%s5335_s2 + $0x8] sm:$0xff]  ;;  %v1039_v21 = vld [vmem:[#allocation2 + $0x330] sm:$0xff]  ;;  %vm5366_vm15 = vcmask 523264  }
 0x3b7   :  { %v3535_v40 = vpop.eup %3534  ;;  %v833_v59 = vadd.f32 %v3533_v4, %v832_v36  ;;  %v858_v36 = vmul.f32 %v857_v20, %v3915_v3  ;;  %v658_v3 = vmul.f32 %v3987_v49, %v3849_v53  ;;  %v1022_v20 = vld [vmem:[#allocation2 + $0x2a8] sm:$0xff] }
 0x3b8   :  { %v870_v54 = vmul.f32 %v3535_v40, %v3997_v1  ;;  %vm875_vm5 = vweird.f32 %v3535_v40  ;;  %v3372_v23 = vclamps-f32 %v803_v35, 1.0  ;;  %v1038_v26 = vld [vmem:[#allocation2 + $0x328] sm:$0xff]  ;;  %v1019_v35 = vld [vmem:[#allocation2 + $0x290] sm:$0xff] }
 0x3b9   :  { %v837_v41 = vsel %vm4037_vm6, %v3533_v4, %v833_v59  ;;  %v757_v4 = vsel %vm4059_vm9, %v3968_v24, %v753_v25  ;;  %vm4075_vm6 = vmor %vm714_vm0, %vm715_vm13  ;;  %v761_v24 = vor.u32 1.1754944e-38, %v760_v30  ;;  %vm874_vm13 = vweird.f32 %v3997_v1 }
 0x3ba   :  { %v871_v5 = vsub.f32 1.0, %v870_v54  ;;  %v842_v14 = vsel %vm839_vm7, %v841_v60, %v837_v41  ;;  %v717_v45 = vsel %vm4075_vm6, %v3960_v11, %v713_v44  ;;  %v677_v11 = vsel %vm4089_vm11, %v3952_v56, %v4004_v15  ;;  %vm876_vm4 = vmor %vm874_vm13, %vm875_vm5  ;;  %v901_v41 = vld [vmem:[%s5335_s2 + $0x18] sm:$0xff] }
 0x3bb   :  { %v843_v28 = vmul.f32 %v842_v14, %v818_v13  ;;  %v762_v30 = vsel %vm759_vm10, %v761_v24, %v757_v4  ;;  %v722_v56 = vsel %vm4032_vm8, %v4000_v6, %v717_v45  ;;  %v682_v2 = vsel %vm679_vm14, %v3992_v62, %v677_v11  ;;  %v1007_v4 = vld [vmem:[#allocation2 + $0x230] sm:$0xff]  ;;  %v1006_v13 = vld [vmem:[#allocation2 + $0x228] sm:$0xff]  ;;  %v1024_v14 = vld [vmem:[#allocation2 + $0x2b8] sm:$0xff] }
 0x3bc   :  { %v872_v17 = vmul.f32 %v3535_v40, %v871_v5  ;;  %v763_v15 = vmul.f32 %v762_v30, %v738_v22  ;;  %v723_v9 = vmul.f32 %v722_v56, %v698_v16  ;;  %v683_v51 = vmul.f32 %v682_v2, %v658_v3  ;;  %v1008_v5 = vld [vmem:[#allocation2 + $0x238] sm:$0xff]  ;;  %v1021_v24 = vld [vmem:[#allocation2 + $0x2a0] sm:$0xff]  ;;  %v1018_v56 = vld [vmem:[#allocation2 + $0x288] sm:$0xff] }
 0x3bd   :  { %v3373_v38 = vclamps-f32 %v843_v28, 1.0  ;;  %v638_v6 = vmul.f32 0.5, %v3892_v33  ;;  %v889_v62 = vadd.f32 1.0, %v3372_v23  ;;  %v637_v44 = vmul.f32 0.5, %v3876_v12  ;;  %1076 = vmatpush.msra.mxu0 %v1008_v5  ;;  %v1048_v45 = vld [vmem:[#allocation2 + $0x378] sm:$0xff]  ;;  %v1046_v28 = vld [vmem:[#allocation2 + $0x368] sm:$0xff]  ;;  %vm5370_vm7 = vmmov %vm5366_vm15 }
 0x3be   :  { %v873_v32 = vadd.f32 %v3535_v40, %v872_v17  ;;  %v3371_v25 = vclamps-f32 %v763_v15, 1.0  ;;  %v3370_v59 = vclamps-f32 %v723_v9, 1.0  ;;  %v3369_v46 = vclamps-f32 %v683_v51, 1.0  ;;  %v1040_v17 = vld [vmem:[#allocation2 + $0x338] sm:$0xff]  ;;  %1191 = vmatpush.msra.mxu2 %v1048_v45  ;;  %v1037_v22 = vld [vmem:[#allocation2 + $0x320] sm:$0xff]  ;;  %v1015_v15 = vld [vmem:[#allocation2 + $0x270] sm:$0xff] }
 0x3bf   :  { %v890_v61 = vadd.f32 1.0, %v3373_v38  ;;  %v635_v33 = vmul.f32 0.5, %v3853_v57  ;;  %v900_v57 = vld [vmem:[%s5335_s2 + $0x10] sm:$0xff]  ;;  %1077 = vmatpush.msra.mxu0 %v1007_v4  ;;  %1168 = vmatpush.msrb.mxu1 %v1040_v17  ;;  %v1020_v11 = vld [vmem:[#allocation2 + $0x298] sm:$0xff]  ;;  %v1045_v30 = vld [vmem:[#allocation2 + $0x360] sm:$0xff]  ;;  %vm5365_vm8 = vcmask 1040384  }
 0x3c0   :  { %v877_v37 = vsel %vm876_vm4, %v3535_v40, %v873_v32  ;;  %v639_v40 = vmul.f32 0.5, %v3907_v55  ;;  %v888_v49 = vadd.f32 1.0, %v3371_v25  ;;  %v4122_v55 = vmul.f32 %v889_v62, %v637_v44  ;;  %v1003_v32 = vld [vmem:[#allocation2 + $0x210] sm:$0xff]  ;;  %1192 = vmatpush.msra.mxu2 %v1047_v31  ;;  %v1001_v16 = vld [vmem:[#allocation2 + $0x200] sm:$0xff]  ;;  %v1014_v38 = vld [vmem:[#allocation2 + $0x268] sm:$0xff] }
 0x3c1   :  { %v882_v1 = vsel %vm879_vm12, %v881_v34, %v877_v37  ;;  %v4118_v53 = vmul.f32 %v890_v61, %v638_v6  ;;  %v887_v50 = vadd.f32 1.0, %v3370_v59  ;;  %v886_v12 = vadd.f32 1.0, %v3369_v46  ;;  %1078 = vmatpush.msra.mxu0 %v1006_v13  ;;  %1169 = vmatpush.msrb.mxu1 %v1039_v21  ;;  %v1002_v34 = vld [vmem:[#allocation2 + $0x208] sm:$0xff]  ;;  %v1044_v37 = vld [vmem:[#allocation2 + $0x358] sm:$0xff]  ;;  %v1017_v2 = vld [vmem:[#allocation2 + $0x280] sm:$0xff] }
 0x3c2   :  { %v883_v18 = vmul.f32 %v882_v1, %v858_v36  ;;  %v4126_v54 = vmul.f32 %v888_v49, %v636_v47  ;;  %1193 = vmatpush.msra.mxu2 %v1046_v28  ;;  %v1036_v36 = vld [vmem:[#allocation2 + $0x318] sm:$0xff]  ;;  %v1013_v3 = vld [vmem:[#allocation2 + $0x260] sm:$0xff]  ;;  %v1010_v23 = vld [vmem:[#allocation2 + $0x248] sm:$0xff] }
 0x3c3   :  { %v4130_v27 = vmul.f32 %v887_v50, %v635_v33  ;;  %v4133_v63 = vmul.f32 %v886_v12, %v634_v48  ;;  %1079 = vmatpush.msra.mxu0 %v1005_v10  ;;  %1170 = vmatpush.msrb.mxu1 %v1038_v26  ;;  %v1016_v1 = vld [vmem:[#allocation2 + $0x278] sm:$0xff]  ;;  %v1035_v51 = vld [vmem:[#allocation2 + $0x310] sm:$0xff]  ;;  %v1009_v61 = vld [vmem:[#allocation2 + $0x240] sm:$0xff] }
 0x3c4   :  { %v3374_v39 = vclamps-f32 %v883_v18, 1.0  ;;  %1194 = vmatpush.msra.mxu2 %v1045_v30  ;;  %v1056_v18 = vld [vmem:[#allocation2 + $0x3b8] sm:$0xff]  ;;  %v1034_v25 = vld [vmem:[#allocation2 + $0x308] sm:$0xff]  ;;  %v1033_v59 = vld [vmem:[#allocation2 + $0x300] sm:$0xff] }
 0x3c5   :  { %1080 = vmatpush.msra.mxu0 %v1004_v19  ;;  %1171 = vmatpush.msrb.mxu1 %v1037_v22  ;;  %v1012_v9 = vld [vmem:[#allocation2 + $0x258] sm:$0xff]  ;;  %v1042_v6 = vld [vmem:[#allocation2 + $0x348] sm:$0xff]  ;;  %v1041_v44 = vld [vmem:[#allocation2 + $0x340] sm:$0xff] }
 0x3c6   :  { %v891_v58 = vadd.f32 1.0, %v3374_v39  ;;  %1195 = vmatpush.msra.mxu2 %v1044_v37  ;;  %v1011_v39 = vld [vmem:[#allocation2 + $0x250] sm:$0xff]  ;;  %v1054_v62 = vld [vmem:[#allocation2 + $0x3a8] sm:$0xff]  ;;  %v1053_v49 = vld [vmem:[#allocation2 + $0x3a0] sm:$0xff] }
 0x3c7   :  { %1081 = vmatpush.msra.mxu0 %v1003_v32  ;;  %1172 = vmatpush.msrb.mxu1 %v1036_v36  ;;  %v1052_v46 = vld [vmem:[#allocation2 + $0x398] sm:$0xff]  ;;  %v3390_v47 = vld [vmem:[%s5338_s5 + $0x40] sm:$0xff]  ;;  %v1051_v50 = vld [vmem:[#allocation2 + $0x390] sm:$0xff] }
 0x3c8   :  { %v4114_v43 = vmul.f32 %v891_v58, %v639_v40  ;;  %v1043_v40 = vld [vmem:[#allocation2 + $0x350] sm:$0xff]  ;;  %v3389_v33 = vld [vmem:[%s5338_s5 + $0x38] sm:$0xff]  ;;  %v1050_v12 = vld [vmem:[#allocation2 + $0x388] sm:$0xff] }
 0x3c9   :  { %1082 = vmatpush.msra.mxu0 %v1002_v34  ;;  %1173 = vmatpush.msrb.mxu1 %v1035_v51  ;;  %v1055_v58 = vld [vmem:[#allocation2 + $0x3b0] sm:$0xff]  ;;  %vm5367_vm0 = vmmov %vm5365_vm8  ;;  %v1029_v30 = vld [vmem:[#allocation2 + $0x2e0] sm:$0xff] }
 0x3ca   :  { %924 = vmatpush.msra.mxu3 %v4114_v43  ;;  %1196 = vmatpush.msra.mxu2 %v1043_v40  ;;  %v3388_v48 = vld [vmem:[%s5338_s5 + $0x30] sm:$0xff]  ;;  %vm5368_vm1 = vmmov %vm5367_vm0  ;;  %v1028_v36 = vld [vmem:[#allocation2 + $0x2d8] sm:$0xff] }
 0x3cb   :  { %1083 = vmatpush.msra.mxu0 %v1001_v16  ;;  %1174 = vmatpush.msrb.mxu1 %v1034_v25  ;;  %v1031_v21 = vld [vmem:[#allocation2 + $0x2f0] sm:$0xff]  ;;  %vm5369_vm9 = vmmov %vm5367_vm0  ;;  %v1062_v51 = vld [vmem:[#allocation2 + $0x3e8] sm:$0xff] }
 0x3cc   :  { %925 = vmatpush.msra.mxu3 %v4118_v53  ;;  %1197 = vmatpush.msra.mxu2 %v1042_v6  ;;  %vm5371_vm6 = vmmov %vm5370_vm7  ;;  %v1060_v40 = vld [vmem:[#allocation2 + $0x3d8] sm:$0xff]  ;;  %v1058_v25 = vld [vmem:[#allocation2 + $0x3c8] sm:$0xff] }
 0x3cd   :  { %1099 = vmatpush.msrb.mxu0 %v1016_v1  ;;  %1175 = vmatpush.msrb.mxu1 %v1033_v59  ;;  %vm5372_vm5 = vmmov %vm5371_vm6 }
 0x3ce   :  { %926 = vmatpush.msra.mxu3 %v4122_v55  ;;  %1198 = vmatpush.msra.mxu2 %v1041_v44  ;;  %vm5373_vm10 = vmmov %vm5367_vm0 }
 0x3cf   :  { %1100 = vmatpush.msrb.mxu0 %v1015_v15  ;;  %1336 = vmatpush.msra.mxu1 %v3390_v47  ;;  %vm5374_vm11 = vmmov %vm5372_vm5  ;;  %v1026_v15 = vld [vmem:[#allocation2 + $0x2c8] sm:$0xff] }
 0x3d0   :  { %927 = vmatpush.msra.mxu3 %v4126_v54  ;;  %vm5375_vm13 = vmmov %vm5367_vm0 }
 0x3d1   :  { %1101 = vmatpush.msrb.mxu0 %v1014_v38  ;;  %1337 = vmatpush.msra.mxu1 %v3389_v33  ;;  %vm5376_vm4 = vmmov %vm5372_vm5 }
 0x3d2   :  { %928 = vmatpush.msra.mxu3 %v4130_v27  ;;  %vm5377_vm12 = vmmov %vm5367_vm0 }
 0x3d3   :  { %1102 = vmatpush.msrb.mxu0 %v1013_v3  ;;  %1338 = vmatpush.msra.mxu1 %v3388_v48  ;;  %v1064_v3 = vld [vmem:[#allocation2 + $0x3f8] sm:$0xff]  ;;  %vm5378_vm14 = vmmov %vm5376_vm4 }
 0x3d4   :  { %929 = vmatpush.msra.mxu3 %v4133_v63 }
 0x3d5   :  { %3375 = vmatmul.msk.f32.vlgmr.msra.gmra.mxu3 %vm115_vm2, %v898_v7  ;;  %1103 = vmatpush.msrb.mxu0 %v1012_v9  ;;  %v1049_v7 = vld [vmem:[#allocation2 + $0x380] sm:$0xff] }
 0x3d6   :  { %1122 = vmatpush.msrb.mxu3 %v1024_v14 }
 0x3d7   :  { %1104 = vmatpush.msrb.mxu0 %v1011_v39  ;;  %v1063_v39 = vld [vmem:[#allocation2 + $0x3f0] sm:$0xff] }
 0x3d8   :  { %1123 = vmatpush.msrb.mxu3 %v1023_v42  ;;  %v1032_v42 = vld [vmem:[#allocation2 + $0x2f8] sm:$0xff] }
 0x3d9   :  { %1105 = vmatpush.msrb.mxu0 %v1010_v23 }
 0x3da   :  { %1124 = vmatpush.msrb.mxu3 %v1022_v20 }
 0x3db   :  { %1106 = vmatpush.msrb.mxu0 %v1009_v61  ;;  %v1059_v61 = vld [vmem:[#allocation2 + $0x3d0] sm:$0xff] }
 0x3dc   :  { %1125 = vmatpush.msrb.mxu3 %v1021_v24 }
 0x3dd   :  { %3376 = vmatmul.msk.f32.gmra.mxu3 %vm115_vm2, %v899_v52  ;;  %v3387_v52 = vld [vmem:[%s5338_s5 + $0x28] sm:$0xff] }
 0x3de   :  { %1126 = vmatpush.msrb.mxu3 %v1020_v11  ;;  %1339 = vmatpush.msra.mxu1 %v3387_v52  ;;  %v1030_v11 = vld [vmem:[#allocation2 + $0x2e8] sm:$0xff] }
 0x3e0   :  { %1127 = vmatpush.msrb.mxu3 %v1019_v35 }
 0x3e2   :  { %1128 = vmatpush.msrb.mxu3 %v1018_v56  ;;  %v1027_v56 = vld [vmem:[#allocation2 + $0x2d0] sm:$0xff] }
 0x3e4   :  { %1129 = vmatpush.msrb.mxu3 %v1017_v2 }
 0x3e5   :  { %3377 = vmatmul.msk.f32.gmra.mxu3 %vm115_vm2, %v900_v57 }
 0x3e6   :  { %1214 = vmatpush.msra.mxu3 %v1056_v18  ;;  %v1025_v18 = vld [vmem:[#allocation2 + $0x2c0] sm:$0xff] }
 0x3e8   :  { %1215 = vmatpush.msra.mxu3 %v1055_v58 }
 0x3ea   :  { %1216 = vmatpush.msra.mxu3 %v1054_v62  ;;  %v1057_v62 = vld [vmem:[#allocation2 + $0x3c0] sm:$0xff] }
 0x3ec   :  { %1217 = vmatpush.msra.mxu3 %v1053_v49 }
 0x3ed   :  { %3378 = vmatmul.msk.f32.gmra.mxu3 %vm115_vm2, %v901_v41 }
 0x3ee   :  { %1218 = vmatpush.msra.mxu3 %v1052_v46 }
 0x3f0   :  { %1219 = vmatpush.msra.mxu3 %v1051_v50 }
 0x3f2   :  { %1220 = vmatpush.msra.mxu3 %v1050_v12 }
 0x3f4   :  { %1221 = vmatpush.msra.mxu3 %v1049_v7 }
 0x458   :  { %v4152_v60 = vpop.f32.mrf.mxu3 }
 0x460   :  { %v4154_v29 = vpop.f32.mrf.mxu3 }
 0x468   :  { %v937_v8 = vpop.f32.mrf.mxu3 }
 0x469   :  { %944 = vrot.lane.b32.xlu2 %v937_v8, %s3627_s9 }
 0x470   :  { %v940_v0 = vpop.f32.mrf.mxu3 }
 0x471   :  { %964 = vrot.lane.b32.xlu1 %v940_v0, %s3627_s9 }
 0x4c3   :  { %v945_v57 = vpop.permute.xlu2 %944 }
 0x4c4   :  { %v4172_v41 = vsel %vm161_vm3, %v4152_v60, %v945_v57 }
 0x4c5   :  { %v950_v10 = vrot.slane %v4172_v41, 2  ;;  %v952_v20 = vrot.slane %v4172_v41, 4  ;;  %v953_v60 = vrot.slane %v4172_v41, 5  ;;  %v949_v34 = vrot.slane %v4172_v41, 1 }
 0x4c6   :  { %v954_v16 = vrot.slane %v4172_v41, 6  ;;  %v951_v9 = vrot.slane %v4172_v41, 3  ;;  %v955_v59 = vrot.slane %v4172_v41, 7 }
 0x4e3   :  { %v965_v8 = vpop.permute.xlu1 %964 }
 0x4e4   :  { %v4176_v0 = vsel %vm161_vm3, %v4154_v29, %v965_v8 }
 0x4e5   :  { %v976_v5 = vperm.slane %v4176_v0, 0  ;;  %v970_v4 = vrot.slane %v4176_v0, 2  ;;  %v972_v13 = vrot.slane %v4176_v0, 4  ;;  %v973_v14 = vrot.slane %v4176_v0, 5 }
 0x4e6   :  { %v969_v17 = vrot.slane %v4176_v0, 1  ;;  %v974_v32 = vrot.slane %v4176_v0, 6  ;;  %v971_v1 = vrot.slane %v4176_v0, 3  ;;  %v975_v58 = vrot.slane %v4176_v0, 7 }
 0x4e7   :  { %v992_v29 = vsel %vm5365_vm8, %v4172_v41, %v976_v5  ;;  %v978_v19 = vperm.slane %v970_v4, 0  ;;  %v980_v45 = vperm.slane %v972_v13, 0  ;;  %v981_v24 = vperm.slane %v973_v14, 0  ;;  %vm5379_vm8 = vmmov %vm5367_vm0 }
 0x4e8   :  { %3379 = vmatmul.msk.f32.vlgmr.msra.gmra.mxu0 %vm5366_vm15, %v992_v29  ;;  %v977_v22 = vperm.slane %v969_v17, 0  ;;  %v982_v35 = vperm.slane %v974_v32, 0  ;;  %v979_v38 = vperm.slane %v971_v1, 0  ;;  %v983_v6 = vperm.slane %v975_v58, 0  ;;  %vm5380_vm15 = vmmov %vm5376_vm4  ;;  %v1298_v1 = vld [vmem:[%s5336_s3 + $0x28] sm:$0xff] }
 0x4e9   :  { %1145 = vmatpush.msra.mxu0 %v1032_v42  ;;  %v994_v31 = vsel %vm5367_vm0, %v950_v10, %v978_v19  ;;  %v996_v26 = vsel %vm5368_vm1, %v952_v20, %v980_v45  ;;  %v997_v28 = vsel %vm5369_vm9, %v953_v60, %v981_v24  ;;  %vm5381_vm0 = vcmask 1041409  }
 0x4ea   :  { %3381 = vmatmul.msk.f32.vlgmr.msrb.gmra.mxu3 %vm5370_vm7, %v994_v31  ;;  %3383 = vmatmul.msk.f32.vlgmr.msrb.gmra.mxu1 %vm5371_vm6, %v996_v26  ;;  %v993_v37 = vsel %vm5373_vm10, %v949_v34, %v977_v22  ;;  %v998_v2 = vsel %vm5375_vm13, %v954_v16, %v982_v35  ;;  %v995_v23 = vsel %vm5377_vm12, %v951_v9, %v979_v38  ;;  %vm5382_vm1 = vmmov %vm5381_vm0  ;;  %vm5383_vm9 = vcmask 1042434   ;;  %v1293_v35 = vld [vmem:[%s5336_s3] sm:$0xff]  ;;  %v1296_v16 = vld [vmem:[%s5336_s3 + $0x18] sm:$0xff] }
 0x4eb   :  { %1146 = vmatpush.msra.mxu0 %v1031_v21  ;;  %3384 = vmatmul.msk.f32.vlgmr.msra.gmra.mxu2 %vm5372_vm5, %v997_v28  ;;  %vm5384_vm7 = vmmov %vm5383_vm9  ;;  %vm5385_vm6 = vcmask 1043459   ;;  %vm5387_vm10 = vcmask 1044484   ;;  %vm5389_vm13 = vcmask 1045509   ;;  %vm5391_vm12 = vcmask 1046534  }
 0x4ec   :  { %vm5386_vm5 = vmmov %vm5385_vm6 }
 0x4ed   :  { %1147 = vmatpush.msra.mxu0 %v1030_v11 }
 0x4ef   :  { %1148 = vmatpush.msra.mxu0 %v1029_v30 }
 0x4f0   :  { %3380 = vmatmul.msk.f32.vlgmr.msrb.gmra.mxu0 %vm5374_vm11, %v993_v37  ;;  %vm5388_vm11 = vmmov %vm5387_vm10  ;;  %v1295_v37 = vld [vmem:[%s5336_s3 + $0x10] sm:$0xff] }
 0x4f1   :  { %1149 = vmatpush.msra.mxu0 %v1028_v36  ;;  %v1294_v36 = vld [vmem:[%s5336_s3 + $0x8] sm:$0xff] }
 0x4f2   :  { %3385 = vmatmul.msk.f32.vlgmr.msra.gmra.mxu3 %vm5376_vm4, %v998_v2  ;;  %3392 = vmatmul.msk.f32.vlgmr.msra.gmra.mxu1 %vm161_vm3, %v4133_v63  ;;  %v1061_v63 = vld [vmem:[#allocation2 + $0x3e0] sm:$0xff]  ;;  %vm5390_vm4 = vmmov %vm5389_vm13 }
 0x4f3   :  { %1150 = vmatpush.msra.mxu0 %v1027_v56  ;;  %v1297_v56 = vld [vmem:[%s5336_s3 + $0x20] sm:$0xff] }
 0x4f5   :  { %1151 = vmatpush.msra.mxu0 %v1026_v15  ;;  %v3521_v15 = vld [vmem:[%s5338_s5 + $0x48] ss:$0 sm:$0xff] }
 0x4f7   :  { %1152 = vmatpush.msra.mxu0 %v1025_v18 }
 0x4f8   :  { %3382 = vmatmul.msk.f32.vlgmr.msra.gmra.mxu0 %vm5378_vm14, %v995_v23  ;;  %vm5392_vm14 = vmmov %vm5391_vm12 }
 0x4f9   :  { %1237 = vmatpush.msrb.mxu0 %v1064_v3 }
 0x4fa   :  { %3393 = vmatmul.msk.f32.gmra.mxu1 %vm161_vm3, %v4130_v27  ;;  %v999_v27 = vsel %vm5379_vm8, %v955_v59, %v983_v6  ;;  %vm5393_vm8 = vcmask 1047559  }
 0x4fb   :  { %1238 = vmatpush.msrb.mxu0 %v1063_v39 }
 0x4fd   :  { %1239 = vmatpush.msrb.mxu0 %v1062_v51 }
 0x4ff   :  { %1240 = vmatpush.msrb.mxu0 %v1061_v63 }
 0x501   :  { %1241 = vmatpush.msrb.mxu0 %v1060_v40 }
 0x502   :  { %3394 = vmatmul.msk.f32.gmra.mxu1 %vm161_vm3, %v4126_v54 }
 0x503   :  { %1242 = vmatpush.msrb.mxu0 %v1059_v61 }
 0x505   :  { %1243 = vmatpush.msrb.mxu0 %v1058_v25 }
 0x507   :  { %1244 = vmatpush.msrb.mxu0 %v1057_v62 }
 0x508   :  { %3386 = vmatmul.msk.f32.vlgmr.msrb.gmra.mxu0 %vm5380_vm15, %v999_v27  ;;  %vm5394_vm15 = vmmov %vm5393_vm8 }
 0x50a   :  { %3395 = vmatmul.msk.f32.gmra.mxu1 %vm161_vm3, %v4122_v55 }
 0x512   :  { %3396 = vmatmul.msk.f32.gmra.mxu1 %vm161_vm3, %v4118_v53 }
 0x51a   :  { %3397 = vmatmul.msk.f32.gmra.mxu1 %vm161_vm3, %v4114_v43 }
 0x565   :  { %v1085_v54 = vpop.f32.mrf.mxu0 }
 0x566   :  { %v1272_v50 = vrot.slane %v1085_v54, 1 }
 0x567   :  { %v1177_v57 = vpop.f32.mrf.mxu1 }
 0x568   :  { %v1263_v0 = vrot.slane %v1177_v57, 4  ;;  %v1278_v5 = vrot.slane %v1177_v57, 5 }
 0x56d   :  { %v1108_v44 = vpop.f32.mrf.mxu0  ;;  %v1131_v46 = vpop.f32.mrf.mxu3 }
 0x56e   :  { %v1257_v49 = vrot.slane %v1108_v44, 7  ;;  %v1259_v33 = vrot.slane %v1131_v46, 6  ;;  %v1274_v12 = vrot.slane %v1131_v46, 7  ;;  %v1273_v7 = vsel %vm5382_vm1, %v1108_v44, %v1272_v50  ;;  %v1200_v4 = vpop.f32.mrf.mxu2 }
 0x56f   :  { %v1265_v42 = vrot.slane %v1200_v4, 3  ;;  %v1280_v10 = vrot.slane %v1200_v4, 4  ;;  %v1341_v2 = vpop.f32.mrf.mxu1 }
 0x570   :  { %v1258_v48 = vsel %vm5381_vm0, %v1257_v49, %v1085_v54  ;;  %v1275_v41 = vsel %vm5384_vm7, %v1274_v12, %v1273_v7  ;;  %v1342_v18 = vadd.f32 %v3521_v15, %v1341_v2 }
 0x571   :  { %v1260_v53 = vsel %vm5383_vm9, %v1259_v33, %v1258_v48 }
 0x575   :  { %v1154_v47 = vpop.f32.mrf.mxu0  ;;  %v1223_v20 = vpop.f32.mrf.mxu3 }
 0x576   :  { %v1261_v52 = vrot.slane %v1154_v47, 5  ;;  %v1276_v55 = vrot.slane %v1154_v47, 6  ;;  %v1267_v29 = vrot.slane %v1223_v20, 2  ;;  %v1282_v19 = vrot.slane %v1223_v20, 3 }
 0x577   :  { %v1344_v38 = vpop.f32.mrf.mxu1 }
 0x578   :  { %v1262_v43 = vsel %vm5385_vm6, %v1261_v52, %v1260_v53  ;;  %v1277_v8 = vsel %vm5386_vm5, %v1276_v55, %v1275_v41  ;;  %v1345_v23 = vadd.f32 %v3521_v15, %v1344_v38 }
 0x579   :  { %v1264_v13 = vsel %vm5387_vm10, %v1263_v0, %v1262_v43  ;;  %v1279_v14 = vsel %vm5388_vm11, %v1278_v5, %v1277_v8 }
 0x57a   :  { %v1266_v60 = vsel %vm5389_vm13, %v1265_v42, %v1264_v13  ;;  %v1281_v17 = vsel %vm5390_vm4, %v1280_v10, %v1279_v14 }
 0x57b   :  { %v1268_v31 = vsel %vm5391_vm12, %v1267_v29, %v1266_v60  ;;  %v1283_v26 = vsel %vm5392_vm14, %v1282_v19, %v1281_v17 }
 0x57f   :  { %v1347_v63 = vpop.f32.mrf.mxu1 }
 0x580   :  { %v1348_v62 = vadd.f32 %v3521_v15, %v1347_v63 }
 0x585   :  { %v1246_v45 = vpop.f32.mrf.mxu0 }
 0x586   :  { %v1269_v24 = vrot.slane %v1246_v45, 1  ;;  %v1284_v21 = vrot.slane %v1246_v45, 2 }
 0x587   :  { %v1350_v49 = vpop.f32.mrf.mxu1 }
 0x588   :  { %v1270_v28 = vsel %vm5393_vm8, %v1269_v24, %v1268_v31  ;;  %v1285_v32 = vsel %vm5394_vm15, %v1284_v21, %v1283_v26  ;;  %v1351_v12 = vadd.f32 %v3521_v15, %v1350_v49 }
 0x589   :  { %v3504_v11 = vpack.i.bf16 %v1270_v28, %v1285_v32 }
 0x58b   :  { %3505 = vrot.lane.b32.xlu2 %v3504_v11, %s3628_s17 }
 0x58f   :  { %v1353_v8 = vpop.f32.mrf.mxu1 }
 0x590   :  { %v1354_v19 = vadd.f32 %v3521_v15, %v1353_v8 }
 0x597   :  { %v1356_v26 = vpop.f32.mrf.mxu1 }
 0x5e5   :  { %v3506_v22 = vpop.permute.xlu2 %3505 }
 0x5e6   :  { %v3507_v30 = vunpack.i.l.bf16 %v3506_v22  ;;  %v3508_v34 = vunpack.i.h.bf16 %v3506_v22 }
 0x5e8   :  { %1389 = vmatpush.msrb.mxu2 %v3507_v30 }
 0x5ea   :  { %1390 = vmatpush.msrb.mxu2 %v3508_v34 }
 0x5ec   :  { %1391 = vmatpush.msrb.mxu2 %v1285_v32 }
 0x5ee   :  { %1392 = vmatpush.msrb.mxu2 %v1270_v28 }
 0x5ef   :  { %3398 = vmatmul.msk.f32.vlgmr.msrb.gmra.mxu2 %vm161_vm3, %v1293_v35 }
 0x5f7   :  { %3399 = vmatmul.msk.f32.gmra.mxu2 %vm161_vm3, %v1294_v36  ;;  %v1357_v36 = vadd.f32 %v3521_v15, %v1356_v26 }
 0x5ff   :  { %3400 = vmatmul.msk.f32.gmra.mxu2 %vm161_vm3, %v1295_v37 }
 0x607   :  { %3401 = vmatmul.msk.f32.gmra.mxu2 %vm161_vm3, %v1296_v16 }
 0x60f   :  { %3402 = vmatmul.msk.f32.gmra.mxu2 %vm161_vm3, %v1297_v56 }
 0x617   :  { %3403 = vmatmul.msk.f32.gmra.mxu2 %vm161_vm3, %v1298_v1 }
 0x672   :  { %v1394_v3 = vpop.f32.mrf.mxu2 }
 0x673   :  { %v4264_v9 = vadd.f32 %v1394_v3, %v1342_v18 }
 0x675   :  { %v4267_v39 = vmul.f32 0.70710677, %v4264_v9 }
 0x677   :  { %v1424_v40 = vmul.f32 %v4267_v39, %v4267_v39 }
 0x679   :  { %v4276_v25 = vmin.f32 %v1424_v40, 16.0 }
 0x67a   :  { %v1397_v51 = vpop.f32.mrf.mxu2 }
 0x67b   :  { %v4271_v58 = vadd.f32 %v1397_v51, %v1345_v23  ;;  %v1437_v54 = vmul.f32 3.8918573e-05, %v4276_v25  ;;  %v1426_v45 = vmul.f32 2.1237322e-06, %v4276_v25 }
 0x67d   :  { %v4274_v61 = vmul.f32 0.70710677, %v4271_v58  ;;  %v1438_v50 = vadd.f32 0.001143296, %v1437_v54  ;;  %v1427_v22 = vadd.f32 0.00028619796, %v1426_v45 }
 0x67f   :  { %v1464_v6 = vmul.f32 %v4274_v61, %v4274_v61  ;;  %v1439_v55 = vmul.f32 %v1438_v50, %v4276_v25  ;;  %v1428_v38 = vmul.f32 %v1427_v22, %v4276_v25 }
 0x681   :  { %v4280_v59 = vmin.f32 %v1464_v6, 16.0  ;;  %v1440_v0 = vadd.f32 0.014752088, %v1439_v55  ;;  %v1429_v49 = vadd.f32 0.0036580483, %v1428_v38 }
 0x682   :  { %v1400_v27 = vpop.f32.mrf.mxu2 }
 0x683   :  { %v4283_v44 = vadd.f32 %v1400_v27, %v1348_v62  ;;  %v1477_v46 = vmul.f32 3.8918573e-05, %v4280_v59  ;;  %v1441_v42 = vmul.f32 %v1440_v0, %v4276_v25  ;;  %v1466_v28 = vmul.f32 2.1237322e-06, %v4280_v59 }
 0x685   :  { %v4287_v47 = vmul.f32 0.70710677, %v4283_v44  ;;  %v1478_v48 = vadd.f32 0.001143296, %v1477_v46  ;;  %v1442_v24 = vadd.f32 0.112945676, %v1441_v42 }
 0x686   :  { %v1467_v1 = vadd.f32 0.00028619796, %v1466_v28 }
 0x687   :  { %v1504_v33 = vmul.f32 %v4287_v47, %v4287_v47  ;;  %v1479_v53 = vmul.f32 %v1478_v48, %v4280_v59  ;;  %v1443_v34 = vmul.f32 %v1442_v24, %v4276_v25 }
 0x688   :  { %v1468_v6 = vmul.f32 %v1467_v1, %v4280_v59 }
 0x689   :  { %v4291_v7 = vmin.f32 %v1504_v33, 16.0  ;;  %v1480_v5 = vadd.f32 0.014752088, %v1479_v53  ;;  %v1444_v15 = vadd.f32 0.4994258, %v1443_v34 }
 0x68a   :  { %v1403_v52 = vpop.f32.mrf.mxu2  ;;  %v1469_v53 = vadd.f32 0.0036580483, %v1468_v6 }
 0x68b   :  { %v4294_v57 = vadd.f32 %v1403_v52, %v1351_v12  ;;  %v1517_v41 = vmul.f32 3.8918573e-05, %v4291_v7  ;;  %v1481_v60 = vmul.f32 %v1480_v5, %v4280_v59  ;;  %v1506_v37 = vmul.f32 2.1237322e-06, %v4291_v7 }
 0x68c   :  { %v1445_v33 = vmul.f32 %v1444_v15, %v4276_v25  ;;  %v1470_v45 = vmul.f32 %v1469_v53, %v4280_v59 }
 0x68d   :  { %v4299_v43 = vmul.f32 0.70710677, %v4294_v57  ;;  %v1518_v4 = vadd.f32 0.001143296, %v1517_v41  ;;  %v1482_v32 = vadd.f32 0.112945676, %v1481_v60 }
 0x68e   :  { %v1507_v63 = vadd.f32 0.00028619796, %v1506_v37  ;;  %v4344_v42 = vadd.f32 1.0, %v1445_v33 }
 0x68f   :  { %v1544_v13 = vmul.f32 %v4299_v43, %v4299_v43  ;;  %v1519_v10 = vmul.f32 %v1518_v4, %v4291_v7  ;;  %v1483_v2 = vmul.f32 %v1482_v32, %v4280_v59 }
 0x690   :  { %v1508_v55 = vmul.f32 %v1507_v63, %v4291_v7  ;;  %3536 = vrcp.f32 %v4344_v42  ;;  %vm1452_vm5 = vweird.f32 %v4344_v42 }
 0x691   :  { %v4305_v20 = vmin.f32 %v1544_v13, 16.0  ;;  %v1520_v17 = vadd.f32 0.014752088, %v1519_v10  ;;  %v1484_v62 = vadd.f32 0.4994258, %v1483_v2 }
 0x692   :  { %v1406_v14 = vpop.f32.mrf.mxu2  ;;  %v1509_v60 = vadd.f32 0.0036580483, %v1508_v55  ;;  %v1471_v2 = vadd.f32 0.05243302, %v1470_v45 }
 0x693   :  { %v1557_v29 = vmul.f32 3.8918573e-05, %v4305_v20  ;;  %v4310_v31 = vadd.f32 %v1406_v14, %v1354_v19  ;;  %v1521_v11 = vmul.f32 %v1520_v17, %v4291_v7  ;;  %v1546_v12 = vmul.f32 2.1237322e-06, %v4305_v20 }
 0x694   :  { %v1485_v41 = vmul.f32 %v1484_v62, %v4280_v59  ;;  %v1430_v14 = vmul.f32 %v1429_v49, %v4276_v25  ;;  %v1510_v34 = vmul.f32 %v1509_v60, %v4291_v7  ;;  %v1472_v49 = vmul.f32 %v1471_v2, %v4280_v59 }
 0x695   :  { %v1558_v21 = vadd.f32 0.001143296, %v1557_v29  ;;  %v4318_v56 = vmul.f32 0.70710677, %v4310_v31  ;;  %v1522_v18 = vadd.f32 0.112945676, %v1521_v11 }
 0x696   :  { %v1547_v10 = vadd.f32 0.00028619796, %v1546_v12  ;;  %v4351_v24 = vadd.f32 1.0, %v1485_v41  ;;  %v1511_v6 = vadd.f32 0.05243302, %v1510_v34 }
 0x697   :  { %v1559_v30 = vmul.f32 %v1558_v21, %v4305_v20  ;;  %v1584_v23 = vmul.f32 %v4318_v56, %v4318_v56  ;;  %v1523_v27 = vmul.f32 %v1522_v18, %v4291_v7 }
 0x698   :  { %v1548_v22 = vmul.f32 %v1547_v10, %v4305_v20  ;;  %3538 = vrcp.f32 %v4351_v24  ;;  %vm1492_vm7 = vweird.f32 %v4351_v24 }
 0x699   :  { %v1560_v16 = vadd.f32 0.014752088, %v1559_v30  ;;  %v4329_v54 = vmin.f32 %v1584_v23, 16.0  ;;  %v1524_v8 = vadd.f32 0.4994258, %v1523_v27 }
 0x69a   :  { %v1409_v35 = vpop.f32.mrf.mxu2  ;;  %v1431_v30 = vadd.f32 0.05243302, %v1430_v14  ;;  %v1549_v38 = vadd.f32 0.0036580483, %v1548_v22 }
 0x69b   :  { %v1561_v3 = vmul.f32 %v1560_v16, %v4305_v20  ;;  %v4325_v51 = vadd.f32 %v1409_v35, %v1357_v36  ;;  %v1586_v48 = vmul.f32 2.1237322e-06, %v4329_v54  ;;  %v1597_v52 = vmul.f32 3.8918573e-05, %v4329_v54 }
 0x69c   :  { %v1525_v21 = vmul.f32 %v1524_v8, %v4291_v7  ;;  %v1432_v63 = vmul.f32 %v1431_v30, %v4276_v25  ;;  %v1550_v33 = vmul.f32 %v1549_v38, %v4305_v20  ;;  %v1512_v8 = vmul.f32 %v1511_v6, %v4291_v7 }
 0x69d   :  { %v1562_v40 = vadd.f32 0.112945676, %v1561_v3  ;;  %v4333_v50 = vmul.f32 0.70710677, %v4325_v51  ;;  %v1587_v5 = vadd.f32 0.00028619796, %v1586_v48 }
 0x69e   :  { %v1598_v4 = vadd.f32 0.001143296, %v1597_v52  ;;  %v4362_v36 = vadd.f32 1.0, %v1525_v21  ;;  %v1433_v53 = vadd.f32 0.18741608, %v1432_v63 }
 0x69f   :  { %v1563_v46 = vmul.f32 %v1562_v40, %v4305_v20  ;;  %v1624_v13 = vmul.f32 %v4333_v50, %v4333_v50  ;;  %v1588_v26 = vmul.f32 %v1587_v5, %v4329_v54  ;;  %v4370_v40 = vpop.eup %3536  ;;  %v1551_v60 = vadd.f32 0.05243302, %v1550_v33 }
 0x6a0   :  { %v1599_v29 = vmul.f32 %v1598_v4, %v4329_v54  ;;  %v4378_v55 = vpop.eup %3538  ;;  %v1448_v41 = vmul.f32 %v4370_v40, %v4344_v42  ;;  %v1434_v21 = vmul.f32 %v1433_v53, %v4276_v25  ;;  %vm1532_vm1 = vweird.f32 %v4362_v36 }
 0x6a1   :  { %v1564_v0 = vadd.f32 0.4994258, %v1563_v46  ;;  %v4348_v19 = vmin.f32 %v1624_v13, 16.0  ;;  %v1589_v18 = vadd.f32 0.0036580483, %v1588_v26  ;;  %vm1493_vm0 = vweird.f32 %v4378_v55 }
 0x6a2   :  { %v1600_v28 = vadd.f32 0.014752088, %v1599_v29  ;;  %v1473_v13 = vadd.f32 0.18741608, %v1472_v49  ;;  %v1449_v26 = vsub.f32 1.0, %v1448_v41  ;;  %vm1453_vm9 = vweird.f32 %v4370_v40 }
 0x6a3   :  { %v1565_v17 = vmul.f32 %v1564_v0, %v4305_v20  ;;  %v1626_v32 = vmul.f32 2.1237322e-06, %v4348_v19  ;;  %v1637_v11 = vmul.f32 3.8918573e-05, %v4348_v19  ;;  %v1590_v46 = vmul.f32 %v1589_v18, %v4329_v54 }
 0x6a4   :  { %v1601_v37 = vmul.f32 %v1600_v28, %v4329_v54  ;;  %v1458_v28 = vand.u32 2147483648, %v4344_v42  ;;  %v1474_v30 = vmul.f32 %v1473_v13, %v4280_v59  ;;  %v4405_v18 = vadd.f32 1.1283791, %v1434_v21 }
 0x6a5   :  { %v4360_v35 = vadd.f32 1.0, %v1565_v17  ;;  %v1627_v16 = vadd.f32 0.00028619796, %v1626_v32  ;;  %v1638_v1 = vadd.f32 0.001143296, %v1637_v11  ;;  %v1488_v32 = vmul.f32 %v4378_v55, %v4351_v24 }
 0x6a6   :  { %v1602_v3 = vadd.f32 0.112945676, %v1601_v37  ;;  %v1591_v14 = vadd.f32 0.05243302, %v1590_v46  ;;  %v1513_v11 = vadd.f32 0.18741608, %v1512_v8  ;;  %v1450_v38 = vmul.f32 %v4370_v40, %v1449_v26 }
 0x6a7   :  { %v1628_v23 = vmul.f32 %v1627_v16, %v4348_v19  ;;  %v1639_v15 = vmul.f32 %v1638_v1, %v4348_v19  ;;  %3540 = vrcp.f32 %v4360_v35  ;;  %v1498_v16 = vand.u32 2147483648, %v4351_v24 }
 0x6a8   :  { %3542 = vrcp.f32 %v4362_v36  ;;  %v1603_v62 = vmul.f32 %v1602_v3, %v4329_v54  ;;  %v1592_v37 = vmul.f32 %v1591_v14, %v4329_v54  ;;  %v1552_v1 = vmul.f32 %v1551_v60, %v4305_v20 }
 0x6a9   :  { %v1640_v27 = vadd.f32 0.014752088, %v1639_v15  ;;  %v1629_v48 = vadd.f32 0.0036580483, %v1628_v23  ;;  %v1456_v3 = vand.u32 2147483647, %v4344_v42  ;;  %v1514_v63 = vmul.f32 %v1513_v11, %v4291_v7 }
 0x6aa   :  { %v1604_v12 = vadd.f32 0.4994258, %v1603_v62  ;;  %v4410_v59 = vor.u32 1.1754944e-38, %v1458_v28  ;;  %v1489_v15 = vsub.f32 1.0, %v1488_v32  ;;  %v4413_v62 = vadd.f32 1.1283791, %v1474_v30 }
 0x6ab   :  { %v1641_v52 = vmul.f32 %v1640_v27, %v4348_v19  ;;  %v1630_v29 = vmul.f32 %v1629_v48, %v4348_v19  ;;  %v1593_v49 = vadd.f32 0.18741608, %v1592_v37  ;;  %v4418_v48 = vor.u32 1.1754944e-38, %v1498_v16 }
 0x6ac   :  { %v1605_v0 = vmul.f32 %v1604_v12, %v4329_v54  ;;  %v1496_v12 = vand.u32 2147483647, %v4351_v24  ;;  %v4422_v41 = vadd.f32 %v4370_v40, %v1450_v38  ;;  %v1490_v8 = vmul.f32 %v4378_v55, %v1489_v15  ;;  %v1780_v24 = vld [vmem:[#allocation2 + $0x408] sm:$0xff] }
 0x6ad   :  { %v1642_v5 = vadd.f32 0.112945676, %v1641_v52  ;;  %v4384_v4 = vpop.eup %3540  ;;  %v1631_v2 = vadd.f32 0.05243302, %v1630_v29  ;;  %v1553_v52 = vadd.f32 0.18741608, %v1552_v1  ;;  %v1594_v60 = vmul.f32 %v1593_v49, %v4329_v54 }
 0x6ae   :  { %v4386_v10 = vpop.eup %3542  ;;  %v4388_v17 = vadd.f32 1.0, %v1605_v0  ;;  %v1568_v22 = vmul.f32 %v4384_v4, %v4360_v35  ;;  %v4428_v0 = vadd.f32 1.1283791, %v1514_v63  ;;  %v1536_v14 = vand.u32 2147483647, %v4362_v36  ;;  %v1676_v63 = vld [vmem:[%s5335_s2] sm:$0xff] }
 0x6af   :  { %v1643_v45 = vmul.f32 %v1642_v5, %v4348_v19  ;;  %v1528_v34 = vmul.f32 %v4386_v10, %v4362_v36  ;;  %v1632_v53 = vmul.f32 %v1631_v2, %v4348_v19  ;;  %vm1533_vm6 = vweird.f32 %v4386_v10 }
 0x6b0   :  { %3544 = vrcp.f32 %v4388_v17  ;;  %v1569_v6 = vsub.f32 1.0, %v1568_v22  ;;  %v1554_v21 = vmul.f32 %v1553_v52, %v4305_v20  ;;  %v1576_v28 = vand.u32 2147483647, %v4360_v35 }
 0x6b1   :  { %v1644_v25 = vadd.f32 0.4994258, %v1643_v45  ;;  %v1529_v27 = vsub.f32 1.0, %v1528_v34  ;;  %v1538_v45 = vand.u32 2147483648, %v4362_v36  ;;  %v1633_v26 = vadd.f32 0.18741608, %v1632_v53 }
 0x6b2   :  { %v1570_v5 = vmul.f32 %v4384_v4, %v1569_v6  ;;  %v1618_v11 = vand.u32 2147483648, %v4388_v17  ;;  %vm1573_vm11 = vweird.f32 %v4384_v4  ;;  %v1578_v54 = vand.u32 2147483648, %v4360_v35 }
 0x6b3   :  { %v1645_v23 = vmul.f32 %v1644_v25, %v4348_v19  ;;  %v1530_v13 = vmul.f32 %v4386_v10, %v1529_v27  ;;  %v1616_v30 = vand.u32 2147483647, %v4388_v17  ;;  %v1595_v37 = vadd.f32 1.1283791, %v1594_v60 }
 0x6b4   :  { %v1571_v22 = vadd.f32 %v4384_v4, %v1570_v5  ;;  %vm1612_vm13 = vweird.f32 %v4388_v17  ;;  %v1491_v16 = vadd.f32 %v4378_v55, %v1490_v8  ;;  %vm4450_vm4 = vcmp.eq.f32.partialorder %v1496_v12, 8.507059e+37 }
 0x6b5   :  { %v4415_v46 = vadd.f32 1.0, %v1645_v23  ;;  %v1531_v20 = vadd.f32 %v4386_v10, %v1530_v13  ;;  %vm1572_vm12 = vweird.f32 %v4360_v35  ;;  %v1634_v38 = vmul.f32 %v1633_v26, %v4348_v19  ;;  %v1785_v19 = vld [vmem:[#allocation2 + $0x430] sm:$0xff] }
 0x6b6   :  { %v3545_v33 = vpop.eup %3544  ;;  %v1555_v15 = vadd.f32 1.1283791, %v1554_v21  ;;  %vm4463_vm8 = vmor %vm1572_vm12, %vm1573_vm11  ;;  %vm4467_vm15 = vcmp.eq.f32.partialorder %v1576_v28, 8.507059e+37  ;;  %v1619_v6 = vor.u32 1.1754944e-38, %v1618_v11  ;;  %v1579_v49 = vor.u32 1.1754944e-38, %v1578_v54 }
 0x6b7   :  { %v1608_v7 = vmul.f32 %v3545_v33, %v4388_v17  ;;  %3546 = vrcp.f32 %v4415_v46  ;;  %vm1613_vm10 = vweird.f32 %v3545_v33  ;;  %v1575_v27 = vsel %vm4463_vm8, %v4384_v4, %v1571_v22 }
 0x6b8   :  { %vm4455_vm14 = vmor %vm1612_vm13, %vm1613_vm10  ;;  %vm1617_vm11 = vcmp.eq.f32.partialorder %v1616_v30, 8.507059e+37  ;;  %v1596_v52 = vmul.f32 %v1595_v37, %v4318_v56  ;;  %v1658_v36 = vand.u32 2147483648, %v4415_v46  ;;  %v1635_v4 = vadd.f32 1.1283791, %v1634_v38 }
 0x6b9   :  { %v1609_v29 = vsub.f32 1.0, %v1608_v7  ;;  %vm4477_vm10 = vmor %vm1532_vm1, %vm1533_vm6  ;;  %v1656_v5 = vand.u32 2147483647, %v4415_v46  ;;  %vm1537_vm13 = vcmp.eq.f32.partialorder %v1536_v14, 8.507059e+37  ;;  %v1580_v13 = vsel %vm4467_vm15, %v1579_v49, %v1575_v27  ;;  %v1802_v27 = vld [vmem:[#allocation2 + $0x4b8] sm:$0xff]  ;;  %v1784_v49 = vld [vmem:[#allocation2 + $0x428] sm:$0xff] }
 0x6ba   :  { %vm4493_vm1 = vmor %vm1492_vm7, %vm1493_vm0  ;;  %v1556_v60 = vmul.f32 %v1555_v15, %v4299_v43  ;;  %vm1652_vm7 = vweird.f32 %v4415_v46  ;;  %v1516_v14 = vmul.f32 %v4428_v0, %v4287_v47  ;;  %v1659_v26 = vor.u32 1.1754944e-38, %v1658_v36  ;;  %v1783_v36 = vld [vmem:[#allocation2 + $0x420] sm:$0xff]  ;;  %v1808_v7 = vld [vmem:[#allocation2 + $0x4e8] sm:$0xff] }
 0x6bb   :  { %v1610_v32 = vmul.f32 %v3545_v33, %v1609_v29  ;;  %v1495_v56 = vsel %vm4493_vm1, %v4378_v55, %v1491_v16  ;;  %vm4507_vm0 = vmor %vm1452_vm5, %vm1453_vm9  ;;  %vm1657_vm9 = vcmp.eq.f32.partialorder %v1656_v5, 8.507059e+37  ;;  %vm1457_vm5 = vcmp.eq.f32.partialorder %v1456_v3, 8.507059e+37  ;;  %v1782_v5 = vld [vmem:[#allocation2 + $0x418] sm:$0xff] }
 0x6bc   :  { %v1455_v55 = vsel %vm4507_vm0, %v4370_v40, %v4422_v41  ;;  %v1581_v28 = vmul.f32 %v1580_v13, %v1556_v60  ;;  %v1476_v43 = vmul.f32 %v4413_v62, %v4274_v61  ;;  %v1500_v40 = vsel %vm4450_vm4, %v4418_v48, %v1495_v56  ;;  %v1807_v56 = vld [vmem:[#allocation2 + $0x4e0] sm:$0xff]  ;;  %v1781_v13 = vld [vmem:[#allocation2 + $0x410] sm:$0xff] }
 0x6bd   :  { %v3547_v34 = vpop.eup %3546  ;;  %v1611_v25 = vadd.f32 %v3545_v33, %v1610_v32  ;;  %v1636_v32 = vmul.f32 %v1635_v4, %v4333_v50  ;;  %v1460_v47 = vsel %vm1457_vm5, %v4410_v59, %v1455_v55  ;;  %v1436_v50 = vmul.f32 %v4405_v18, %v4267_v39  ;;  %v1799_v4 = vld [vmem:[#allocation2 + $0x4a0] sm:$0xff] }
 0x6be   :  { %v1648_v23 = vmul.f32 %v3547_v34, %v4415_v46  ;;  %vm1653_vm6 = vweird.f32 %v3547_v34  ;;  %v1501_v54 = vmul.f32 %v1500_v40, %v1476_v43  ;;  %v3407_v42 = vclamps-f32 %v1581_v28, 1.0  ;;  %v1779_v60 = vld [vmem:[#allocation2 + $0x400] sm:$0xff]  ;;  %v1806_v28 = vld [vmem:[#allocation2 + $0x4d8] sm:$0xff]  ;;  %v1797_v43 = vld [vmem:[#allocation2 + $0x490] sm:$0xff] }
 0x6bf   :  { %v1615_v35 = vsel %vm4455_vm14, %v3545_v33, %v1611_v25  ;;  %v1535_v33 = vsel %vm4477_vm10, %v4386_v10, %v1531_v20  ;;  %v1539_v10 = vor.u32 1.1754944e-38, %v1538_v45  ;;  %vm1654_vm12 = vmor %vm1652_vm7, %vm1653_vm6  ;;  %v1461_v3 = vmul.f32 %v1460_v47, %v1436_v50  ;;  %v1805_v40 = vld [vmem:[#allocation2 + $0x4d0] sm:$0xff]  ;;  %v1791_v47 = vld [vmem:[#allocation2 + $0x460] sm:$0xff] }
 0x6c0   :  { %v1649_v12 = vsub.f32 1.0, %v1648_v23  ;;  %v1620_v53 = vsel %vm1617_vm11, %v1619_v6, %v1615_v35  ;;  %v1416_v48 = vmul.f32 0.5, %v4310_v31  ;;  %v1667_v59 = vadd.f32 1.0, %v3407_v42  ;;  %v1679_v35 = vld [vmem:[%s5335_s2 + $0x18] sm:$0xff] }
 0x6c1   :  { %v1621_v29 = vmul.f32 %v1620_v53, %v1596_v52  ;;  %v1540_v45 = vsel %vm1537_vm13, %v1539_v10, %v1535_v33  ;;  %v3405_v25 = vclamps-f32 %v1501_v54, 1.0  ;;  %v1415_v16 = vmul.f32 0.5, %v4294_v57  ;;  %v1786_v6 = vld [vmem:[#allocation2 + $0x438] sm:$0xff]  ;;  %v1801_v33 = vld [vmem:[#allocation2 + $0x4b0] sm:$0xff]  ;;  %v1800_v53 = vld [vmem:[#allocation2 + $0x4a8] sm:$0xff] }
 0x6c2   :  { %v1650_v8 = vmul.f32 %v3547_v34, %v1649_v12  ;;  %v1541_v41 = vmul.f32 %v1540_v45, %v1516_v14  ;;  %v3404_v1 = vclamps-f32 %v1461_v3, 1.0  ;;  %v1414_v2 = vmul.f32 0.5, %v4283_v44  ;;  %1854 = vmatpush.msra.mxu0 %v1786_v6  ;;  %v1810_v12 = vld [vmem:[#allocation2 + $0x4f8] sm:$0xff]  ;;  %v1809_v52 = vld [vmem:[#allocation2 + $0x4f0] sm:$0xff]  ;;  %v1795_v54 = vld [vmem:[#allocation2 + $0x480] sm:$0xff] }
 0x6c3   :  { %v3408_v22 = vclamps-f32 %v1621_v29, 1.0  ;;  %v1665_v38 = vadd.f32 1.0, %v3405_v25  ;;  %v1413_v31 = vmul.f32 0.5, %v4271_v58  ;;  %v1412_v15 = vmul.f32 0.5, %v4264_v9  ;;  %v1677_v9 = vld [vmem:[%s5335_s2 + $0x8] sm:$0xff]  ;;  %v1678_v58 = vld [vmem:[%s5335_s2 + $0x10] sm:$0xff]  ;;  %1923 = vmatpush.msrb.mxu1 %v1810_v12 }
 0x6c4   :  { %v1651_v21 = vadd.f32 %v3547_v34, %v1650_v8  ;;  %v3406_v20 = vclamps-f32 %v1541_v41, 1.0  ;;  %v1664_v57 = vadd.f32 1.0, %v3404_v1  ;;  %1855 = vmatpush.msra.mxu0 %v1785_v19  ;;  %v1818_v8 = vld [vmem:[#allocation2 + $0x538] sm:$0xff]  ;;  %v1793_v45 = vld [vmem:[#allocation2 + $0x470] sm:$0xff]  ;;  %v1796_v41 = vld [vmem:[#allocation2 + $0x488] sm:$0xff]  ;;  %vm5409_vm4 = vcmask 1040384  }
 0x6c5   :  { %v1668_v62 = vadd.f32 1.0, %v3408_v22  ;;  %v4548_v17 = vmul.f32 %v1665_v38, %v1413_v31  ;;  %1924 = vmatpush.msrb.mxu1 %v1809_v52  ;;  %1946 = vmatpush.msra.mxu2 %v1818_v8  ;;  %v1794_v29 = vld [vmem:[#allocation2 + $0x478] sm:$0xff]  ;;  %v1815_v22 = vld [vmem:[#allocation2 + $0x520] sm:$0xff]  ;;  %v1812_v25 = vld [vmem:[#allocation2 + $0x508] sm:$0xff]  ;;  %vm5410_vm14 = vcmask 523264  }
 0x6c6   :  { %v1655_v11 = vsel %vm1654_vm12, %v3547_v34, %v1651_v21  ;;  %v1417_v34 = vmul.f32 0.5, %v4325_v51  ;;  %v1666_v18 = vadd.f32 1.0, %v3406_v20  ;;  %v4540_v51 = vmul.f32 %v1667_v59, %v1415_v16  ;;  %1856 = vmatpush.msra.mxu0 %v1784_v49  ;;  %v1790_v50 = vld [vmem:[#allocation2 + $0x458] sm:$0xff]  ;;  %v1833_v20 = vld [vmem:[#allocation2 + $0x5b0] sm:$0xff]  ;;  %v1788_v59 = vld [vmem:[#allocation2 + $0x448] sm:$0xff] }
 0x6c7   :  { %v1660_v46 = vsel %vm1657_vm9, %v1659_v26, %v1655_v11  ;;  %v4536_v39 = vmul.f32 %v1668_v62, %v1416_v48  ;;  %v4551_v44 = vmul.f32 %v1664_v57, %v1412_v15  ;;  %1925 = vmatpush.msrb.mxu1 %v1808_v7  ;;  %v1798_v26 = vld [vmem:[#allocation2 + $0x498] sm:$0xff]  ;;  %v1792_v11 = vld [vmem:[#allocation2 + $0x468] sm:$0xff]  ;;  %v1813_v62 = vld [vmem:[#allocation2 + $0x510] sm:$0xff] }
 0x6c8   :  { %v1661_v0 = vmul.f32 %v1660_v46, %v1636_v32  ;;  %v4544_v23 = vmul.f32 %v1666_v18, %v1414_v2  ;;  %1857 = vmatpush.msra.mxu0 %v1783_v36  ;;  %v1817_v32 = vld [vmem:[#allocation2 + $0x530] sm:$0xff]  ;;  %v1816_v46 = vld [vmem:[#allocation2 + $0x528] sm:$0xff]  ;;  %v1814_v42 = vld [vmem:[#allocation2 + $0x518] sm:$0xff] }
 0x6c9   :  { %1926 = vmatpush.msrb.mxu1 %v1807_v56  ;;  %1947 = vmatpush.msra.mxu2 %v1817_v32  ;;  %v1834_v3 = vld [vmem:[#allocation2 + $0x5b8] sm:$0xff]  ;;  %v1841_v48 = vld [vmem:[#allocation2 + $0x5f0] sm:$0xff]  ;;  %v1832_v16 = vld [vmem:[#allocation2 + $0x5a8] sm:$0xff] }
 0x6ca   :  { %v3409_v30 = vclamps-f32 %v1661_v0, 1.0  ;;  %1858 = vmatpush.msra.mxu0 %v1782_v5  ;;  %v1804_v0 = vld [vmem:[#allocation2 + $0x4c8] sm:$0xff]  ;;  %v1787_v1 = vld [vmem:[#allocation2 + $0x440] sm:$0xff]  ;;  %v1830_v57 = vld [vmem:[#allocation2 + $0x598] sm:$0xff] }
 0x6cb   :  { %1927 = vmatpush.msrb.mxu1 %v1806_v28  ;;  %1948 = vmatpush.msra.mxu2 %v1816_v46  ;;  %v1840_v18 = vld [vmem:[#allocation2 + $0x5e8] sm:$0xff]  ;;  %v1811_v2 = vld [vmem:[#allocation2 + $0x500] sm:$0xff]  ;;  %v1838_v15 = vld [vmem:[#allocation2 + $0x5d8] sm:$0xff] }
 0x6cc   :  { %v1669_v61 = vadd.f32 1.0, %v3409_v30  ;;  %1859 = vmatpush.msra.mxu0 %v1781_v13  ;;  %v1803_v30 = vld [vmem:[#allocation2 + $0x4c0] sm:$0xff]  ;;  %v1828_v6 = vld [vmem:[#allocation2 + $0x588] sm:$0xff]  ;;  %v1826_v13 = vld [vmem:[#allocation2 + $0x578] sm:$0xff] }
 0x6cd   :  { %1928 = vmatpush.msrb.mxu1 %v1805_v40  ;;  %1949 = vmatpush.msra.mxu2 %v1815_v22  ;;  %v1831_v38 = vld [vmem:[#allocation2 + $0x5a0] sm:$0xff]  ;;  %v1836_v19 = vld [vmem:[#allocation2 + $0x5c8] sm:$0xff]  ;;  %vm5411_vm8 = vmmov %vm5409_vm4 }
 0x6ce   :  { %v4532_v37 = vmul.f32 %v1669_v61, %v1417_v34  ;;  %1860 = vmatpush.msra.mxu0 %v1780_v24  ;;  %v1842_v34 = vld [vmem:[#allocation2 + $0x5f8] sm:$0xff]  ;;  %v1789_v61 = vld [vmem:[#allocation2 + $0x450] sm:$0xff]  ;;  %v1839_v31 = vld [vmem:[#allocation2 + $0x5e0] sm:$0xff] }
 0x6cf   :  { %1929 = vmatpush.msrb.mxu1 %v1804_v0  ;;  %1950 = vmatpush.msra.mxu2 %v1814_v42  ;;  %v1827_v49 = vld [vmem:[#allocation2 + $0x580] sm:$0xff]  ;;  %vm5412_vm15 = vmmov %vm5409_vm4  ;;  %v1824_v46 = vld [vmem:[#allocation2 + $0x568] sm:$0xff] }
 0x6d0   :  { %1702 = vmatpush.msrb.mxu3 %v4532_v37  ;;  %1861 = vmatpush.msra.mxu0 %v1779_v60  ;;  %v1835_v12 = vld [vmem:[#allocation2 + $0x5c0] sm:$0xff]  ;;  %vm5413_vm10 = vmmov %vm5409_vm4 }
 0x6d1   :  { %1930 = vmatpush.msrb.mxu1 %v1803_v30  ;;  %1951 = vmatpush.msra.mxu2 %v1813_v62  ;;  %vm5414_vm11 = vmmov %vm5410_vm14 }
 0x6d2   :  { %1703 = vmatpush.msrb.mxu3 %v4536_v39  ;;  %1877 = vmatpush.msrb.mxu0 %v1794_v29  ;;  %vm5415_vm1 = vmmov %vm5414_vm11 }
 0x6d3   :  { %2015 = vmatpush.msra.mxu1 %v1842_v34  ;;  %1952 = vmatpush.msra.mxu2 %v1812_v25  ;;  %vm5416_vm6 = vmmov %vm5415_vm1  ;;  %v1819_v25 = vld [vmem:[#allocation2 + $0x540] sm:$0xff] }
 0x6d4   :  { %1704 = vmatpush.msrb.mxu3 %v4540_v51  ;;  %1878 = vmatpush.msrb.mxu0 %v1793_v45  ;;  %vm5417_vm13 = vmmov %vm5409_vm4 }
 0x6d5   :  { %2016 = vmatpush.msra.mxu1 %v1841_v48  ;;  %1953 = vmatpush.msra.mxu2 %v1811_v2  ;;  %vm5418_vm0 = vmmov %vm5415_vm1  ;;  %v1820_v48 = vld [vmem:[#allocation2 + $0x548] sm:$0xff] }
 0x6d6   :  { %1705 = vmatpush.msrb.mxu3 %v4544_v23  ;;  %1879 = vmatpush.msrb.mxu0 %v1792_v11  ;;  %vm5419_vm7 = vmmov %vm5409_vm4 }
 0x6d7   :  { %2017 = vmatpush.msra.mxu1 %v1840_v18  ;;  %vm5420_vm12 = vmmov %vm5409_vm4 }
 0x6d8   :  { %1706 = vmatpush.msrb.mxu3 %v4548_v17  ;;  %1880 = vmatpush.msrb.mxu0 %v1791_v47  ;;  %vm5421_vm9 = vmmov %vm5418_vm0 }
 0x6d9   :  { %2018 = vmatpush.msra.mxu1 %v1839_v31  ;;  %vm5422_vm5 = vmmov %vm5418_vm0 }
 0x6da   :  { %1707 = vmatpush.msrb.mxu3 %v4551_v44  ;;  %1881 = vmatpush.msrb.mxu0 %v1790_v50 }
 0x6db   :  { %3410 = vmatmul.msk.f32.vlgmr.msrb.gmra.mxu3 %vm115_vm2, %v1676_v63  ;;  %v3425_v63 = vld [vmem:[%s5338_s5 + $0x68] sm:$0xff]  ;;  %2019 = vmatpush.msra.mxu1 %v1838_v15 }
 0x6dc   :  { %1900 = vmatpush.msra.mxu3 %v1802_v27  ;;  %1882 = vmatpush.msrb.mxu0 %v1789_v61  ;;  %v3423_v27 = vld [vmem:[%s5338_s5 + $0x58] sm:$0xff]  ;;  %v1821_v61 = vld [vmem:[#allocation2 + $0x550] sm:$0xff] }
 0x6dd   :  { %2114 = vmatpush.msrb.mxu2 %v3425_v63 }
 0x6de   :  { %1901 = vmatpush.msra.mxu3 %v1801_v33  ;;  %1883 = vmatpush.msrb.mxu0 %v1788_v59  ;;  %v3422_v33 = vld [vmem:[%s5338_s5 + $0x50] sm:$0xff] }
 0x6e0   :  { %1902 = vmatpush.msra.mxu3 %v1800_v53  ;;  %1884 = vmatpush.msrb.mxu0 %v1787_v1 }
 0x6e2   :  { %1903 = vmatpush.msra.mxu3 %v1799_v4 }
 0x6e3   :  { %3411 = vmatmul.msk.f32.gmra.mxu3 %vm115_vm2, %v1677_v9  ;;  %v1829_v9 = vld [vmem:[#allocation2 + $0x590] sm:$0xff] }
 0x6e4   :  { %1904 = vmatpush.msra.mxu3 %v1798_v26 }
 0x6e6   :  { %1905 = vmatpush.msra.mxu3 %v1797_v43 }
 0x6e8   :  { %1906 = vmatpush.msra.mxu3 %v1796_v41  ;;  %v1823_v41 = vld [vmem:[#allocation2 + $0x560] sm:$0xff] }
 0x6ea   :  { %1907 = vmatpush.msra.mxu3 %v1795_v54  ;;  %v1822_v54 = vld [vmem:[#allocation2 + $0x558] sm:$0xff] }
 0x6eb   :  { %3412 = vmatmul.msk.f32.gmra.mxu3 %vm115_vm2, %v1678_v58  ;;  %v1837_v58 = vld [vmem:[#allocation2 + $0x5d0] sm:$0xff] }
 0x6ec   :  { %1992 = vmatpush.msrb.mxu3 %v1834_v3  ;;  %2020 = vmatpush.msra.mxu1 %v1837_v58 }
 0x6ee   :  { %1993 = vmatpush.msrb.mxu3 %v1833_v20  ;;  %2021 = vmatpush.msra.mxu1 %v1836_v19 }
 0x6f0   :  { %1994 = vmatpush.msrb.mxu3 %v1832_v16  ;;  %2022 = vmatpush.msra.mxu1 %v1835_v12 }
 0x6f2   :  { %1995 = vmatpush.msrb.mxu3 %v1831_v38 }
 0x6f3   :  { %3413 = vmatmul.msk.f32.gmra.mxu3 %vm115_vm2, %v1679_v35  ;;  %v3424_v35 = vld [vmem:[%s5338_s5 + $0x60] sm:$0xff] }
 0x6f4   :  { %1996 = vmatpush.msrb.mxu3 %v1830_v57  ;;  %2115 = vmatpush.msrb.mxu2 %v3424_v35 }
 0x6f6   :  { %1997 = vmatpush.msrb.mxu3 %v1829_v9  ;;  %2116 = vmatpush.msrb.mxu2 %v3423_v27 }
 0x6f8   :  { %1998 = vmatpush.msrb.mxu3 %v1828_v6  ;;  %2117 = vmatpush.msrb.mxu2 %v3422_v33 }
 0x6fa   :  { %1999 = vmatpush.msrb.mxu3 %v1827_v49 }
 0x75e   :  { %v4570_v10 = vpop.f32.mrf.mxu3 }
 0x766   :  { %v4572_v21 = vpop.f32.mrf.mxu3 }
 0x76e   :  { %v1715_v55 = vpop.f32.mrf.mxu3 }
 0x76f   :  { %1722 = vrot.lane.b32.xlu1 %v1715_v55, %s3627_s9 }
 0x776   :  { %v1718_v14 = vpop.f32.mrf.mxu3 }
 0x777   :  { %1742 = vrot.lane.b32.xlu0 %v1718_v14, %s3627_s9 }
 0x7e1   :  { %v1723_v52 = vpop.permute.xlu1 %1722 }
 0x7e2   :  { %v1725_v53 = vsel %vm161_vm3, %v4570_v10, %v1723_v52  ;;  %v1825_v10 = vld [vmem:[#allocation2 + $0x570] sm:$0xff] }
 0x7e3   :  { %v1728_v24 = vrot.slane %v1725_v53, 2  ;;  %v1729_v60 = vrot.slane %v1725_v53, 3  ;;  %v1730_v29 = vrot.slane %v1725_v53, 4  ;;  %v1727_v0 = vrot.slane %v1725_v53, 1 }
 0x7e4   :  { %v1732_v42 = vrot.slane %v1725_v53, 6  ;;  %v1733_v3 = vrot.slane %v1725_v53, 7  ;;  %v1731_v16 = vrot.slane %v1725_v53, 5 }
 0x7e9   :  { %v1743_v36 = vpop.permute.xlu0 %1742 }
 0x7ea   :  { %v1745_v7 = vsel %vm161_vm3, %v4572_v21, %v1743_v36 }
 0x7eb   :  { %v1754_v4 = vperm.slane %v1745_v7, 0  ;;  %v1748_v8 = vrot.slane %v1745_v7, 2  ;;  %v1749_v5 = vrot.slane %v1745_v7, 3  ;;  %v1750_v56 = vrot.slane %v1745_v7, 4 }
 0x7ec   :  { %v1747_v55 = vrot.slane %v1745_v7, 1  ;;  %v1752_v32 = vrot.slane %v1745_v7, 6  ;;  %v1753_v40 = vrot.slane %v1745_v7, 7  ;;  %v1751_v34 = vrot.slane %v1745_v7, 5 }
 0x7ed   :  { %v1770_v14 = vsel %vm5409_vm4, %v1725_v53, %v1754_v4  ;;  %v1756_v45 = vperm.slane %v1748_v8, 0  ;;  %v1757_v26 = vperm.slane %v1749_v5, 0  ;;  %v1758_v28 = vperm.slane %v1750_v56, 0 }
 0x7ee   :  { %3414 = vmatmul.msk.f32.vlgmr.msra.gmra.mxu0 %vm5410_vm14, %v1770_v14  ;;  %v1755_v47 = vperm.slane %v1747_v55, 0  ;;  %v1760_v22 = vperm.slane %v1752_v32, 0  ;;  %v1761_v50 = vperm.slane %v1753_v40, 0  ;;  %v1759_v59 = vperm.slane %v1751_v34, 0  ;;  %vm5423_vm14 = vmmov %vm5418_vm0  ;;  %v2071_v32 = vld [vmem:[%s5336_s3] sm:$0xff] }
 0x7ef   :  { %1969 = vmatpush.msra.mxu0 %v1826_v13  ;;  %v1772_v21 = vsel %vm5411_vm8, %v1728_v24, %v1756_v45  ;;  %v1773_v11 = vsel %vm5412_vm15, %v1729_v60, %v1757_v26  ;;  %v1774_v43 = vsel %vm5413_vm10, %v1730_v29, %v1758_v28  ;;  %vm5424_vm8 = vcmask 1041409   ;;  %v2075_v40 = vld [vmem:[%s5336_s3 + $0x20] sm:$0xff] }
 0x7f0   :  { %3416 = vmatmul.msk.f32.vlgmr.msra.gmra.mxu3 %vm5414_vm11, %v1772_v21  ;;  %3417 = vmatmul.msk.f32.vlgmr.msrb.gmra.mxu1 %vm5415_vm1, %v1773_v11  ;;  %v1771_v30 = vsel %vm5417_vm13, %v1727_v0, %v1755_v47  ;;  %v1776_v62 = vsel %vm5419_vm7, %v1732_v42, %v1760_v22  ;;  %v1777_v20 = vsel %vm5420_vm12, %v1733_v3, %v1761_v50  ;;  %vm5425_vm15 = vmmov %vm5424_vm8  ;;  %vm5426_vm10 = vcmask 1042434   ;;  %v2072_v21 = vld [vmem:[%s5336_s3 + $0x8] sm:$0xff]  ;;  %v2073_v11 = vld [vmem:[%s5336_s3 + $0x10] sm:$0xff] }
 0x7f1   :  { %3418 = vmatmul.msk.f32.vlgmr.msra.gmra.mxu2 %vm5416_vm6, %v1774_v43  ;;  %1970 = vmatpush.msra.mxu0 %v1825_v10  ;;  %v1775_v18 = vsel %vm5409_vm4, %v1731_v16, %v1759_v59  ;;  %vm5427_vm11 = vmmov %vm5426_vm10  ;;  %vm5428_vm1 = vcmask 1043459   ;;  %vm5430_vm13 = vcmask 1044484   ;;  %vm5432_vm7 = vcmask 1045509   ;;  %v2074_v43 = vld [vmem:[%s5336_s3 + $0x18] sm:$0xff] }
 0x7f2   :  { %vm5429_vm6 = vmmov %vm5428_vm1  ;;  %vm5436_vm4 = vcmask 1047559  }
 0x7f3   :  { %1971 = vmatpush.msra.mxu0 %v1824_v46  ;;  %vm5433_vm12 = vmmov %vm5432_vm7  ;;  %v2076_v46 = vld [vmem:[%s5336_s3 + $0x28] sm:$0xff] }
 0x7f5   :  { %1972 = vmatpush.msra.mxu0 %v1823_v41  ;;  %v3522_v41 = vld [vmem:[%s5338_s5 + $0x70] ss:$0 sm:$0xff] }
 0x7f6   :  { %3415 = vmatmul.msk.f32.vlgmr.msrb.gmra.mxu0 %vm5418_vm0, %v1771_v30  ;;  %vm5431_vm0 = vmmov %vm5430_vm13 }
 0x7f7   :  { %1973 = vmatpush.msra.mxu0 %v1822_v54 }
 0x7f8   :  { %3420 = vmatmul.msk.f32.vlgmr.msrb.gmra.mxu3 %vm5421_vm9, %v1776_v62  ;;  %3421 = vmatmul.msk.f32.vlgmr.msra.gmra.mxu1 %vm5422_vm5, %v1777_v20  ;;  %vm5434_vm9 = vcmask 1046534  }
 0x7f9   :  { %3427 = vmatmul.msk.f32.vlgmr.msrb.gmra.mxu2 %vm161_vm3, %v4551_v44  ;;  %1974 = vmatpush.msra.mxu0 %v1821_v61  ;;  %vm5435_vm5 = vmmov %vm5434_vm9 }
 0x7fb   :  { %1975 = vmatpush.msra.mxu0 %v1820_v48 }
 0x7fd   :  { %1976 = vmatpush.msra.mxu0 %v1819_v25 }
 0x7fe   :  { %3419 = vmatmul.msk.f32.vlgmr.msra.gmra.mxu0 %vm5423_vm14, %v1775_v18  ;;  %vm5437_vm14 = vmmov %vm5436_vm4 }
 0x801   :  { %3428 = vmatmul.msk.f32.gmra.mxu2 %vm161_vm3, %v4548_v17 }
 0x809   :  { %3429 = vmatmul.msk.f32.gmra.mxu2 %vm161_vm3, %v4544_v23 }
 0x811   :  { %3430 = vmatmul.msk.f32.gmra.mxu2 %vm161_vm3, %v4540_v51 }
 0x819   :  { %3431 = vmatmul.msk.f32.gmra.mxu2 %vm161_vm3, %v4536_v39 }
 0x821   :  { %3432 = vmatmul.msk.f32.gmra.mxu2 %vm161_vm3, %v4532_v37 }
 0x86b   :  { %v1863_v44 = vpop.f32.mrf.mxu0 }
 0x86c   :  { %v2050_v2 = vrot.slane %v1863_v44, 1 }
 0x86d   :  { %v1932_v1 = vpop.f32.mrf.mxu1 }
 0x86e   :  { %v2039_v39 = vrot.slane %v1932_v1, 5  ;;  %v2054_v58 = vrot.slane %v1932_v1, 6 }
 0x873   :  { %v1886_v38 = vpop.f32.mrf.mxu0  ;;  %v1909_v31 = vpop.f32.mrf.mxu3 }
 0x874   :  { %v2035_v57 = vrot.slane %v1886_v38, 7  ;;  %v2051_v17 = vsel %vm5424_vm8, %v1886_v38, %v2050_v2  ;;  %v2037_v15 = vrot.slane %v1909_v31, 6  ;;  %v2052_v63 = vrot.slane %v1909_v31, 7  ;;  %v1955_v35 = vpop.f32.mrf.mxu2 }
 0x875   :  { %v2024_v19 = vpop.f32.mrf.mxu1  ;;  %v2041_v27 = vrot.slane %v1955_v35, 4  ;;  %v2056_v49 = vrot.slane %v1955_v35, 5 }
 0x876   :  { %v2036_v23 = vsel %vm5425_vm15, %v2035_v57, %v1863_v44  ;;  %v2053_v9 = vsel %vm5427_vm11, %v2052_v63, %v2051_v17  ;;  %v2047_v5 = vrot.slane %v2024_v19, 1  ;;  %v2062_v56 = vrot.slane %v2024_v19, 2 }
 0x877   :  { %v2038_v51 = vsel %vm5426_vm10, %v2037_v15, %v2036_v23  ;;  %v2055_v6 = vsel %vm5429_vm6, %v2054_v58, %v2053_v9 }
 0x878   :  { %v2040_v37 = vsel %vm5428_vm1, %v2039_v39, %v2038_v51  ;;  %v2057_v8 = vsel %vm5431_vm0, %v2056_v49, %v2055_v6 }
 0x879   :  { %v2042_v4 = vsel %vm5430_vm13, %v2041_v27, %v2040_v37 }
 0x87b   :  { %v1978_v12 = vpop.f32.mrf.mxu0  ;;  %v2001_v33 = vpop.f32.mrf.mxu3 }
 0x87c   :  { %v2043_v52 = vrot.slane %v1978_v12, 3  ;;  %v2058_v53 = vrot.slane %v1978_v12, 4  ;;  %v2045_v36 = vrot.slane %v2001_v33, 2  ;;  %v2060_v7 = vrot.slane %v2001_v33, 3  ;;  %v2119_v47 = vpop.f32.mrf.mxu2 }
 0x87d   :  { %v2120_v0 = vadd.f32 %v3522_v41, %v2119_v47 }
 0x87e   :  { %v2044_v13 = vsel %vm5432_vm7, %v2043_v52, %v2042_v4  ;;  %v2059_v24 = vsel %vm5433_vm12, %v2058_v53, %v2057_v8 }
 0x87f   :  { %v2046_v60 = vsel %vm5434_vm9, %v2045_v36, %v2044_v13  ;;  %v2061_v29 = vsel %vm5435_vm5, %v2060_v7, %v2059_v24 }
 0x880   :  { %v2048_v55 = vsel %vm5436_vm4, %v2047_v5, %v2046_v60  ;;  %v2063_v14 = vsel %vm5437_vm14, %v2062_v56, %v2061_v29 }
 0x881   :  { %v3509_v45 = vpack.i.bf16 %v2048_v55, %v2063_v14 }
 0x883   :  { %3510 = vrot.lane.b32.xlu2 %v3509_v45, %s3628_s17 }
 0x884   :  { %v2122_v22 = vpop.f32.mrf.mxu2 }
 0x885   :  { %v2123_v42 = vadd.f32 %v3522_v41, %v2122_v22 }
 0x88c   :  { %v2125_v34 = vpop.f32.mrf.mxu2 }
 0x88d   :  { %v2126_v25 = vadd.f32 %v3522_v41, %v2125_v34 }
 0x894   :  { %v2128_v2 = vpop.f32.mrf.mxu2 }
 0x895   :  { %v2129_v15 = vadd.f32 %v3522_v41, %v2128_v2 }
 0x89c   :  { %v2131_v6 = vpop.f32.mrf.mxu2 }
 0x89d   :  { %v2132_v5 = vadd.f32 %v3522_v41, %v2131_v6 }
 0x8a4   :  { %v2134_v29 = vpop.f32.mrf.mxu2 }
 0x8dd   :  { %v3511_v26 = vpop.permute.xlu2 %3510 }
 0x8de   :  { %v3512_v28 = vunpack.i.l.bf16 %v3511_v26  ;;  %v3513_v10 = vunpack.i.h.bf16 %v3511_v26 }
 0x8e0   :  { %2167 = vmatpush.msrb.mxu0 %v3512_v28 }
 0x8e2   :  { %2168 = vmatpush.msrb.mxu0 %v3513_v10 }
 0x8e4   :  { %2169 = vmatpush.msrb.mxu0 %v2063_v14 }
 0x8e6   :  { %2170 = vmatpush.msrb.mxu0 %v2048_v55 }
 0x8e7   :  { %3433 = vmatmul.msk.f32.vlgmr.msrb.gmra.mxu0 %vm161_vm3, %v2071_v32 }
 0x8ef   :  { %3434 = vmatmul.msk.f32.gmra.mxu0 %vm161_vm3, %v2072_v21  ;;  %v2135_v21 = vadd.f32 %v3522_v41, %v2134_v29 }
 0x8f7   :  { %3435 = vmatmul.msk.f32.gmra.mxu0 %vm161_vm3, %v2073_v11 }
 0x8ff   :  { %3436 = vmatmul.msk.f32.gmra.mxu0 %vm161_vm3, %v2074_v43 }
 0x907   :  { %3437 = vmatmul.msk.f32.gmra.mxu0 %vm161_vm3, %v2075_v40 }
 0x90f   :  { %3438 = vmatmul.msk.f32.gmra.mxu0 %vm161_vm3, %v2076_v46 }
 0x964   :  { %v2172_v50 = vpop.f32.mrf.mxu0 }
 0x965   :  { %v4662_v54 = vadd.f32 %v2172_v50, %v2120_v0 }
 0x967   :  { %v4665_v30 = vmul.f32 0.70710677, %v4662_v54 }
 0x969   :  { %v2202_v61 = vmul.f32 %v4665_v30, %v4665_v30 }
 0x96b   :  { %v4674_v48 = vmin.f32 %v2202_v61, 16.0 }
 0x96c   :  { %v2175_v3 = vpop.f32.mrf.mxu0 }
 0x96d   :  { %v4669_v62 = vadd.f32 %v2175_v3, %v2123_v42  ;;  %v2215_v44 = vmul.f32 3.8918573e-05, %v4674_v48  ;;  %v2204_v56 = vmul.f32 2.1237322e-06, %v4674_v48 }
 0x96f   :  { %v4672_v20 = vmul.f32 0.70710677, %v4669_v62  ;;  %v2216_v57 = vadd.f32 0.001143296, %v2215_v44  ;;  %v2205_v26 = vadd.f32 0.00028619796, %v2204_v56 }
 0x971   :  { %v2242_v59 = vmul.f32 %v4672_v20, %v4672_v20  ;;  %v2217_v9 = vmul.f32 %v2216_v57, %v4674_v48  ;;  %v2206_v22 = vmul.f32 %v2205_v26, %v4674_v48 }
 0x973   :  { %v4678_v16 = vmin.f32 %v2242_v59, 16.0  ;;  %v2218_v19 = vadd.f32 0.014752088, %v2217_v9  ;;  %v2207_v2 = vadd.f32 0.0036580483, %v2206_v22 }
 0x974   :  { %v2178_v18 = vpop.f32.mrf.mxu0 }
 0x975   :  { %v4681_v1 = vadd.f32 %v2178_v18, %v2126_v25  ;;  %v2255_v38 = vmul.f32 3.8918573e-05, %v4678_v16  ;;  %v2219_v52 = vmul.f32 %v2218_v19, %v4674_v48  ;;  %v2244_v55 = vmul.f32 2.1237322e-06, %v4678_v16 }
 0x977   :  { %v4685_v31 = vmul.f32 0.70710677, %v4681_v1  ;;  %v2256_v63 = vadd.f32 0.001143296, %v2255_v38  ;;  %v2220_v13 = vadd.f32 0.112945676, %v2219_v52 }
 0x978   :  { %v2245_v46 = vadd.f32 0.00028619796, %v2244_v55 }
 0x979   :  { %v2282_v17 = vmul.f32 %v4685_v31, %v4685_v31  ;;  %v2257_v58 = vmul.f32 %v2256_v63, %v4678_v16  ;;  %v2221_v10 = vmul.f32 %v2220_v13, %v4674_v48 }
 0x97a   :  { %v2246_v59 = vmul.f32 %v2245_v46, %v4678_v16 }
 0x97b   :  { %v4689_v23 = vmin.f32 %v2282_v17, 16.0  ;;  %v2258_v27 = vadd.f32 0.014752088, %v2257_v58  ;;  %v2222_v41 = vadd.f32 0.4994258, %v2221_v10 }
 0x97c   :  { %v2181_v51 = vpop.f32.mrf.mxu0  ;;  %v2247_v58 = vadd.f32 0.0036580483, %v2246_v59 }
 0x97d   :  { %v4692_v39 = vadd.f32 %v2181_v51, %v2129_v15  ;;  %v2295_v35 = vmul.f32 3.8918573e-05, %v4689_v23  ;;  %v2259_v7 = vmul.f32 %v2258_v27, %v4678_v16  ;;  %v2284_v11 = vmul.f32 2.1237322e-06, %v4689_v23 }
 0x97e   :  { %v2223_v17 = vmul.f32 %v2222_v41, %v4674_v48  ;;  %v2248_v56 = vmul.f32 %v2247_v58, %v4678_v16 }
 0x97f   :  { %v4697_v37 = vmul.f32 0.70710677, %v4692_v39  ;;  %v2296_v49 = vadd.f32 0.001143296, %v2295_v35  ;;  %v2260_v14 = vadd.f32 0.112945676, %v2259_v7 }
 0x980   :  { %v2285_v34 = vadd.f32 0.00028619796, %v2284_v11  ;;  %v4742_v52 = vadd.f32 1.0, %v2223_v17 }
 0x981   :  { %v2322_v12 = vmul.f32 %v4697_v37, %v4697_v37  ;;  %v2297_v53 = vmul.f32 %v2296_v49, %v4689_v23  ;;  %v2261_v47 = vmul.f32 %v2260_v14, %v4678_v16 }
 0x982   :  { %v2286_v9 = vmul.f32 %v2285_v34, %v4689_v23  ;;  %3548 = vrcp.f32 %v4742_v52  ;;  %vm2230_vm6 = vweird.f32 %v4742_v52 }
 0x983   :  { %v4703_v36 = vmin.f32 %v2322_v12, 16.0  ;;  %v2298_v4 = vadd.f32 0.014752088, %v2297_v53  ;;  %v2262_v25 = vadd.f32 0.4994258, %v2261_v47 }
 0x984   :  { %v2184_v33 = vpop.f32.mrf.mxu0  ;;  %v2287_v7 = vadd.f32 0.0036580483, %v2286_v9  ;;  %v2249_v47 = vadd.f32 0.05243302, %v2248_v56 }
 0x985   :  { %v2335_v8 = vmul.f32 3.8918573e-05, %v4703_v36  ;;  %v4708_v60 = vadd.f32 %v2184_v33, %v2132_v5  ;;  %v2299_v45 = vmul.f32 %v2298_v4, %v4689_v23  ;;  %v2324_v15 = vmul.f32 2.1237322e-06, %v4703_v36 }
 0x986   :  { %v2263_v35 = vmul.f32 %v2262_v25, %v4678_v16  ;;  %v2208_v33 = vmul.f32 %v2207_v2, %v4674_v48  ;;  %v2288_v10 = vmul.f32 %v2287_v7, %v4689_v23  ;;  %v2250_v2 = vmul.f32 %v2249_v47, %v4678_v16 }
 0x987   :  { %v2336_v24 = vadd.f32 0.001143296, %v2335_v8  ;;  %v4716_v40 = vmul.f32 0.70710677, %v4708_v60  ;;  %v2300_v0 = vadd.f32 0.112945676, %v2299_v45 }
 0x988   :  { %v2325_v53 = vadd.f32 0.00028619796, %v2324_v15  ;;  %v4749_v13 = vadd.f32 1.0, %v2263_v35  ;;  %v2289_v59 = vadd.f32 0.05243302, %v2288_v10 }
 0x989   :  { %v2337_v28 = vmul.f32 %v2336_v24, %v4703_v36  ;;  %v2362_v42 = vmul.f32 %v4716_v40, %v4716_v40  ;;  %v2301_v18 = vmul.f32 %v2300_v0, %v4689_v23 }
 0x98a   :  { %v2326_v26 = vmul.f32 %v2325_v53, %v4703_v36  ;;  %3550 = vrcp.f32 %v4749_v13  ;;  %vm2270_vm11 = vweird.f32 %v4749_v13 }
 0x98b   :  { %v2338_v43 = vadd.f32 0.014752088, %v2337_v28  ;;  %v4727_v44 = vmin.f32 %v2362_v42, 16.0  ;;  %v2302_v6 = vadd.f32 0.4994258, %v2301_v18 }
 0x98c   :  { %v2187_v32 = vpop.f32.mrf.mxu0  ;;  %v2209_v28 = vadd.f32 0.05243302, %v2208_v33  ;;  %v2327_v22 = vadd.f32 0.0036580483, %v2326_v26 }
 0x98d   :  { %v2339_v50 = vmul.f32 %v2338_v43, %v4703_v36  ;;  %v4723_v3 = vadd.f32 %v2187_v32, %v2135_v21  ;;  %v2364_v63 = vmul.f32 2.1237322e-06, %v4727_v44  ;;  %v2375_v51 = vmul.f32 3.8918573e-05, %v4727_v44 }
 0x98e   :  { %v2303_v24 = vmul.f32 %v2302_v6, %v4689_v23  ;;  %v2210_v34 = vmul.f32 %v2209_v28, %v4674_v48  ;;  %v2328_v17 = vmul.f32 %v2327_v22, %v4703_v36  ;;  %v2290_v6 = vmul.f32 %v2289_v59, %v4689_v23 }
 0x98f   :  { %v2340_v61 = vadd.f32 0.112945676, %v2339_v50  ;;  %v4731_v57 = vmul.f32 0.70710677, %v4723_v3  ;;  %v2365_v27 = vadd.f32 0.00028619796, %v2364_v63 }
 0x990   :  { %v2376_v49 = vadd.f32 0.001143296, %v2375_v51  ;;  %v4760_v21 = vadd.f32 1.0, %v2303_v24  ;;  %v2211_v58 = vadd.f32 0.18741608, %v2210_v34 }
 0x991   :  { %v2341_v38 = vmul.f32 %v2340_v61, %v4703_v36  ;;  %v2402_v12 = vmul.f32 %v4731_v57, %v4731_v57  ;;  %v2366_v29 = vmul.f32 %v2365_v27, %v4727_v44  ;;  %v4768_v61 = vpop.eup %3548  ;;  %v2329_v7 = vadd.f32 0.05243302, %v2328_v17 }
 0x992   :  { %v2377_v8 = vmul.f32 %v2376_v49, %v4727_v44  ;;  %v4776_v9 = vpop.eup %3550  ;;  %v2226_v35 = vmul.f32 %v4768_v61, %v4742_v52  ;;  %v2212_v24 = vmul.f32 %v2211_v58, %v4674_v48  ;;  %vm2310_vm15 = vweird.f32 %v4760_v21 }
 0x993   :  { %v2342_v19 = vadd.f32 0.4994258, %v2341_v38  ;;  %v4746_v5 = vmin.f32 %v2402_v12, 16.0  ;;  %v2367_v0 = vadd.f32 0.0036580483, %v2366_v29  ;;  %vm2271_vm8 = vweird.f32 %v4776_v9 }
 0x994   :  { %v2378_v55 = vadd.f32 0.014752088, %v2377_v8  ;;  %v2251_v12 = vadd.f32 0.18741608, %v2250_v2  ;;  %v2227_v29 = vsub.f32 1.0, %v2226_v35  ;;  %vm2231_vm10 = vweird.f32 %v4768_v61 }
 0x995   :  { %v2343_v4 = vmul.f32 %v2342_v19, %v4703_v36  ;;  %v2404_v14 = vmul.f32 2.1237322e-06, %v4746_v5  ;;  %v2415_v45 = vmul.f32 3.8918573e-05, %v4746_v5  ;;  %v2368_v38 = vmul.f32 %v2367_v0, %v4727_v44 }
 0x996   :  { %v2379_v11 = vmul.f32 %v2378_v55, %v4727_v44  ;;  %v2236_v55 = vand.u32 2147483648, %v4742_v52  ;;  %v2252_v28 = vmul.f32 %v2251_v12, %v4678_v16  ;;  %v4803_v0 = vadd.f32 1.1283791, %v2212_v24 }
 0x997   :  { %v4758_v32 = vadd.f32 1.0, %v2343_v4  ;;  %v2405_v43 = vadd.f32 0.00028619796, %v2404_v14  ;;  %v2416_v46 = vadd.f32 0.001143296, %v2415_v45  ;;  %v2266_v14 = vmul.f32 %v4776_v9, %v4749_v13 }
 0x998   :  { %v2380_v50 = vadd.f32 0.112945676, %v2379_v11  ;;  %v2369_v33 = vadd.f32 0.05243302, %v2368_v38  ;;  %v2291_v45 = vadd.f32 0.18741608, %v2290_v6  ;;  %v2228_v22 = vmul.f32 %v4768_v61, %v2227_v29 }
 0x999   :  { %v2406_v42 = vmul.f32 %v2405_v43, %v4746_v5  ;;  %v2417_v41 = vmul.f32 %v2416_v46, %v4746_v5  ;;  %3552 = vrcp.f32 %v4758_v32  ;;  %v2276_v43 = vand.u32 2147483648, %v4749_v13 }
 0x99a   :  { %3554 = vrcp.f32 %v4760_v21  ;;  %v2381_v25 = vmul.f32 %v2380_v50, %v4727_v44  ;;  %v2370_v11 = vmul.f32 %v2369_v33, %v4727_v44  ;;  %v2330_v46 = vmul.f32 %v2329_v7, %v4703_v36 }
 0x99b   :  { %v2418_v18 = vadd.f32 0.014752088, %v2417_v41  ;;  %v2407_v63 = vadd.f32 0.0036580483, %v2406_v42  ;;  %v2234_v50 = vand.u32 2147483647, %v4742_v52  ;;  %v2292_v34 = vmul.f32 %v2291_v45, %v4689_v23 }
 0x99c   :  { %v2382_v15 = vadd.f32 0.4994258, %v2381_v25  ;;  %v4808_v16 = vor.u32 1.1754944e-38, %v2236_v55  ;;  %v2267_v41 = vsub.f32 1.0, %v2266_v14  ;;  %v4811_v25 = vadd.f32 1.1283791, %v2252_v28 }
 0x99d   :  { %v2419_v51 = vmul.f32 %v2418_v18, %v4746_v5  ;;  %v2408_v8 = vmul.f32 %v2407_v63, %v4746_v5  ;;  %v2371_v2 = vadd.f32 0.18741608, %v2370_v11  ;;  %v4816_v63 = vor.u32 1.1754944e-38, %v2276_v43 }
 0x99e   :  { %v2383_v19 = vmul.f32 %v2382_v15, %v4727_v44  ;;  %v2274_v15 = vand.u32 2147483647, %v4749_v13  ;;  %v4820_v35 = vadd.f32 %v4768_v61, %v2228_v22  ;;  %v2268_v6 = vmul.f32 %v4776_v9, %v2267_v41  ;;  %v2558_v13 = vld [vmem:[#allocation2 + $0x608] sm:$0xff] }
 0x99f   :  { %v2420_v27 = vadd.f32 0.112945676, %v2419_v51  ;;  %v4782_v49 = vpop.eup %3552  ;;  %v2409_v47 = vadd.f32 0.05243302, %v2408_v8  ;;  %v2331_v51 = vadd.f32 0.18741608, %v2330_v46  ;;  %v2372_v7 = vmul.f32 %v2371_v2, %v4727_v44 }
 0x9a0   :  { %v4784_v53 = vpop.eup %3554  ;;  %v4786_v4 = vadd.f32 1.0, %v2383_v19  ;;  %v2346_v26 = vmul.f32 %v4782_v49, %v4758_v32  ;;  %v4826_v19 = vadd.f32 1.1283791, %v2292_v34  ;;  %v2314_v33 = vand.u32 2147483647, %v4760_v21  ;;  %v2454_v34 = vld [vmem:[%s5335_s2] sm:$0xff] }
 0x9a1   :  { %v2421_v56 = vmul.f32 %v2420_v27, %v4746_v5  ;;  %v2306_v10 = vmul.f32 %v4784_v53, %v4760_v21  ;;  %v2410_v58 = vmul.f32 %v2409_v47, %v4746_v5  ;;  %vm2311_vm1 = vweird.f32 %v4784_v53 }
 0x9a2   :  { %3556 = vrcp.f32 %v4786_v4  ;;  %v2347_v59 = vsub.f32 1.0, %v2346_v26  ;;  %v2332_v24 = vmul.f32 %v2331_v51, %v4703_v36  ;;  %v2354_v55 = vand.u32 2147483647, %v4758_v32 }
 0x9a3   :  { %v2422_v48 = vadd.f32 0.4994258, %v2421_v56  ;;  %v2307_v18 = vsub.f32 1.0, %v2306_v10  ;;  %v2316_v56 = vand.u32 2147483648, %v4760_v21  ;;  %v2411_v29 = vadd.f32 0.18741608, %v2410_v58 }
 0x9a4   :  { %v2348_v27 = vmul.f32 %v4782_v49, %v2347_v59  ;;  %v2396_v45 = vand.u32 2147483648, %v4786_v4  ;;  %vm2351_vm0 = vweird.f32 %v4782_v49  ;;  %v2356_v44 = vand.u32 2147483648, %v4758_v32 }
 0x9a5   :  { %v2423_v42 = vmul.f32 %v2422_v48, %v4746_v5  ;;  %v2308_v12 = vmul.f32 %v4784_v53, %v2307_v18  ;;  %v2394_v28 = vand.u32 2147483647, %v4786_v4  ;;  %v2373_v11 = vadd.f32 1.1283791, %v2372_v7 }
 0x9a6   :  { %v2349_v26 = vadd.f32 %v4782_v49, %v2348_v27  ;;  %vm2390_vm7 = vweird.f32 %v4786_v4  ;;  %v2269_v43 = vadd.f32 %v4776_v9, %v2268_v6  ;;  %vm4848_vm12 = vcmp.eq.f32.partialorder %v2274_v15, 8.507059e+37 }
 0x9a7   :  { %v4813_v38 = vadd.f32 1.0, %v2423_v42  ;;  %v2309_v36 = vadd.f32 %v4784_v53, %v2308_v12  ;;  %vm2350_vm9 = vweird.f32 %v4758_v32  ;;  %v2412_v22 = vmul.f32 %v2411_v29, %v4746_v5  ;;  %v2563_v5 = vld [vmem:[#allocation2 + $0x630] sm:$0xff] }
 0x9a8   :  { %v3557_v17 = vpop.eup %3556  ;;  %v2333_v41 = vadd.f32 1.1283791, %v2332_v24  ;;  %vm4861_vm4 = vmor %vm2350_vm9, %vm2351_vm0  ;;  %vm4865_vm14 = vcmp.eq.f32.partialorder %v2354_v55, 8.507059e+37  ;;  %v2397_v59 = vor.u32 1.1754944e-38, %v2396_v45  ;;  %v2357_v2 = vor.u32 1.1754944e-38, %v2356_v44 }
 0x9a9   :  { %v2386_v23 = vmul.f32 %v3557_v17, %v4786_v4  ;;  %3558 = vrcp.f32 %v4813_v38  ;;  %vm2391_vm13 = vweird.f32 %v3557_v17  ;;  %v2353_v18 = vsel %vm4861_vm4, %v4782_v49, %v2349_v26 }
 0x9aa   :  { %vm4853_vm5 = vmor %vm2390_vm7, %vm2391_vm13  ;;  %vm2395_vm0 = vcmp.eq.f32.partialorder %v2394_v28, 8.507059e+37  ;;  %v2374_v51 = vmul.f32 %v2373_v11, %v4716_v40  ;;  %v2436_v21 = vand.u32 2147483648, %v4813_v38  ;;  %v2413_v49 = vadd.f32 1.1283791, %v2412_v22 }
 0x9ab   :  { %v2387_v8 = vsub.f32 1.0, %v2386_v23  ;;  %vm4875_vm13 = vmor %vm2310_vm15, %vm2311_vm1  ;;  %v2434_v27 = vand.u32 2147483647, %v4813_v38  ;;  %vm2315_vm7 = vcmp.eq.f32.partialorder %v2314_v33, 8.507059e+37  ;;  %v2358_v12 = vsel %vm4865_vm14, %v2357_v2, %v2353_v18  ;;  %v2580_v18 = vld [vmem:[#allocation2 + $0x6b8] sm:$0xff]  ;;  %v2562_v2 = vld [vmem:[#allocation2 + $0x628] sm:$0xff] }
 0x9ac   :  { %vm4891_vm15 = vmor %vm2270_vm11, %vm2271_vm8  ;;  %v2334_v7 = vmul.f32 %v2333_v41, %v4697_v37  ;;  %vm2430_vm11 = vweird.f32 %v4813_v38  ;;  %v2294_v33 = vmul.f32 %v4826_v19, %v4685_v31  ;;  %v2437_v29 = vor.u32 1.1754944e-38, %v2436_v21  ;;  %v2561_v21 = vld [vmem:[#allocation2 + $0x620] sm:$0xff]  ;;  %v2586_v23 = vld [vmem:[#allocation2 + $0x6e8] sm:$0xff] }
 0x9ad   :  { %v2388_v14 = vmul.f32 %v3557_v17, %v2387_v8  ;;  %v2273_v40 = vsel %vm4891_vm15, %v4776_v9, %v2269_v43  ;;  %vm4905_vm8 = vmor %vm2230_vm6, %vm2231_vm10  ;;  %vm2435_vm10 = vcmp.eq.f32.partialorder %v2434_v27, 8.507059e+37  ;;  %vm2235_vm6 = vcmp.eq.f32.partialorder %v2234_v50, 8.507059e+37  ;;  %v2560_v27 = vld [vmem:[#allocation2 + $0x618] sm:$0xff] }
 0x9ae   :  { %v2233_v9 = vsel %vm4905_vm8, %v4768_v61, %v4820_v35  ;;  %v2359_v55 = vmul.f32 %v2358_v12, %v2334_v7  ;;  %v2254_v37 = vmul.f32 %v4811_v25, %v4672_v20  ;;  %v2278_v61 = vsel %vm4848_vm12, %v4816_v63, %v2273_v40  ;;  %v2585_v40 = vld [vmem:[#allocation2 + $0x6e0] sm:$0xff]  ;;  %v2559_v12 = vld [vmem:[#allocation2 + $0x610] sm:$0xff] }
 0x9af   :  { %v3559_v10 = vpop.eup %3558  ;;  %v2389_v48 = vadd.f32 %v3557_v17, %v2388_v14  ;;  %v2414_v14 = vmul.f32 %v2413_v49, %v4731_v57  ;;  %v2238_v31 = vsel %vm2235_vm6, %v4808_v16, %v2233_v9  ;;  %v2214_v57 = vmul.f32 %v4803_v0, %v4665_v30  ;;  %v2577_v49 = vld [vmem:[#allocation2 + $0x6a0] sm:$0xff] }
 0x9b0   :  { %v2426_v42 = vmul.f32 %v3559_v10, %v4813_v38  ;;  %vm2431_vm1 = vweird.f32 %v3559_v10  ;;  %v2279_v44 = vmul.f32 %v2278_v61, %v2254_v37  ;;  %v3442_v52 = vclamps-f32 %v2359_v55, 1.0  ;;  %v2557_v7 = vld [vmem:[#allocation2 + $0x600] sm:$0xff]  ;;  %v2584_v55 = vld [vmem:[#allocation2 + $0x6d8] sm:$0xff]  ;;  %v2575_v37 = vld [vmem:[#allocation2 + $0x690] sm:$0xff] }
 0x9b1   :  { %v2393_v32 = vsel %vm4853_vm5, %v3557_v17, %v2389_v48  ;;  %v2313_v17 = vsel %vm4875_vm13, %v4784_v53, %v2309_v36  ;;  %v2317_v53 = vor.u32 1.1754944e-38, %v2316_v56  ;;  %vm2432_vm9 = vmor %vm2430_vm11, %vm2431_vm1  ;;  %v2239_v50 = vmul.f32 %v2238_v31, %v2214_v57  ;;  %v2583_v61 = vld [vmem:[#allocation2 + $0x6d0] sm:$0xff]  ;;  %v2569_v31 = vld [vmem:[#allocation2 + $0x660] sm:$0xff] }
 0x9b2   :  { %v2427_v15 = vsub.f32 1.0, %v2426_v42  ;;  %v2398_v58 = vsel %vm2395_vm0, %v2397_v59, %v2393_v32  ;;  %v2194_v63 = vmul.f32 0.5, %v4708_v60  ;;  %v2445_v16 = vadd.f32 1.0, %v3442_v52  ;;  %v2457_v32 = vld [vmem:[%s5335_s2 + $0x18] sm:$0xff] }
 0x9b3   :  { %v2399_v8 = vmul.f32 %v2398_v58, %v2374_v51  ;;  %v2318_v56 = vsel %vm2315_vm7, %v2317_v53, %v2313_v17  ;;  %v3440_v48 = vclamps-f32 %v2279_v44, 1.0  ;;  %v2193_v43 = vmul.f32 0.5, %v4692_v39  ;;  %v2564_v59 = vld [vmem:[#allocation2 + $0x638] sm:$0xff]  ;;  %v2579_v17 = vld [vmem:[#allocation2 + $0x6b0] sm:$0xff]  ;;  %v2578_v58 = vld [vmem:[#allocation2 + $0x6a8] sm:$0xff] }
 0x9b4   :  { %v2428_v6 = vmul.f32 %v3559_v10, %v2427_v15  ;;  %v2319_v35 = vmul.f32 %v2318_v56, %v2294_v33  ;;  %v3439_v46 = vclamps-f32 %v2239_v50, 1.0  ;;  %v2192_v47 = vmul.f32 0.5, %v4681_v1  ;;  %2632 = vmatpush.msrb.mxu1 %v2564_v59  ;;  %v2588_v15 = vld [vmem:[#allocation2 + $0x6f8] sm:$0xff]  ;;  %v2587_v51 = vld [vmem:[#allocation2 + $0x6f0] sm:$0xff]  ;;  %v2573_v44 = vld [vmem:[#allocation2 + $0x680] sm:$0xff] }
 0x9b5   :  { %v3443_v26 = vclamps-f32 %v2399_v8, 1.0  ;;  %v2443_v22 = vadd.f32 1.0, %v3440_v48  ;;  %v2191_v60 = vmul.f32 0.5, %v4669_v62  ;;  %v2190_v41 = vmul.f32 0.5, %v4662_v54  ;;  %v2455_v54 = vld [vmem:[%s5335_s2 + $0x8] sm:$0xff]  ;;  %v2456_v62 = vld [vmem:[%s5335_s2 + $0x10] sm:$0xff]  ;;  %2701 = vmatpush.msra.mxu2 %v2588_v15 }
 0x9b6   :  { %v2429_v24 = vadd.f32 %v3559_v10, %v2428_v6  ;;  %v3441_v36 = vclamps-f32 %v2319_v35, 1.0  ;;  %v2442_v39 = vadd.f32 1.0, %v3439_v46  ;;  %2633 = vmatpush.msrb.mxu1 %v2563_v5  ;;  %v2596_v6 = vld [vmem:[#allocation2 + $0x738] sm:$0xff]  ;;  %v2571_v56 = vld [vmem:[#allocation2 + $0x670] sm:$0xff]  ;;  %v2574_v35 = vld [vmem:[#allocation2 + $0x688] sm:$0xff]  ;;  %vm5453_vm12 = vcmask 523264  }
 0x9b7   :  { %v2446_v25 = vadd.f32 1.0, %v3443_v26  ;;  %v4946_v4 = vmul.f32 %v2443_v22, %v2191_v60  ;;  %2702 = vmatpush.msra.mxu2 %v2587_v51  ;;  %2724 = vmatpush.msra.mxu0 %v2596_v6  ;;  %v2572_v8 = vld [vmem:[#allocation2 + $0x678] sm:$0xff]  ;;  %v2593_v26 = vld [vmem:[#allocation2 + $0x720] sm:$0xff]  ;;  %v2590_v48 = vld [vmem:[#allocation2 + $0x708] sm:$0xff] }
 0x9b8   :  { %v2433_v45 = vsel %vm2432_vm9, %v3559_v10, %v2429_v24  ;;  %v2195_v10 = vmul.f32 0.5, %v4723_v3  ;;  %v2444_v0 = vadd.f32 1.0, %v3441_v36  ;;  %v4938_v3 = vmul.f32 %v2445_v16, %v2193_v43  ;;  %2634 = vmatpush.msrb.mxu1 %v2562_v2  ;;  %v2568_v57 = vld [vmem:[#allocation2 + $0x658] sm:$0xff]  ;;  %v2611_v36 = vld [vmem:[#allocation2 + $0x7b0] sm:$0xff]  ;;  %v2566_v16 = vld [vmem:[#allocation2 + $0x648] sm:$0xff] }
 0x9b9   :  { %v2438_v38 = vsel %vm2435_vm10, %v2437_v29, %v2433_v45  ;;  %v4934_v30 = vmul.f32 %v2446_v25, %v2194_v63  ;;  %v4949_v1 = vmul.f32 %v2442_v39, %v2190_v41  ;;  %2703 = vmatpush.msra.mxu2 %v2586_v23  ;;  %v2576_v29 = vld [vmem:[#allocation2 + $0x698] sm:$0xff]  ;;  %v2570_v45 = vld [vmem:[#allocation2 + $0x668] sm:$0xff]  ;;  %v2591_v25 = vld [vmem:[#allocation2 + $0x710] sm:$0xff] }
 0x9ba   :  { %v2439_v19 = vmul.f32 %v2438_v38, %v2414_v14  ;;  %v4942_v42 = vmul.f32 %v2444_v0, %v2192_v47  ;;  %2635 = vmatpush.msrb.mxu1 %v2561_v21  ;;  %v2595_v14 = vld [vmem:[#allocation2 + $0x730] sm:$0xff]  ;;  %v2594_v38 = vld [vmem:[#allocation2 + $0x728] sm:$0xff]  ;;  %v2592_v52 = vld [vmem:[#allocation2 + $0x718] sm:$0xff] }
 0x9bb   :  { %2704 = vmatpush.msra.mxu2 %v2585_v40  ;;  %2725 = vmatpush.msra.mxu0 %v2595_v14  ;;  %v2612_v50 = vld [vmem:[#allocation2 + $0x7b8] sm:$0xff]  ;;  %v2619_v63 = vld [vmem:[#allocation2 + $0x7f0] sm:$0xff]  ;;  %v2610_v43 = vld [vmem:[#allocation2 + $0x7a8] sm:$0xff] }
 0x9bc   :  { %v3444_v28 = vclamps-f32 %v2439_v19, 1.0  ;;  %2636 = vmatpush.msrb.mxu1 %v2560_v27  ;;  %v2582_v19 = vld [vmem:[#allocation2 + $0x6c8] sm:$0xff]  ;;  %v2565_v46 = vld [vmem:[#allocation2 + $0x640] sm:$0xff]  ;;  %v2608_v39 = vld [vmem:[#allocation2 + $0x798] sm:$0xff] }
 0x9bd   :  { %2705 = vmatpush.msra.mxu2 %v2584_v55  ;;  %2726 = vmatpush.msra.mxu0 %v2594_v38  ;;  %v2618_v0 = vld [vmem:[#allocation2 + $0x7e8] sm:$0xff]  ;;  %v2589_v47 = vld [vmem:[#allocation2 + $0x700] sm:$0xff]  ;;  %v2616_v41 = vld [vmem:[#allocation2 + $0x7d8] sm:$0xff] }
 0x9be   :  { %v2447_v20 = vadd.f32 1.0, %v3444_v28  ;;  %2637 = vmatpush.msrb.mxu1 %v2559_v12  ;;  %v2581_v28 = vld [vmem:[#allocation2 + $0x6c0] sm:$0xff]  ;;  %v2606_v59 = vld [vmem:[#allocation2 + $0x788] sm:$0xff]  ;;  %v2604_v12 = vld [vmem:[#allocation2 + $0x778] sm:$0xff] }
 0x9bf   :  { %2706 = vmatpush.msra.mxu2 %v2583_v61  ;;  %2727 = vmatpush.msra.mxu0 %v2593_v26  ;;  %v2609_v22 = vld [vmem:[#allocation2 + $0x7a0] sm:$0xff]  ;;  %v2614_v5 = vld [vmem:[#allocation2 + $0x7c8] sm:$0xff]  ;;  %vm5457_vm13 = vmmov %vm5453_vm12 }
 0x9c0   :  { %v4930_v11 = vmul.f32 %v2447_v20, %v2195_v10  ;;  %2638 = vmatpush.msrb.mxu1 %v2558_v13  ;;  %v2620_v10 = vld [vmem:[#allocation2 + $0x7f8] sm:$0xff]  ;;  %v2567_v20 = vld [vmem:[#allocation2 + $0x650] sm:$0xff]  ;;  %v2617_v60 = vld [vmem:[#allocation2 + $0x7e0] sm:$0xff] }
 0x9c1   :  { %2707 = vmatpush.msra.mxu2 %v2582_v19  ;;  %2728 = vmatpush.msra.mxu0 %v2592_v52  ;;  %v2605_v2 = vld [vmem:[#allocation2 + $0x780] sm:$0xff]  ;;  %vm5458_vm0 = vmmov %vm5453_vm12  ;;  %v2602_v38 = vld [vmem:[#allocation2 + $0x768] sm:$0xff] }
 0x9c2   :  { %2480 = vmatpush.msra.mxu3 %v4930_v11  ;;  %2639 = vmatpush.msrb.mxu1 %v2557_v7  ;;  %v2613_v15 = vld [vmem:[#allocation2 + $0x7c0] sm:$0xff]  ;;  %vm5459_vm15 = vmmov %vm5458_vm0 }
 0x9c3   :  { %2708 = vmatpush.msra.mxu2 %v2581_v28  ;;  %2729 = vmatpush.msra.mxu0 %v2591_v25  ;;  %vm5461_vm7 = vmmov %vm5458_vm0 }
 0x9c4   :  { %2481 = vmatpush.msra.mxu3 %v4934_v30  ;;  %2655 = vmatpush.msra.mxu1 %v2572_v8  ;;  %vm5464_vm9 = vmmov %vm5458_vm0 }
 0x9c5   :  { %2793 = vmatpush.msrb.mxu2 %v2620_v10  ;;  %2730 = vmatpush.msra.mxu0 %v2590_v48  ;;  %vm5465_vm10 = vmmov %vm5458_vm0  ;;  %v2597_v48 = vld [vmem:[#allocation2 + $0x740] sm:$0xff] }
 0x9c6   :  { %2482 = vmatpush.msra.mxu3 %v4938_v3  ;;  %2656 = vmatpush.msra.mxu1 %v2571_v56 }
 0x9c7   :  { %2794 = vmatpush.msrb.mxu2 %v2619_v63  ;;  %2731 = vmatpush.msra.mxu0 %v2589_v47  ;;  %v2598_v63 = vld [vmem:[#allocation2 + $0x748] sm:$0xff] }
 0x9c8   :  { %2483 = vmatpush.msra.mxu3 %v4942_v42  ;;  %2657 = vmatpush.msra.mxu1 %v2570_v45 }
 0x9c9   :  { %2795 = vmatpush.msrb.mxu2 %v2618_v0 }
 0x9ca   :  { %2484 = vmatpush.msra.mxu3 %v4946_v4  ;;  %2658 = vmatpush.msra.mxu1 %v2569_v31 }
 0x9cb   :  { %2796 = vmatpush.msrb.mxu2 %v2617_v60 }
 0x9cc   :  { %2485 = vmatpush.msra.mxu3 %v4949_v1  ;;  %2659 = vmatpush.msra.mxu1 %v2568_v57 }
 0x9cd   :  { %3445 = vmatmul.msk.f32.vlgmr.msra.gmra.mxu3 %vm115_vm2, %v2454_v34  ;;  %v3460_v34 = vld [vmem:[%s5338_s5 + $0x90] sm:$0xff]  ;;  %2797 = vmatpush.msrb.mxu2 %v2616_v41 }
 0x9ce   :  { %2678 = vmatpush.msrb.mxu3 %v2580_v18  ;;  %2660 = vmatpush.msra.mxu1 %v2567_v20  ;;  %v3458_v18 = vld [vmem:[%s5338_s5 + $0x80] sm:$0xff]  ;;  %v2599_v20 = vld [vmem:[#allocation2 + $0x750] sm:$0xff] }
 0x9cf   :  { %2892 = vmatpush.msrb.mxu0 %v3460_v34 }
 0x9d0   :  { %2679 = vmatpush.msrb.mxu3 %v2579_v17  ;;  %2661 = vmatpush.msra.mxu1 %v2566_v16  ;;  %v3457_v17 = vld [vmem:[%s5338_s5 + $0x78] sm:$0xff] }
 0x9d2   :  { %2680 = vmatpush.msrb.mxu3 %v2578_v58  ;;  %2662 = vmatpush.msra.mxu1 %v2565_v46 }
 0x9d4   :  { %2681 = vmatpush.msrb.mxu3 %v2577_v49 }
 0x9d5   :  { %3446 = vmatmul.msk.f32.gmra.mxu3 %vm115_vm2, %v2455_v54  ;;  %v2607_v54 = vld [vmem:[#allocation2 + $0x790] sm:$0xff] }
 0x9d6   :  { %2682 = vmatpush.msrb.mxu3 %v2576_v29 }
 0x9d8   :  { %2683 = vmatpush.msrb.mxu3 %v2575_v37 }
 0x9da   :  { %2684 = vmatpush.msrb.mxu3 %v2574_v35  ;;  %v2601_v35 = vld [vmem:[#allocation2 + $0x760] sm:$0xff] }
 0x9dc   :  { %2685 = vmatpush.msrb.mxu3 %v2573_v44  ;;  %v2600_v44 = vld [vmem:[#allocation2 + $0x758] sm:$0xff] }
 0x9dd   :  { %3447 = vmatmul.msk.f32.gmra.mxu3 %vm115_vm2, %v2456_v62  ;;  %v2615_v62 = vld [vmem:[#allocation2 + $0x7d0] sm:$0xff] }
 0x9de   :  { %2770 = vmatpush.msra.mxu3 %v2612_v50  ;;  %2798 = vmatpush.msrb.mxu2 %v2615_v62 }
 0x9e0   :  { %2771 = vmatpush.msra.mxu3 %v2611_v36  ;;  %2799 = vmatpush.msrb.mxu2 %v2614_v5 }
 0x9e2   :  { %2772 = vmatpush.msra.mxu3 %v2610_v43  ;;  %2800 = vmatpush.msrb.mxu2 %v2613_v15 }
 0x9e4   :  { %2773 = vmatpush.msra.mxu3 %v2609_v22 }
 0x9e5   :  { %3448 = vmatmul.msk.f32.gmra.mxu3 %vm115_vm2, %v2457_v32  ;;  %v3459_v32 = vld [vmem:[%s5338_s5 + $0x88] sm:$0xff]  ;;  %vm5452_vm2 = vcmask 1040384  }
 0x9e6   :  { %2774 = vmatpush.msra.mxu3 %v2608_v39  ;;  %2893 = vmatpush.msrb.mxu0 %v3459_v32  ;;  %vm5454_vm5 = vmmov %vm5452_vm2 }
 0x9e7   :  { %vm5455_vm4 = vmmov %vm5452_vm2 }
 0x9e8   :  { %2775 = vmatpush.msra.mxu3 %v2607_v54  ;;  %2894 = vmatpush.msrb.mxu0 %v3458_v18  ;;  %vm5456_vm14 = vmmov %vm5452_vm2 }
 0x9e9   :  { %vm5460_vm1 = vmmov %vm5452_vm2 }
 0x9ea   :  { %2776 = vmatpush.msra.mxu3 %v2606_v59  ;;  %2895 = vmatpush.msrb.mxu0 %v3457_v17  ;;  %vm5462_vm8 = vmmov %vm5460_vm1 }
 0x9eb   :  { %vm5463_vm11 = vmmov %vm5460_vm1 }
 0x9ec   :  { %2777 = vmatpush.msra.mxu3 %v2605_v2  ;;  %vm5466_vm6 = vmmov %vm5460_vm1 }
 0xa50   :  { %v4968_v53 = vpop.f32.mrf.mxu3 }
 0xa58   :  { %v4970_v24 = vpop.f32.mrf.mxu3 }
 0xa60   :  { %v2493_v9 = vpop.f32.mrf.mxu3 }
 0xa61   :  { %2500 = vrot.lane.b32.xlu1 %v2493_v9, %s3627_s9 }
 0xa68   :  { %v2496_v33 = vpop.f32.mrf.mxu3 }
 0xa69   :  { %2520 = vrot.lane.b32.xlu0 %v2496_v33, %s3627_s9 }
 0xad3   :  { %v2501_v51 = vpop.permute.xlu1 %2500 }
 0xad4   :  { %v2503_v58 = vsel %vm161_vm3, %v4968_v53, %v2501_v51  ;;  %v2603_v53 = vld [vmem:[#allocation2 + $0x770] sm:$0xff] }
 0xad5   :  { %v2506_v13 = vrot.slane %v2503_v58, 2  ;;  %v2507_v7 = vrot.slane %v2503_v58, 3  ;;  %v2508_v8 = vrot.slane %v2503_v58, 4  ;;  %v2505_v19 = vrot.slane %v2503_v58, 1 }
 0xad6   :  { %v2510_v52 = vrot.slane %v2503_v58, 6  ;;  %v2511_v50 = vrot.slane %v2503_v58, 7  ;;  %v2509_v43 = vrot.slane %v2503_v58, 5 }
 0xadb   :  { %v2521_v21 = vpop.permute.xlu0 %2520 }
 0xadc   :  { %v2523_v23 = vsel %vm161_vm3, %v4970_v24, %v2521_v21 }
 0xadd   :  { %v2532_v49 = vperm.slane %v2523_v23, 0  ;;  %v2526_v6 = vrot.slane %v2523_v23, 2  ;;  %v2527_v27 = vrot.slane %v2523_v23, 3  ;;  %v2528_v40 = vrot.slane %v2523_v23, 4 }
 0xade   :  { %v2525_v9 = vrot.slane %v2523_v23, 1  ;;  %v2530_v14 = vrot.slane %v2523_v23, 6  ;;  %v2531_v61 = vrot.slane %v2523_v23, 7  ;;  %v2529_v10 = vrot.slane %v2523_v23, 5 }
 0xadf   :  { %v2548_v33 = vsel %vm5452_vm2, %v2503_v58, %v2532_v49  ;;  %v2534_v56 = vperm.slane %v2526_v6, 0  ;;  %v2535_v29 = vperm.slane %v2527_v27, 0  ;;  %v2536_v55 = vperm.slane %v2528_v40, 0  ;;  %vm5467_vm2 = vmmov %vm5458_vm0 }
 0xae0   :  { %3449 = vmatmul.msk.f32.vlgmr.msrb.gmra.mxu1 %vm5453_vm12, %v2548_v33  ;;  %v2533_v31 = vperm.slane %v2525_v9, 0  ;;  %v2538_v26 = vperm.slane %v2530_v14, 0  ;;  %v2539_v57 = vperm.slane %v2531_v61, 0  ;;  %v2537_v16 = vperm.slane %v2529_v10, 0  ;;  %v2849_v14 = vld [vmem:[%s5336_s3] sm:$0xff]  ;;  %v2851_v61 = vld [vmem:[%s5336_s3 + $0x10] sm:$0xff] }
 0xae1   :  { %2747 = vmatpush.msrb.mxu1 %v2604_v12  ;;  %v2550_v24 = vsel %vm5454_vm5, %v2506_v13, %v2534_v56  ;;  %v2551_v45 = vsel %vm5455_vm4, %v2507_v7, %v2535_v29  ;;  %v2552_v37 = vsel %vm5456_vm14, %v2508_v8, %v2536_v55  ;;  %vm5468_vm12 = vcmask 1041409  }
 0xae2   :  { %3451 = vmatmul.msk.f32.vlgmr.msrb.gmra.mxu3 %vm5457_vm13, %v2550_v24  ;;  %3452 = vmatmul.msk.f32.vlgmr.msra.gmra.mxu2 %vm5458_vm0, %v2551_v45  ;;  %v2549_v28 = vsel %vm5460_vm1, %v2505_v19, %v2533_v31  ;;  %v2554_v25 = vsel %vm5462_vm8, %v2510_v52, %v2538_v26  ;;  %v2555_v36 = vsel %vm5463_vm11, %v2511_v50, %v2539_v57  ;;  %vm5469_vm5 = vmmov %vm5468_vm12  ;;  %vm5470_vm4 = vcmask 1042434   ;;  %v2850_v24 = vld [vmem:[%s5336_s3 + $0x8] sm:$0xff]  ;;  %v2972_v45 = vld [vmem:[%s5339_s6 + $0x18] sm:$0xff] }
 0xae3   :  { %3453 = vmatmul.msk.f32.vlgmr.msra.gmra.mxu0 %vm5459_vm15, %v2552_v37  ;;  %2748 = vmatpush.msrb.mxu1 %v2603_v53  ;;  %v2553_v0 = vsel %vm5466_vm6, %v2509_v43, %v2537_v16  ;;  %vm5471_vm14 = vmmov %vm5470_vm4  ;;  %vm5472_vm13 = vcmask 1043459   ;;  %vm5474_vm15 = vcmask 1044484   ;;  %vm5478_vm11 = vcmask 1046534   ;;  %v2971_v37 = vld [vmem:[%s5339_s6 + $0x10] sm:$0xff]  ;;  %v2853_v31 = vld [vmem:[%s5336_s3 + $0x20] sm:$0xff] }
 0xae4   :  { %vm5473_vm0 = vmmov %vm5472_vm13  ;;  %3004 = vmatpush.msrb.mxu3 %v2972_v45  ;;  %v2970_v19 = vld [vmem:[%s5339_s6 + $0x8] sm:$0xff]  ;;  %v2969_v26 = vld [vmem:[%s5339_s6] sm:$0xff]  ;;  %s3630_s6 = smov [#allocation5]  }
 0xae5   :  { %2749 = vmatpush.msrb.mxu1 %v2602_v38  ;;  %vm5475_vm1 = vmmov %vm5474_vm15  ;;  %v2852_v38 = vld [vmem:[%s5336_s3 + $0x18] sm:$0xff] }
 0xae6   :  { %3005 = vmatpush.msrb.mxu3 %v2971_v37 }
 0xae7   :  { %2750 = vmatpush.msrb.mxu1 %v2601_v35  ;;  %v2854_v35 = vld [vmem:[%s5336_s3 + $0x28] sm:$0xff] }
 0xae8   :  { %3450 = vmatmul.msk.f32.vlgmr.msra.gmra.mxu1 %vm5461_vm7, %v2549_v28  ;;  %vm5476_vm7 = vcmask 1045509   ;;  %3006 = vmatpush.msrb.mxu3 %v2970_v19 }
 0xae9   :  { %2751 = vmatpush.msrb.mxu1 %v2600_v44  ;;  %vm5477_vm8 = vmmov %vm5476_vm7  ;;  %v3523_v44 = vld [vmem:[%s5338_s5 + $0x98] ss:$0 sm:$0xff] }
 0xaea   :  { %3455 = vmatmul.msk.f32.vlgmr.msra.gmra.mxu3 %vm5464_vm9, %v2554_v25  ;;  %3456 = vmatmul.msk.f32.vlgmr.msrb.gmra.mxu2 %vm5465_vm10, %v2555_v36  ;;  %vm5479_vm9 = vmmov %vm5478_vm11  ;;  %vm5480_vm10 = vcmask 1047559  }
 0xaeb   :  { %3462 = vmatmul.msk.f32.vlgmr.msrb.gmra.mxu0 %vm161_vm3, %v4949_v1  ;;  %2752 = vmatpush.msrb.mxu1 %v2599_v20  ;;  %vm5481_vm6 = vmmov %vm5480_vm10 }
 0xaec   :  { %3007 = vmatpush.msrb.mxu3 %v2969_v26 }
 0xaed   :  { %2753 = vmatpush.msrb.mxu1 %v2598_v63 }
 0xaef   :  { %2754 = vmatpush.msrb.mxu1 %v2597_v48 }
 0xaf0   :  { %3454 = vmatmul.msk.f32.vlgmr.msrb.gmra.mxu1 %vm5467_vm2, %v2553_v0 }
 0xaf3   :  { %3463 = vmatmul.msk.f32.gmra.mxu0 %vm161_vm3, %v4946_v4 }
 0xafb   :  { %3464 = vmatmul.msk.f32.gmra.mxu0 %vm161_vm3, %v4942_v42 }
 0xb03   :  { %3465 = vmatmul.msk.f32.gmra.mxu0 %vm161_vm3, %v4938_v3 }
 0xb0b   :  { %3466 = vmatmul.msk.f32.gmra.mxu0 %vm161_vm3, %v4934_v30 }
 0xb13   :  { %3467 = vmatmul.msk.f32.gmra.mxu0 %vm161_vm3, %v4930_v11 }
 0xb5d   :  { %v2641_v1 = vpop.f32.mrf.mxu1 }
 0xb5e   :  { %v2828_v46 = vrot.slane %v2641_v1, 1 }
 0xb60   :  { %v2733_v62 = vpop.f32.mrf.mxu0 }
 0xb61   :  { %v2819_v5 = vrot.slane %v2733_v62, 4  ;;  %v2834_v18 = vrot.slane %v2733_v62, 5 }
 0xb65   :  { %v2664_v47 = vpop.f32.mrf.mxu1  ;;  %v2687_v22 = vpop.f32.mrf.mxu3 }
 0xb66   :  { %v2813_v60 = vrot.slane %v2664_v47, 7  ;;  %v2829_v39 = vsel %vm5468_vm12, %v2664_v47, %v2828_v46  ;;  %v2815_v4 = vrot.slane %v2687_v22, 6  ;;  %v2830_v41 = vrot.slane %v2687_v22, 7  ;;  %v2710_v34 = vpop.f32.mrf.mxu2 }
 0xb67   :  { %v2832_v54 = vrot.slane %v2710_v34, 6  ;;  %v2817_v32 = vrot.slane %v2710_v34, 5 }
 0xb68   :  { %v2814_v42 = vsel %vm5469_vm5, %v2813_v60, %v2641_v1  ;;  %v2831_v30 = vsel %vm5471_vm14, %v2830_v41, %v2829_v39  ;;  %v2897_v57 = vpop.f32.mrf.mxu0 }
 0xb69   :  { %v2816_v3 = vsel %vm5470_vm4, %v2815_v4, %v2814_v42  ;;  %v2833_v59 = vsel %vm5473_vm0, %v2832_v54, %v2831_v30  ;;  %v2898_v52 = vadd.f32 %v3523_v44, %v2897_v57 }
 0xb6a   :  { %v2818_v11 = vsel %vm5472_vm13, %v2817_v32, %v2816_v3  ;;  %v2835_v6 = vsel %vm5475_vm1, %v2834_v18, %v2833_v59  ;;  %v5081_v3 = vld [vmem:[%s5340_s7] sm:$0x7]  ;;  %s3326_s7 = sshll.u32 %s3630_s6, 4  ;;  %s3327_s7 = int_to_ptr.vmem [resolvable:$true] %s3326_s7 }
 0xb6b   :  { %v2820_v49 = vsel %vm5474_vm15, %v2819_v5, %v2818_v11  ;;  %v2973_v62 = vperm.slane %v5081_v3, 0 }
 0xb6d   :  { %v2756_v2 = vpop.f32.mrf.mxu1  ;;  %v2779_v15 = vpop.f32.mrf.mxu3 }
 0xb6e   :  { %v2821_v17 = vrot.slane %v2756_v2, 3  ;;  %v2836_v51 = vrot.slane %v2756_v2, 4  ;;  %v2823_v58 = vrot.slane %v2779_v15, 2  ;;  %v2838_v21 = vrot.slane %v2779_v15, 3  ;;  %v2802_v23 = vpop.f32.mrf.mxu2 }
 0xb6f   :  { %v2825_v12 = vrot.slane %v2802_v23, 1  ;;  %v2840_v13 = vrot.slane %v2802_v23, 2 }
 0xb70   :  { %v2822_v27 = vsel %vm5476_vm7, %v2821_v17, %v2820_v49  ;;  %v2837_v40 = vsel %vm5477_vm8, %v2836_v51, %v2835_v6  ;;  %v2900_v28 = vpop.f32.mrf.mxu0 }
 0xb71   :  { %v2824_v7 = vsel %vm5478_vm11, %v2823_v58, %v2822_v27  ;;  %v2839_v8 = vsel %vm5479_vm9, %v2838_v21, %v2837_v40  ;;  %v2901_v25 = vadd.f32 %v3523_v44, %v2900_v28 }
 0xb72   :  { %v2826_v9 = vsel %vm5480_vm10, %v2825_v12, %v2824_v7  ;;  %v2841_v33 = vsel %vm5481_vm6, %v2840_v13, %v2839_v8 }
 0xb73   :  { %v3514_v56 = vpack.i.bf16 %v2826_v9, %v2841_v33 }
 0xb75   :  { %3515 = vrot.lane.b32.xlu2 %v3514_v56, %s3628_s17 }
 0xb78   :  { %v2903_v20 = vpop.f32.mrf.mxu0 }
 0xb79   :  { %v2904_v16 = vadd.f32 %v3523_v44, %v2903_v20 }
 0xb80   :  { %v2906_v48 = vpop.f32.mrf.mxu0 }
 0xb81   :  { %v2907_v1 = vadd.f32 %v3523_v44, %v2906_v48 }
 0xb88   :  { %v2909_v22 = vpop.f32.mrf.mxu0 }
 0xb89   :  { %v2910_v60 = vadd.f32 %v3523_v44, %v2909_v22 }
 0xb90   :  { %v2912_v41 = vpop.f32.mrf.mxu0 }
 0xb91   :  { %v2913_v34 = vadd.f32 %v3523_v44, %v2912_v41 }
 0xbcf   :  { %v3516_v29 = vpop.permute.xlu2 %3515 }
 0xbd0   :  { %v3517_v55 = vunpack.i.l.bf16 %v3516_v29  ;;  %v3518_v53 = vunpack.i.h.bf16 %v3516_v29 }
 0xbd2   :  { %2945 = vmatpush.msra.mxu1 %v3517_v55 }
 0xbd4   :  { %2946 = vmatpush.msra.mxu1 %v3518_v53 }
 0xbd6   :  { %2947 = vmatpush.msra.mxu1 %v2841_v33 }
 0xbd8   :  { %2948 = vmatpush.msra.mxu1 %v2826_v9 }
 0xbd9   :  { %3468 = vmatmul.msk.f32.vlgmr.msra.gmra.mxu1 %vm161_vm3, %v2849_v14 }
 0xbe1   :  { %3469 = vmatmul.msk.f32.gmra.mxu1 %vm161_vm3, %v2850_v24 }
 0xbe9   :  { %3470 = vmatmul.msk.f32.gmra.mxu1 %vm161_vm3, %v2851_v61 }
 0xbf1   :  { %3471 = vmatmul.msk.f32.gmra.mxu1 %vm161_vm3, %v2852_v38 }
 0xbf9   :  { %3472 = vmatmul.msk.f32.gmra.mxu1 %vm161_vm3, %v2853_v31 }
 0xc01   :  { %3473 = vmatmul.msk.f32.gmra.mxu1 %vm161_vm3, %v2854_v35 }
 0xc56   :  { %v2950_v50 = vpop.f32.mrf.mxu1 }
 0xc57   :  { %v2951_v10 = vadd.f32 %v2950_v50, %v2898_v52 }
 0xc59   :  { %3474 = vmatmul.msk.f32.vlgmr.msrb.gmra.mxu3 %vm161_vm3, %v2951_v10 }
 0xc5e   :  { %v2953_v36 = vpop.f32.mrf.mxu1 }
 0xc5f   :  { %v2954_v63 = vadd.f32 %v2953_v36, %v2901_v25 }
 0xc61   :  { %3475 = vmatmul.msk.f32.gmra.mxu3 %vm161_vm3, %v2954_v63 }
 0xc66   :  { %v2956_v43 = vpop.f32.mrf.mxu1 }
 0xc67   :  { %v2957_v0 = vadd.f32 %v2956_v43, %v2904_v16 }
 0xc69   :  { %3476 = vmatmul.msk.f32.gmra.mxu3 %vm161_vm3, %v2957_v0 }
 0xc6e   :  { %v2959_v46 = vpop.f32.mrf.mxu1 }
 0xc6f   :  { %v2960_v47 = vadd.f32 %v2959_v46, %v2907_v1 }
 0xc71   :  { %3477 = vmatmul.msk.f32.gmra.mxu3 %vm161_vm3, %v2960_v47 }
 0xc76   :  { %v2962_v39 = vpop.f32.mrf.mxu1 }
 0xc77   :  { %v2963_v4 = vadd.f32 %v2962_v39, %v2910_v60 }
 0xc79   :  { %3478 = vmatmul.msk.f32.gmra.mxu3 %vm161_vm3, %v2963_v4 }
 0xc7e   :  { %v2965_v42 = vpop.f32.mrf.mxu1 }
 0xc7f   :  { %v2966_v54 = vadd.f32 %v2965_v42, %v2913_v34 }
 0xc81   :  { %3479 = vmatmul.msk.f32.gmra.mxu3 %vm161_vm3, %v2966_v54 }
 0xcdc   :  { %v3009_v30 = vpop.f32.mrf.mxu3 }
 0xcdd   :  { %v5084_v32 = vadd.f32 %v3009_v30, %v2973_v62 }
 0xcdf   :  { %v5087_v59 = vmul.f32 0.70710677, %v5084_v32 }
 0xce1   :  { %v3039_v2 = vmul.f32 %v5087_v59, %v5087_v59 }
 0xce3   :  { %v5098_v51 = vmin.f32 %v3039_v2, 16.0 }
 0xce4   :  { %v3012_v11 = vpop.f32.mrf.mxu3 }
 0xce5   :  { %v5089_v5 = vadd.f32 %v3012_v11, %v2973_v62  ;;  %v3052_v49 = vmul.f32 3.8918573e-05, %v5098_v51  ;;  %v3041_v43 = vmul.f32 2.1237322e-06, %v5098_v51 }
 0xce7   :  { %v5092_v18 = vmul.f32 0.70710677, %v5089_v5  ;;  %v3053_v12 = vadd.f32 0.001143296, %v3052_v49  ;;  %v3042_v41 = vadd.f32 0.00028619796, %v3041_v43 }
 0xce9   :  { %v3079_v15 = vmul.f32 %v5092_v18, %v5092_v18  ;;  %v3054_v33 = vmul.f32 %v3053_v12, %v5098_v51 }
 0xceb   :  { %v5102_v21 = vmin.f32 %v3079_v15, 16.0  ;;  %v3055_v14 = vadd.f32 0.014752088, %v3054_v33 }
 0xcec   :  { %v3015_v17 = vpop.f32.mrf.mxu3 }
 0xced   :  { %v5100_v58 = vadd.f32 %v3015_v17, %v2973_v62  ;;  %v3092_v27 = vmul.f32 3.8918573e-05, %v5102_v21  ;;  %v3056_v38 = vmul.f32 %v3055_v14, %v5098_v51  ;;  %v3081_v1 = vmul.f32 2.1237322e-06, %v5102_v21 }
 0xcef   :  { %v5105_v23 = vmul.f32 0.70710677, %v5100_v58  ;;  %v3093_v9 = vadd.f32 0.001143296, %v3092_v27  ;;  %v3057_v44 = vadd.f32 0.112945676, %v3056_v38 }
 0xcf0   :  { %v3082_v54 = vadd.f32 0.00028619796, %v3081_v1 }
 0xcf1   :  { %v3119_v6 = vmul.f32 %v5105_v23, %v5105_v23  ;;  %v3094_v55 = vmul.f32 %v3093_v9, %v5102_v21  ;;  %v3058_v16 = vmul.f32 %v3057_v44, %v5098_v51  ;;  %v3043_v9 = vmul.f32 %v3042_v41, %v5098_v51 }
 0xcf2   :  { %v3083_v33 = vmul.f32 %v3082_v54, %v5102_v21 }
 0xcf3   :  { %v5111_v13 = vmin.f32 %v3119_v6, 16.0  ;;  %v3095_v61 = vadd.f32 0.014752088, %v3094_v55  ;;  %v3059_v60 = vadd.f32 0.4994258, %v3058_v16 }
 0xcf4   :  { %v3018_v40 = vpop.f32.mrf.mxu3 }
 0xcf5   :  { %v5113_v7 = vadd.f32 %v3018_v40, %v2973_v62  ;;  %v3132_v56 = vmul.f32 3.8918573e-05, %v5111_v13  ;;  %v3096_v26 = vmul.f32 %v3095_v61, %v5102_v21  ;;  %v3121_v34 = vmul.f32 2.1237322e-06, %v5111_v13 }
 0xcf6   :  { %v3060_v17 = vmul.f32 %v3059_v60, %v5098_v51 }
 0xcf7   :  { %v5116_v8 = vmul.f32 0.70710677, %v5113_v7  ;;  %v3133_v24 = vadd.f32 0.001143296, %v3132_v56  ;;  %v3097_v20 = vadd.f32 0.112945676, %v3096_v26 }
 0xcf8   :  { %v3122_v6 = vadd.f32 0.00028619796, %v3121_v34  ;;  %v5167_v61 = vadd.f32 1.0, %v3060_v17 }
 0xcf9   :  { %v3159_v29 = vmul.f32 %v5116_v8, %v5116_v8  ;;  %v3134_v31 = vmul.f32 %v3133_v24, %v5111_v13  ;;  %v3098_v47 = vmul.f32 %v3097_v20, %v5102_v21 }
 0xcfa   :  { %v3123_v38 = vmul.f32 %v3122_v6, %v5111_v13  ;;  %3560 = vrcp.f32 %v5167_v61  ;;  %vm3067_vm10 = vweird.f32 %v5167_v61 }
 0xcfb   :  { %v5123_v45 = vmin.f32 %v3159_v29, 16.0  ;;  %v3135_v28 = vadd.f32 0.014752088, %v3134_v31  ;;  %v3099_v11 = vadd.f32 0.4994258, %v3098_v47 }
 0xcfc   :  { %v3021_v53 = vpop.f32.mrf.mxu3  ;;  %v3124_v43 = vadd.f32 0.0036580483, %v3123_v38 }
 0xcfd   :  { %v3172_v37 = vmul.f32 3.8918573e-05, %v5123_v45  ;;  %v5128_v19 = vadd.f32 %v3021_v53, %v2973_v62  ;;  %v3136_v48 = vmul.f32 %v3135_v28, %v5111_v13  ;;  %v3161_v30 = vmul.f32 2.1237322e-06, %v5123_v45 }
 0xcfe   :  { %v3100_v55 = vmul.f32 %v3099_v11, %v5102_v21  ;;  %v3044_v28 = vadd.f32 0.0036580483, %v3043_v9 }
 0xcff   :  { %v3173_v35 = vadd.f32 0.001143296, %v3172_v37  ;;  %v5133_v10 = vmul.f32 0.70710677, %v5128_v19  ;;  %v3137_v39 = vadd.f32 0.112945676, %v3136_v48 }
 0xd00   :  { %v3162_v56 = vadd.f32 0.00028619796, %v3161_v30 }
 0xd01   :  { %v3174_v57 = vmul.f32 %v3173_v35, %v5123_v45  ;;  %v3199_v36 = vmul.f32 %v5133_v10, %v5133_v10  ;;  %v3138_v49 = vmul.f32 %v3137_v39, %v5111_v13  ;;  %v3045_v39 = vmul.f32 %v3044_v28, %v5098_v51 }
 0xd02   :  { %v3163_v20 = vmul.f32 %v3162_v56, %v5123_v45 }
 0xd03   :  { %v3175_v50 = vadd.f32 0.014752088, %v3174_v57  ;;  %v5144_v46 = vmin.f32 %v3199_v36, 16.0  ;;  %v3139_v37 = vadd.f32 0.4994258, %v3138_v49 }
 0xd04   :  { %v3024_v52 = vpop.f32.mrf.mxu3  ;;  %v3164_v41 = vadd.f32 0.0036580483, %v3163_v20  ;;  %v3046_v17 = vadd.f32 0.05243302, %v3045_v39 }
 0xd05   :  { %v3176_v25 = vmul.f32 %v3175_v50, %v5123_v45  ;;  %v5138_v63 = vadd.f32 %v3024_v52, %v2973_v62  ;;  %v3212_v4 = vmul.f32 3.8918573e-05, %v5144_v46  ;;  %v3201_v62 = vmul.f32 2.1237322e-06, %v5144_v46 }
 0xd06   :  { %v3084_v52 = vadd.f32 0.0036580483, %v3083_v33  ;;  %v5173_v50 = vadd.f32 1.0, %v3100_v55  ;;  %v3165_v6 = vmul.f32 %v3164_v41, %v5123_v45 }
 0xd07   :  { %v3177_v0 = vadd.f32 0.112945676, %v3176_v25  ;;  %v5148_v22 = vmul.f32 0.70710677, %v5138_v63  ;;  %v3213_v2 = vadd.f32 0.001143296, %v3212_v4  ;;  %v3140_v25 = vmul.f32 %v3139_v37, %v5111_v13 }
 0xd08   :  { %v3202_v29 = vadd.f32 0.00028619796, %v3201_v62  ;;  %v3085_v4 = vmul.f32 %v3084_v52, %v5102_v21  ;;  %3562 = vrcp.f32 %v5173_v50  ;;  %v3125_v62 = vmul.f32 %v3124_v43, %v5111_v13 }
 0xd09   :  { %v3178_v42 = vmul.f32 %v3177_v0, %v5123_v45  ;;  %v3239_v15 = vmul.f32 %v5148_v22, %v5148_v22  ;;  %v3214_v40 = vmul.f32 %v3213_v2, %v5144_v46  ;;  %v5186_v34 = vadd.f32 1.0, %v3140_v25 }
 0xd0a   :  { %v3203_v35 = vmul.f32 %v3202_v29, %v5144_v46  ;;  %v3086_v49 = vadd.f32 0.05243302, %v3085_v4  ;;  %v3126_v29 = vadd.f32 0.05243302, %v3125_v62 }
 0xd0b   :  { %v3179_v27 = vadd.f32 0.4994258, %v3178_v42  ;;  %v5160_v12 = vmin.f32 %v3239_v15, 16.0  ;;  %v3215_v53 = vadd.f32 0.014752088, %v3214_v40  ;;  %vm3147_vm2 = vweird.f32 %v5186_v34 }
 0xd0c   :  { %v3204_v1 = vadd.f32 0.0036580483, %v3203_v35  ;;  %v3087_v38 = vmul.f32 %v3086_v49, %v5102_v21 }
 0xd0d   :  { %v3241_v14 = vmul.f32 2.1237322e-06, %v5160_v12  ;;  %v3252_v24 = vmul.f32 3.8918573e-05, %v5160_v12  ;;  %v3180_v31 = vmul.f32 %v3179_v27, %v5123_v45  ;;  %v3216_v26 = vmul.f32 %v3215_v53, %v5144_v46  ;;  %v5194_v27 = vpop.eup %3560 }
 0xd0e   :  { %v3205_v11 = vmul.f32 %v3204_v1, %v5144_v46  ;;  %v5201_v56 = vpop.eup %3562  ;;  %v3063_v37 = vmul.f32 %v5194_v27, %v5167_v61  ;;  %v3088_v43 = vadd.f32 0.18741608, %v3087_v38 }
 0xd0f   :  { %v3242_v57 = vadd.f32 0.00028619796, %v3241_v14  ;;  %v3253_v44 = vadd.f32 0.001143296, %v3252_v24  ;;  %v3217_v36 = vadd.f32 0.112945676, %v3216_v26  ;;  %v3047_v14 = vmul.f32 %v3046_v17, %v5098_v51 }
 0xd10   :  { %v5179_v0 = vadd.f32 1.0, %v3180_v31  ;;  %v3206_v55 = vadd.f32 0.05243302, %v3205_v11  ;;  %v3166_v31 = vadd.f32 0.05243302, %v3165_v6  ;;  %v3127_v26 = vmul.f32 %v3126_v29, %v5111_v13 }
 0xd11   :  { %v3243_v16 = vmul.f32 %v3242_v57, %v5160_v12  ;;  %v3254_v48 = vmul.f32 %v3253_v44, %v5160_v12  ;;  %v3218_v47 = vmul.f32 %v3217_v36, %v5144_v46  ;;  %v3103_v28 = vmul.f32 %v5201_v56, %v5173_v50 }
 0xd12   :  { %3564 = vrcp.f32 %v5179_v0  ;;  %v3207_v20 = vmul.f32 %v3206_v55, %v5144_v46  ;;  %v3048_v25 = vadd.f32 0.18741608, %v3047_v14  ;;  %v3167_v1 = vmul.f32 %v3166_v31, %v5123_v45 }
 0xd13   :  { %v3255_v60 = vadd.f32 0.014752088, %v3254_v48  ;;  %v3219_v42 = vadd.f32 0.4994258, %v3218_v47  ;;  %v3244_v54 = vadd.f32 0.0036580483, %v3243_v16  ;;  %3566 = vrcp.f32 %v5186_v34 }
 0xd14   :  { %v3064_v48 = vsub.f32 1.0, %v3063_v37  ;;  %v3104_v41 = vsub.f32 1.0, %v3103_v28  ;;  %v5228_v62 = vmul.f32 %v3048_v25, %v5098_v51  ;;  %v5231_v11 = vmul.f32 %v3088_v43, %v5102_v21 }
 0xd15   :  { %v3256_v30 = vmul.f32 %v3255_v60, %v5160_v12  ;;  %v3220_v2 = vmul.f32 %v3219_v42, %v5144_v46  ;;  %v3245_v9 = vmul.f32 %v3244_v54, %v5160_v12  ;;  %v3128_v60 = vadd.f32 0.18741608, %v3127_v26 }
 0xd16   :  { %v3208_v54 = vadd.f32 0.18741608, %v3207_v20  ;;  %v5234_v17 = vmul.f32 %v5194_v27, %v3064_v48  ;;  %v3151_v21 = vand.u32 2147483647, %v5186_v34  ;;  %vm3187_vm5 = vweird.f32 %v5179_v0 }
 0xd17   :  { %v3257_v15 = vadd.f32 0.112945676, %v3256_v30  ;;  %v5197_v40 = vadd.f32 1.0, %v3220_v2  ;;  %v3246_v35 = vadd.f32 0.05243302, %v3245_v9  ;;  %v3129_v49 = vmul.f32 %v3128_v60, %v5111_v13 }
 0xd18   :  { %v5204_v53 = vpop.eup %3564  ;;  %v3168_v2 = vadd.f32 0.18741608, %v3167_v1  ;;  %v3209_v55 = vmul.f32 %v3208_v54, %v5144_v46  ;;  %vm3108_vm13 = vweird.f32 %v5201_v56  ;;  %v3193_v28 = vand.u32 2147483648, %v5179_v0 }
 0xd19   :  { %v3258_v33 = vmul.f32 %v3257_v15, %v5160_v12  ;;  %3568 = vrcp.f32 %v5197_v40  ;;  %v5212_v44 = vpop.eup %3566  ;;  %v3183_v52 = vmul.f32 %v5204_v53, %v5179_v0  ;;  %v3247_v47 = vmul.f32 %v3246_v35, %v5160_v12 }
 0xd1a   :  { %v3143_v39 = vmul.f32 %v5212_v44, %v5186_v34  ;;  %v3233_v37 = vand.u32 2147483648, %v5197_v40  ;;  %v3169_v13 = vmul.f32 %v3168_v2, %v5123_v45  ;;  %vm3227_vm12 = vweird.f32 %v5197_v40 }
 0xd1b   :  { %v3259_v24 = vadd.f32 0.4994258, %v3258_v33  ;;  %v3184_v42 = vsub.f32 1.0, %v3183_v52  ;;  %v3248_v15 = vadd.f32 0.18741608, %v3247_v47  ;;  %v3105_v33 = vmul.f32 %v5201_v56, %v3104_v41 }
 0xd1c   :  { %v3144_v6 = vsub.f32 1.0, %v3143_v39  ;;  %vm3188_vm4 = vweird.f32 %v5204_v53  ;;  %v3191_v35 = vand.u32 2147483647, %v5179_v0  ;;  %v3234_v52 = vor.u32 1.1754944e-38, %v3233_v37 }
 0xd1d   :  { %v3260_v57 = vmul.f32 %v3259_v24, %v5160_v12  ;;  %v3185_v29 = vmul.f32 %v5204_v53, %v3184_v42  ;;  %v3231_v24 = vand.u32 2147483647, %v5197_v40  ;;  %v3249_v38 = vmul.f32 %v3248_v15, %v5160_v12  ;;  %vm5270_vm7 = vmor %vm3187_vm5, %vm3188_vm4 }
 0xd1e   :  { %v3145_v46 = vmul.f32 %v5212_v44, %v3144_v6  ;;  %v3210_v12 = vadd.f32 1.1283791, %v3209_v55  ;;  %vm3148_vm1 = vweird.f32 %v5212_v44  ;;  %v3170_v47 = vadd.f32 1.1283791, %v3169_v13 }
 0xd1f   :  { %v5219_v36 = vadd.f32 1.0, %v3260_v57  ;;  %v3569_v16 = vpop.eup %3568  ;;  %v3186_v45 = vadd.f32 %v5204_v53, %v3185_v29  ;;  %vm3232_vm0 = vcmp.eq.f32.partialorder %v3231_v24, 8.507059e+37  ;;  %v3250_v25 = vadd.f32 1.1283791, %v3249_v38 }
 0xd20   :  { %v3223_v4 = vmul.f32 %v3569_v16, %v5197_v40  ;;  %vm3228_vm3 = vweird.f32 %v3569_v16  ;;  %v3146_v1 = vadd.f32 %v5212_v44, %v3145_v46  ;;  %v3153_v42 = vand.u32 2147483648, %v5186_v34 }
 0xd21   :  { %3570 = vrcp.f32 %v5219_v36  ;;  %vm5253_vm14 = vmor %vm3227_vm12, %vm3228_vm3  ;;  %v3273_v20 = vand.u32 2147483648, %v5219_v36  ;;  %v3271_v43 = vand.u32 2147483647, %v5219_v36  ;;  %v3190_v39 = vsel %vm5270_vm7, %v5204_v53, %v3186_v45 }
 0xd22   :  { %v3224_v30 = vsub.f32 1.0, %v3223_v4  ;;  %v3211_v4 = vmul.f32 %v3210_v12, %v5133_v10  ;;  %vm3267_vm8 = vweird.f32 %v5219_v36  ;;  %vm3192_vm11 = vcmp.eq.f32.partialorder %v3191_v35, 8.507059e+37  ;;  %vm5286_vm3 = vmor %vm3147_vm2, %vm3148_vm1 }
 0xd23   :  { %v3194_v54 = vor.u32 1.1754944e-38, %v3193_v28  ;;  %v3274_v0 = vor.u32 1.1754944e-38, %v3273_v20  ;;  %v3251_v2 = vmul.f32 %v3250_v25, %v5148_v22  ;;  %vm3272_vm6 = vcmp.eq.f32.partialorder %v3271_v43, 8.507059e+37 }
 0xd24   :  { %v3225_v9 = vmul.f32 %v3569_v16, %v3224_v30  ;;  %v3130_v6 = vadd.f32 1.1283791, %v3129_v49  ;;  %v3150_v29 = vsel %vm5286_vm3, %v5212_v44, %v3146_v1  ;;  %v3171_v22 = vmul.f32 %v3170_v47, %v5116_v8 }
 0xd25   :  { %v3195_v53 = vsel %vm3192_vm11, %v3194_v54, %v3190_v39  ;;  %v3629_v49 = vmov 0   ;;  %vm3107_vm12 = vweird.f32 %v5173_v50  ;;  %v3111_v34 = vand.u32 2147483647, %v5173_v50 }
 0xd26   :  { %v3226_v14 = vadd.f32 %v3569_v16, %v3225_v9  ;;  %v3106_v9 = vadd.f32 %v5201_v56, %v3105_v33  ;;  %3519 = vset.pattern.permute.xlu0 %v3629_v49  ;;  %vm3152_vm2 = vcmp.eq.f32.partialorder %v3151_v21, 8.507059e+37  ;;  %v3196_v33 = vmul.f32 %v3195_v53, %v3171_v22  ;;  %vm5305_vm4 = vmor %vm3107_vm12, %vm3108_vm13 }
 0xd27   :  { %v3571_v51 = vpop.eup %3570  ;;  %3293 = vperm.xlu0 %3519, %v5081_v3   ;;  %v3066_v44 = vadd.f32 %v5194_v27, %v5234_v17  ;;  %vm3068_vm5 = vweird.f32 %v5194_v27  ;;  %v3090_v8 = vadd.f32 1.1283791, %v5231_v11  ;;  %v3131_v38 = vmul.f32 %v3130_v6, %v5105_v23 }
 0xd28   :  { %v3263_v31 = vmul.f32 %v3571_v51, %v5219_v36  ;;  %v3230_v40 = vsel %vm5253_vm14, %v3569_v16, %v3226_v14  ;;  %vm3268_vm15 = vweird.f32 %v3571_v51  ;;  %v3154_v14 = vor.u32 1.1754944e-38, %v3153_v42  ;;  %vm3069_vm13 = vmor %vm3067_vm10, %vm3068_vm5 }
 0xd29   :  { %v3235_v60 = vsel %vm3232_vm0, %v3234_v52, %v3230_v40  ;;  %vm3269_vm9 = vmor %vm3267_vm8, %vm3268_vm15  ;;  %v3110_v21 = vsel %vm5305_vm4, %v5201_v56, %v3106_v9  ;;  %v3071_v46 = vand.u32 2147483647, %v5167_v61  ;;  %v3073_v11 = vand.u32 2147483648, %v5167_v61 }
 0xd2a   :  { %v3264_v57 = vsub.f32 1.0, %v3263_v31  ;;  %v3236_v30 = vmul.f32 %v3235_v60, %v3211_v4  ;;  %v3032_v31 = vmul.f32 0.5, %v5138_v63  ;;  %vm3112_vm14 = vcmp.eq.f32.partialorder %v3111_v34, 8.507059e+37 }
 0xd2b   :  { %v3483_v40 = vclamps-f32 %v3196_v33, 1.0  ;;  %v3050_v23 = vadd.f32 1.1283791, %v5228_v62  ;;  %v3070_v63 = vsel %vm3069_vm13, %v5194_v27, %v3066_v44  ;;  %v3031_v28 = vmul.f32 0.5, %v5128_v19 }
 0xd2c   :  { %v3265_v48 = vmul.f32 %v3571_v51, %v3264_v57  ;;  %v3484_v37 = vclamps-f32 %v3236_v30, 1.0  ;;  %v3091_v57 = vmul.f32 %v3090_v8, %v5092_v18  ;;  %vm3072_vm0 = vcmp.eq.f32.partialorder %v3071_v46, 8.507059e+37 }
 0xd2d   :  { %v3074_v52 = vor.u32 1.1754944e-38, %v3073_v11  ;;  %v3051_v61 = vmul.f32 %v3050_v23, %v5087_v59  ;;  %v3030_v47 = vmul.f32 0.5, %v5113_v7  ;;  %v3029_v18 = vmul.f32 0.5, %v5100_v58 }
 0xd2e   :  { %v3266_v41 = vadd.f32 %v3571_v51, %v3265_v48  ;;  %v3283_v12 = vadd.f32 1.0, %v3484_v37  ;;  %v3282_v48 = vadd.f32 1.0, %v3483_v40  ;;  %v3027_v59 = vmul.f32 0.5, %v5084_v32 }
 0xd2f   :  { %v3075_v1 = vsel %vm3072_vm0, %v3074_v52, %v3070_v63  ;;  %vm3319_vm15 = vcmask 385024  }
 0xd30   :  { %v3270_v15 = vsel %vm3269_vm9, %v3571_v51, %v3266_v41  ;;  %v3113_v51 = vand.u32 2147483648, %v5173_v50  ;;  %v3155_v50 = vsel %vm3152_vm2, %v3154_v14, %v3150_v29  ;;  %v3289_v25 = vmul.f32 %v3283_v12, %v3031_v28 }
 0xd31   :  { %v3275_v36 = vsel %vm3272_vm6, %v3274_v0, %v3270_v15  ;;  %v3156_v26 = vmul.f32 %v3155_v50, %v3131_v38  ;;  %v3076_v62 = vmul.f32 %v3075_v1, %v3051_v61  ;;  %v3288_v16 = vmul.f32 %v3282_v48, %v3030_v47 }
 0xd32   :  { %v3276_v55 = vmul.f32 %v3275_v36, %v3251_v2  ;;  %v3114_v35 = vor.u32 1.1754944e-38, %v3113_v51  ;;  %v3028_v41 = vmul.f32 0.5, %v5089_v5  ;;  %v3295_v0 = vrot.slane %v5081_v3, 1 }
 0xd33   :  { %v3482_v43 = vclamps-f32 %v3156_v26, 1.0  ;;  %v3480_v4 = vclamps-f32 %v3076_v62, 1.0 }
 0xd34   :  { %v3485_v24 = vclamps-f32 %v3276_v55, 1.0  ;;  %v3115_v56 = vsel %vm3112_vm14, %v3114_v35, %v3110_v21 }
 0xd35   :  { %v3116_v20 = vmul.f32 %v3115_v56, %v3091_v57  ;;  %v3281_v27 = vadd.f32 1.0, %v3482_v43  ;;  %v3279_v54 = vadd.f32 1.0, %v3480_v4 }
 0xd36   :  { %v3284_v17 = vadd.f32 1.0, %v3485_v24 }
 0xd37   :  { %v3481_v60 = vclamps-f32 %v3116_v20, 1.0  ;;  %v3287_v19 = vmul.f32 %v3281_v27, %v3029_v18  ;;  %v3285_v7 = vmul.f32 %v3279_v54, %v3027_v59 }
 0xd38   :  { %v3290_v45 = vmul.f32 %v3284_v17, %v3032_v31 }
 0xd39   :  { %v3280_v39 = vadd.f32 1.0, %v3481_v60 }
 0xd3a   :  { %3309 = vmatpush.xpose.msrb.mxu1 %v3290_v45 }
 0xd3b   :  { %v3286_v42 = vmul.f32 %v3280_v39, %v3028_v41 }
 0xd3e   :  { %3310 = vmatpush.xpose.msrb.mxu1 %v3289_v25 }
 0xd42   :  { %3311 = vmatpush.xpose.msrb.mxu1 %v3288_v16 }
 0xd46   :  { %3312 = vmatpush.xpose.msrb.mxu1 %v3287_v19 }
 0xd4a   :  { %3313 = vmatpush.xpose.msrb.mxu1 %v3286_v42 }
 0xd4e   :  { %3314 = vmatpush.xpose.msrb.mxu1 %v3285_v7 }
 0xd51   :  { %3315 = vmatmul.f32.vlgmr.msrb.gmra.mxu1 %v3295_v0 }
 0xd99   :  { %v3294_v30 = vpop.permute.xlu0 %3293 }
 0xd9a   :  { %v3297_v2 = vrot.slane %v3294_v30, 2 }
 0xdce   :  { %v3316_v5 = vpop.f32.mrf.mxu1 }
 0xdcf   :  { %v3317_v58 = vadd.f32 %v3316_v5, %v3297_v2 }
 0xdd1   :  { %3320 = vst.msk [vmem:[#allocation5] sm:$0x1] %vm3319_vm15, %v3317_v58 }
 0xdd2   :  { %3331 = dma.vmem_to_hbm [thread:$0]  %s3327_s7, 16, %s3329_s12, [#allocation4]  }
 0xdd3   :  { %3622 = dma.done.wait [#allocation4], 16  }
 0xdd4   :  { %3623 = vsyncadd [#allocation4], 4294967280 }
 0xdd5   :  { %3336 = vsyncpa [#allocation3], 1 }
 0xdd6   :  { %3337 = vsyncpa [#allocation4], 1 }

</bundles_post_ra>
